<compile_context>
chip_gen: v5e
topology: v5e:2x2
jax: 0.10.0
libtpu: 0.0.40
codegen_flags: <defaults>
</compile_context>

<pallas_src>
import functools
import math
from typing import NamedTuple

import jax
import jax.numpy as jnp
from jax.experimental import pallas as pl
from jax.experimental.pallas import tpu as pltpu

# `beta` is an (undeclared) global temperature in the reference PyTorch code.
BETA = 10.0

_VMEM_LIMIT_BYTES = 32 * 1024 * 1024       # == default scoped VMEM on v6e/v7x, < v7x physical
_COLLAPSE_VMEM_BUDGET = 20 * 1024 * 1024   # headroom for the double-buffered p_c block


# --------------------------------------------------------------------------
# Tile-size selection
# --------------------------------------------------------------------------
def _round_up(v, m):
    return ((v + m - 1) // m) * m


def _pick_tile(dim_pad, cap):
    for cand in (512, 256, 128):
        if cand <= cap and dim_pad % cand == 0:
            return cand
    return 128


def _collapse_tiles(in_pad, out_pad, num_levels, p_itemsize, *, parallel="both"):
    """Tile sizes for the weight-collapse / fused kernels, VMEM-budgeted."""
    tkw = _pick_tile(in_pad, 256)     # IN axis (sublanes)
    tnw = _pick_tile(out_pad, 512)    # OUT axis (lanes) — keep lane-dense

    def need(tk, tn):
        # double-buffered (L, tk, tn) p_c block dominates; + output & headroom
        return 2 * num_levels * tk * tn * p_itemsize + 4 * tk * tn * 4

    while need(tkw, tnw) > _COLLAPSE_VMEM_BUDGET and (tkw > 128 or tnw > 128):
        if tkw > 128:
            tkw //= 2
        else:
            tnw //= 2

    # v7x has 2 TensorCores sharded over "parallel" grid axes: keep >= 2
    # blocks along them when the problem size allows.
    if parallel == "out":
        if out_pad // tnw < 2 and tnw > 128:
            tnw //= 2
    else:
        if (in_pad // tkw) * (out_pad // tnw) < 2:
            if tnw > 128:
                tnw //= 2
            elif tkw > 128:
                tkw //= 2
    return tkw, tnw


# --------------------------------------------------------------------------
# In-kernel collapse of the quant-level axis: (L, tk, tn) -> (tk, tn) weights
# --------------------------------------------------------------------------
def _collapse_tile(pc_ref, q_ref, *, num_levels, mode, beta):
    """f32 weight tile from the L-major p_c block (upcasts bf16 after load)."""
    f32 = jnp.float32
    if mode == "train":
        # pass 1: sum of squares over L (unrolled, pure VPU)
        p0 = pc_ref[0].astype(f32)
        sumsq = p0 * p0
        for l in range(1, num_levels):
            p = pc_ref[l].astype(f32)
            sumsq = sumsq + p * p
        inv_norm = jax.lax.rsqrt(sumsq)                      # EUP
        # pass 2: fused softmax-weighted sum over L (s_c never materialized);
        # accumulators seeded with the l=0 term.
        e0 = jnp.exp((beta * p0) * inv_norm)                 # EUP exp
        num = e0 * q_ref[0]
        den = e0
        for l in range(1, num_levels):
            e = jnp.exp((beta * pc_ref[l].astype(f32)) * inv_norm)
            num = num + e * q_ref[l]
            den = den + e
        # Exact division keeps the f32 reference check tight; the divide is
        # once per element (not per level) so it is not on the critical path.
        return num / den
    elif mode == "test":
        # argmax_L(softmax(beta * p_c / ||p_c||)) == argmax_L(p_c): positive
        # per-fiber norm + monotone softmax.  Running compare-select; the q
        # broadcast is hoisted out of the L loop (scalar select operand).
        best_p = pc_ref[0].astype(f32)
        best_q = jnp.full_like(best_p, q_ref[0])
        for l in range(1, num_levels):
            p = pc_ref[l].astype(f32)
            take = p > best_p            # strict '>' == first-max tie-breaking
            best_p = jnp.where(take, p, best_p)
            best_q = jnp.where(take, q_ref[l], best_q)
        return best_q
    else:
        raise ValueError(f'Unknown run mode "{mode}"')


# --------------------------------------------------------------------------
# Kernel 1 (large batch): collapse quant levels -> dense weight tile
# --------------------------------------------------------------------------
def _collapse_kernel(pc_ref, q_ref, w_ref, *, num_levels, mode, beta):
    w = _collapse_tile(pc_ref, q_ref, num_levels=num_levels, mode=mode, beta=beta)
    w_ref[...] = w.astype(w_ref.dtype)


# --------------------------------------------------------------------------
# Kernel 2 (large batch): tiled x @ W + bias, accumulating into the resident
# f32 output block (no scratch accumulator).
# --------------------------------------------------------------------------
def _matmul_bias_kernel(x_ref, w_ref, b_ref, o_ref):
    k = pl.program_id(2)

    @pl.when(k == 0)
    def _():
        o_ref[...] = jnp.zeros_like(o_ref)

    o_ref[...] += jnp.dot(x_ref[...], w_ref[...],
                          preferred_element_type=jnp.float32)

    @pl.when(k == pl.num_programs(2) - 1)
    def _():
        o_ref[...] = o_ref[...] + b_ref[...]


# --------------------------------------------------------------------------
# Fused kernel (small batch): collapse + matmul in one pass, W never hits HBM
# --------------------------------------------------------------------------
def _fused_kernel(x_ref, pc_ref, q_ref, b_ref, o_ref, *,
                  num_levels, mode, beta, compute_dtype):
    i = pl.program_id(1)   # IN-tile reduction index (innermost, "arbitrary")

    @pl.when(i == 0)
    def _():
        o_ref[...] = jnp.zeros_like(o_ref) + b_ref[...]   # seed with bias

    w = _collapse_tile(pc_ref, q_ref, num_levels=num_levels, mode=mode, beta=beta)
    o_ref[...] += jnp.dot(x_ref[...], w.astype(compute_dtype),
                          preferred_element_type=jnp.float32)


# --------------------------------------------------------------------------
# Parameter preparation (one-time layout plumbing; cache across forwards)
# --------------------------------------------------------------------------
class MyLinearParams(NamedTuple):
    pcl: jax.Array        # (L, IN_pad, OUT_pad), param_dtype, L-major layout
    q: jax.Array          # (L,) f32 scalar table (SMEM)
    bias: jax.Array       # (1, OUT_pad) f32
    in_features: int
    out_features: int


def prepare_params(p_c, q_level, bias, *, param_dtype=jnp.bfloat16):
    """One-time re-layout of the MyLinear parameters.

    Call once per parameter value (after an optimizer step, or once for
    inference) and reuse across forwards: this removes the per-call
    transpose+pad HBM pass over p_c, and (by default) stores p_c in bf16 to
    halve the collapse kernel's HBM read traffic.
    """
    IN, OUT, L = p_c.shape
    assert q_level.shape == (L,) and bias.shape == (OUT,)
    f32 = jnp.float32
    IN_pad = _round_up(IN, 128)
    OUT_pad = _round_up(OUT, 128)
    # L-major layout; pad with 1.0 so padded fibers have a finite softmax
    # (their x columns are zero, so they contribute nothing to the output).
    pcl = jnp.transpose(p_c.astype(f32), (2, 0, 1))
    pcl = jnp.pad(pcl, ((0, 0), (0, IN_pad - IN), (0, OUT_pad - OUT)),
                  constant_values=1.0).astype(param_dtype)
    q = q_level.astype(f32)
    b = jnp.pad(bias.astype(f32), (0, OUT_pad - OUT)).reshape(1, OUT_pad)
    return MyLinearParams(pcl=pcl, q=q, bias=b, in_features=IN, out_features=OUT)


# --------------------------------------------------------------------------
# Forward
# --------------------------------------------------------------------------
def mylinear_forward_prepared(x, params, *, mode="train", beta=BETA,
                              compute_dtype=jnp.bfloat16):
    """x: (B, IN) -> (B, OUT) f32, using pre-laid-out parameters."""
    B, IN = x.shape
    assert IN == params.in_features
    L, IN_pad, OUT_pad = params.pcl.shape
    OUT = params.out_features
    f32 = jnp.float32
    p_isz = jnp.dtype(params.pcl.dtype).itemsize
    c_isz = jnp.dtype(compute_dtype).itemsize

    B_pad8 = _round_up(B, 8)

    # ---------------- small batch: fused collapse + matmul ----------------
    if B_pad8 <= 128:
        B_pad = B_pad8
        tkw, tnw = _collapse_tiles(IN_pad, OUT_pad, L, p_isz, parallel="out")
        x_p = jnp.pad(x.astype(f32),
                      ((0, B_pad - B), (0, IN_pad - IN))).astype(compute_dtype)
        kern = functools.partial(_fused_kernel, num_levels=L, mode=mode,
                                 beta=beta, compute_dtype=compute_dtype)
        elems = IN_pad * OUT_pad
        trans = elems * (L + 1) if mode == "train" else 0
        out_pad = pl.pallas_call(
            kern,
            out_shape=jax.ShapeDtypeStruct((B_pad, OUT_pad), f32),
            grid_spec=pltpu.PrefetchScalarGridSpec(
                num_scalar_prefetch=0,
                grid=(OUT_pad // tnw, IN_pad // tkw),
                in_specs=[
                    pl.BlockSpec((B_pad, tkw), lambda j, i: (0, i)),
                    pl.BlockSpec((L, tkw, tnw), lambda j, i: (0, i, j)),
                    pl.BlockSpec(memory_space=pltpu.MemorySpace.SMEM),
                    pl.BlockSpec((1, tnw), lambda j, i: (0, j)),
                ],
                out_specs=pl.BlockSpec((B_pad, tnw), lambda j, i: (0, j)),
            ),
            compiler_params=pltpu.CompilerParams(
                dimension_semantics=("parallel", "arbitrary"),
                vmem_limit_bytes=_VMEM_LIMIT_BYTES),
            cost_estimate=pl.CostEstimate(
                flops=int(elems * 7 * L + 2 * B_pad * IN_pad * OUT_pad),
                transcendentals=int(trans),
                bytes_accessed=int(L * elems * p_isz
                                   + B_pad * IN_pad * c_isz * (OUT_pad // tnw)
                                   + 4 * B_pad * OUT_pad + 4 * OUT_pad + 4 * L)),
        )(x_p, params.pcl, params.q, params.bias)
        return out_pad[:B, :OUT]

    # ---------------- large batch: collapse -> W, then tiled matmul --------
    # Kernel 1: collapse quant levels into the dense weight matrix (compute dtype).
    tkw, tnw = _collapse_tiles(IN_pad, OUT_pad, L, p_isz, parallel="both")
    collapse = functools.partial(_collapse_kernel, num_levels=L, mode=mode, beta=beta)
    elems = IN_pad * OUT_pad
    trans = elems * (L + 1) if mode == "train" else 0
    w = pl.pallas_call(
        collapse,
        out_shape=jax.ShapeDtypeStruct((IN_pad, OUT_pad), compute_dtype),
        grid_spec=pltpu.PrefetchScalarGridSpec(
            num_scalar_prefetch=0,
            grid=(IN_pad // tkw, OUT_pad // tnw),
            in_specs=[
                pl.BlockSpec((L, tkw, tnw), lambda i, j: (0, i, j)),
                pl.BlockSpec(memory_space=pltpu.MemorySpace.SMEM),
            ],
            out_specs=pl.BlockSpec((tkw, tnw), lambda i, j: (i, j)),
        ),
        compiler_params=pltpu.CompilerParams(
            dimension_semantics=("parallel", "parallel"),
            vmem_limit_bytes=_VMEM_LIMIT_BYTES),
        cost_estimate=pl.CostEstimate(
            flops=int(elems * 7 * L),
            transcendentals=int(trans),
            bytes_accessed=int(L * elems * p_isz + elems * c_isz + 4 * L)),
    )(params.pcl, params.q)

    # Kernel 2: tiled x @ W + bias, f32 output block as accumulator.
    tm = min((512, 256, 128), key=lambda t: (_round_up(B_pad8, t), -t))
    B_pad = _round_up(B_pad8, tm)
    tk = _pick_tile(IN_pad, 256)
    tn = _pick_tile(OUT_pad, 512)
    # v7x megacore: keep >= 2 blocks along the parallel axes when possible.
    if (B_pad // tm) * (OUT_pad // tn) < 2:
        if tm > 128:
            tm //= 2
        elif tn > 128:
            tn //= 2

    x_p = jnp.pad(x.astype(f32),
                  ((0, B_pad - B), (0, IN_pad - IN))).astype(compute_dtype)
    out_pad = pl.pallas_call(
        _matmul_bias_kernel,
        out_shape=jax.ShapeDtypeStruct((B_pad, OUT_pad), f32),
        grid_spec=pltpu.PrefetchScalarGridSpec(
            num_scalar_prefetch=0,
            grid=(B_pad // tm, OUT_pad // tn, IN_pad // tk),
            in_specs=[
                pl.BlockSpec((tm, tk), lambda i, j, k: (i, k)),
                pl.BlockSpec((tk, tn), lambda i, j, k: (k, j)),
                pl.BlockSpec((1, tn), lambda i, j, k: (0, j)),
            ],
            out_specs=pl.BlockSpec((tm, tn), lambda i, j, k: (i, j)),
        ),
        compiler_params=pltpu.CompilerParams(
            dimension_semantics=("parallel", "parallel", "arbitrary"),
            vmem_limit_bytes=_VMEM_LIMIT_BYTES),
        cost_estimate=pl.CostEstimate(
            flops=int(2 * B_pad * IN_pad * OUT_pad + B_pad * OUT_pad),
            transcendentals=0,
            bytes_accessed=int(B_pad * IN_pad * c_isz
                               + (B_pad // tm) * IN_pad * OUT_pad * c_isz
                               + 4 * OUT_pad + 4 * B_pad * OUT_pad)),
    )(x_p, w, params.bias)
    return out_pad[:B, :OUT]


def mylinear_forward(x, p_c, q_level, bias, *, mode="train", beta=BETA,
                     param_dtype=jnp.bfloat16, compute_dtype=jnp.bfloat16):
    """Convenience wrapper: PyTorch-layout params, prepared per call.

    For production, call `prepare_params` once and reuse the result with
    `mylinear_forward_prepared` (avoids re-paying the p_c transpose+pad HBM
    pass on every forward).
    """
    params = prepare_params(p_c, q_level, bias, param_dtype=param_dtype)
    return mylinear_forward_prepared(x, params, mode=mode, beta=beta,
                                     compute_dtype=compute_dtype)


# --------------------------------------------------------------------------
# Pure-JAX reference (replica of the PyTorch forward) + param init
# --------------------------------------------------------------------------
def _reference_forward(x, p_c, q_level, bias, *, mode="train", beta=BETA):
    p_c_norm = jnp.sqrt(jnp.sum(p_c ** 2, axis=-1, keepdims=True))
    p_c_normal = p_c / p_c_norm
    e = jnp.exp(beta * p_c_normal)
    s_c = e / jnp.sum(e, axis=-1, keepdims=True)
    if mode == "train":
        w = jnp.matmul(s_c, q_level)
    elif mode == "test":
        w = q_level[jnp.argmax(s_c, axis=-1)]
    else:
        raise ValueError(mode)
    return jnp.matmul(x, w) + bias


def init_params(key, in_feature, out_feature, num_level_fc, prim_init="uniform"):
    """Deterministic re-implementation of MyLinear.__init__/reset_parameters."""
    k_pc, k_q, k_b = jax.random.split(key, 3)
    if prim_init == "uniform":
        p_c = jax.random.uniform(k_pc, (in_feature, out_feature, num_level_fc),
                                 dtype=jnp.float32)
    elif prim_init == "normal":
        p_c = jax.random.normal(k_pc, (in_feature, out_feature, num_level_fc),
                                dtype=jnp.float32)
    else:
        raise ValueError(prim_init)

    fan_in = in_feature
    a = math.sqrt(5.0)
    gain = math.sqrt(2.0 / (1.0 + a ** 2))
    std = gain / math.sqrt(fan_in)
    bound_q = math.sqrt(3.0) * std
    q_level = jax.random.uniform(k_q, (num_level_fc,), dtype=jnp.float32,
                                 minval=-bound_q, maxval=bound_q)
    bound_b = 1.0 / math.sqrt(fan_in)
    bias = jax.random.uniform(k_b, (out_feature,), dtype=jnp.float32,
                              minval=-bound_b, maxval=bound_b)
    return p_c, q_level, bias


if __name__ == "__main__":
    # Small shapes consistent with the module: in=32, out=32, 8 quant levels.
    B, IN, OUT, L = 8, 32, 32, 8

    key = jax.random.PRNGKey(0)
    k_params, k_x, k_x2 = jax.random.split(key, 3)
    p_c, q_level, bias = init_params(k_params, IN, OUT, L, prim_init="uniform")
    x = jax.random.normal(k_x, (B, IN), dtype=jnp.float32)

    # --- f32 debug path, small batch (fused kernel): exact parity ----------
    for mode in ("train", "test"):
        out = jax.block_until_ready(mylinear_forward(
            x, p_c, q_level, bias, mode=mode,
            param_dtype=jnp.float32, compute_dtype=jnp.float32))
        ref = _reference_forward(x, p_c, q_level, bias, mode=mode)
        assert out.shape == (B, OUT)
        assert jnp.allclose(out, ref, rtol=1e-4, atol=1e-4), \
            f"{mode}-mode (f32, fused path) mismatch vs reference"

    # --- f32 debug path, larger batch: exercises collapse + matmul path ----
    B2 = 256
    x2 = jax.random.normal(k_x2, (B2, IN), dtype=jnp.float32)
    for mode in ("train", "test"):
        out = jax.block_until_ready(mylinear_forward(
            x2, p_c, q_level, bias, mode=mode,
            param_dtype=jnp.float32, compute_dtype=jnp.float32))
        ref = _reference_forward(x2, p_c, q_level, bias, mode=mode)
        assert out.shape == (B2, OUT)
        assert jnp.allclose(out, ref, rtol=1e-4, atol=1e-4), \
            f"{mode}-mode (f32, two-pass path) mismatch vs reference"

    # --- production path: bf16 p_c storage, bf16 x/W on the MXU ------------
    # Parameters are prepared ONCE and reused across forwards.
    prepared = prepare_params(p_c, q_level, bias, param_dtype=jnp.bfloat16)

    ref_small = _reference_forward(x, p_c, q_level, bias, mode="train")
    out_bf16_small = jax.block_until_ready(mylinear_forward_prepared(
        x, prepared, mode="train", compute_dtype=jnp.bfloat16))
    rel_s = jnp.linalg.norm(out_bf16_small - ref_small) / jnp.linalg.norm(ref_small)
    assert float(rel_s) < 1e-1, f"bf16 fused-path relative L2 error too large: {rel_s}"

    ref_big = _reference_forward(x2, p_c, q_level, bias, mode="train")
    out_bf16_big = jax.block_until_ready(mylinear_forward_prepared(
        x2, prepared, mode="train", compute_dtype=jnp.bfloat16))
    rel_b = jnp.linalg.norm(out_bf16_big - ref_big) / jnp.linalg.norm(ref_big)
    assert float(rel_b) < 1e-1, f"bf16 two-pass relative L2 error too large: {rel_b}"

    # Test mode in bf16 can legitimately flip near-tie argmax picks vs the
    # f32 reference, so only sanity-check it (use param_dtype=f32 for exact
    # hard-argmax semantics).
    out_bf16_test = jax.block_until_ready(mylinear_forward_prepared(
        x2, prepared, mode="test", compute_dtype=jnp.bfloat16))
    assert out_bf16_test.shape == (B2, OUT)
    assert bool(jnp.all(jnp.isfinite(out_bf16_test)))

    # TODO(synk): guard against all-zero p_c fibers (rsqrt -> inf) if real
    # checkpoints can contain them; the PyTorch reference NaNs there too.
    print("KERNEL_OK")
</pallas_src>

<mosaic_0001>
module attributes {stable_mosaic.version = 11 : i64} {
  func.func @_fused_kernel(%arg0: i32, %arg1: i32, %arg2: memref<8x128xf32, #tpu.memory_space<vmem>>, %arg3: memref<8x128x128xf32, #tpu.memory_space<vmem>>, %arg4: memref<8xf32, #tpu.memory_space<smem>>, %arg5: memref<1x128xf32, #tpu.memory_space<vmem>>, %arg6: memref<8x128xf32, #tpu.memory_space<vmem>>) attributes {dimension_semantics = [#tpu.dimension_semantics<parallel>, #tpu.dimension_semantics<arbitrary>], iteration_bounds = array<i64: 1, 1>, scalar_prefetch = 0 : i64, scratch_operands = 0 : i64, tpu.core_type = #tpu.core_type<tc>, window_params = [{transform_indices = @transform_0, window_bounds = array<i64: 8, 128>}, {transform_indices = @transform_1, window_bounds = array<i64: 8, 128, 128>}, {transform_indices = @transform_2, window_bounds = array<i64: 8>}, {transform_indices = @transform_3, window_bounds = array<i64: 1, 128>}, {transform_indices = @transform_4, window_bounds = array<i64: 8, 128>}]} {
    %c0_i32 = arith.constant 0 : i32
    %0 = arith.cmpi eq, %arg1, %c0_i32 : i32
    %1 = arith.extui %0 : i1 to i32
    %c0_i32_0 = arith.constant 0 : i32
    %2 = arith.cmpi ne, %1, %c0_i32_0 : i32
    scf.if %2 {
      %cst_60 = arith.constant 0.000000e+00 : f32
      %125 = vector.broadcast %cst_60 : f32 to vector<8x128xf32>
      %c0_61 = arith.constant 0 : index
      %c0_62 = arith.constant 0 : index
      %126 = vector.load %arg5[%c0_61, %c0_62] : memref<1x128xf32, #tpu.memory_space<vmem>>, vector<1x128xf32>
      %127 = vector.broadcast %126 : vector<1x128xf32> to vector<8x128xf32>
      %128 = arith.addf %125, %127 : vector<8x128xf32>
      %c0_63 = arith.constant 0 : index
      %c0_64 = arith.constant 0 : index
      %129 = vector.load %arg6[%c0_63, %c0_64] : memref<8x128xf32, #tpu.memory_space<vmem>>, vector<8x128xf32>
      tpu.vector_store %arg6[%c0_63, %c0_64], %128 {strides = array<i32>} : memref<8x128xf32, #tpu.memory_space<vmem>>, vector<8x128xf32>,
    } else {
    }
    %c0 = arith.constant 0 : index
    %c0_1 = arith.constant 0 : index
    %c0_2 = arith.constant 0 : index
    %3 = vector.load %arg3[%c0, %c0_1, %c0_2] : memref<8x128x128xf32, #tpu.memory_space<vmem>>, vector<1x128x128xf32>
    %4 = vector.shape_cast %3 : vector<1x128x128xf32> to vector<128x128xf32>
    %5 = arith.mulf %4, %4 : vector<128x128xf32>
    %c1 = arith.constant 1 : index
    %c0_3 = arith.constant 0 : index
    %c0_4 = arith.constant 0 : index
    %6 = vector.load %arg3[%c1, %c0_3, %c0_4] : memref<8x128x128xf32, #tpu.memory_space<vmem>>, vector<1x128x128xf32>
    %7 = vector.shape_cast %6 : vector<1x128x128xf32> to vector<128x128xf32>
    %8 = arith.mulf %7, %7 : vector<128x128xf32>
    %9 = arith.addf %5, %8 : vector<128x128xf32>
    %c2 = arith.constant 2 : index
    %c0_5 = arith.constant 0 : index
    %c0_6 = arith.constant 0 : index
    %10 = vector.load %arg3[%c2, %c0_5, %c0_6] : memref<8x128x128xf32, #tpu.memory_space<vmem>>, vector<1x128x128xf32>
    %11 = vector.shape_cast %10 : vector<1x128x128xf32> to vector<128x128xf32>
    %12 = arith.mulf %11, %11 : vector<128x128xf32>
    %13 = arith.addf %9, %12 : vector<128x128xf32>
    %c3 = arith.constant 3 : index
    %c0_7 = arith.constant 0 : index
    %c0_8 = arith.constant 0 : index
    %14 = vector.load %arg3[%c3, %c0_7, %c0_8] : memref<8x128x128xf32, #tpu.memory_space<vmem>>, vector<1x128x128xf32>
    %15 = vector.shape_cast %14 : vector<1x128x128xf32> to vector<128x128xf32>
    %16 = arith.mulf %15, %15 : vector<128x128xf32>
    %17 = arith.addf %13, %16 : vector<128x128xf32>
    %c4 = arith.constant 4 : index
    %c0_9 = arith.constant 0 : index
    %c0_10 = arith.constant 0 : index
    %18 = vector.load %arg3[%c4, %c0_9, %c0_10] : memref<8x128x128xf32, #tpu.memory_space<vmem>>, vector<1x128x128xf32>
    %19 = vector.shape_cast %18 : vector<1x128x128xf32> to vector<128x128xf32>
    %20 = arith.mulf %19, %19 : vector<128x128xf32>
    %21 = arith.addf %17, %20 : vector<128x128xf32>
    %c5 = arith.constant 5 : index
    %c0_11 = arith.constant 0 : index
    %c0_12 = arith.constant 0 : index
    %22 = vector.load %arg3[%c5, %c0_11, %c0_12] : memref<8x128x128xf32, #tpu.memory_space<vmem>>, vector<1x128x128xf32>
    %23 = vector.shape_cast %22 : vector<1x128x128xf32> to vector<128x128xf32>
    %24 = arith.mulf %23, %23 : vector<128x128xf32>
    %25 = arith.addf %21, %24 : vector<128x128xf32>
    %c6 = arith.constant 6 : index
    %c0_13 = arith.constant 0 : index
    %c0_14 = arith.constant 0 : index
    %26 = vector.load %arg3[%c6, %c0_13, %c0_14] : memref<8x128x128xf32, #tpu.memory_space<vmem>>, vector<1x128x128xf32>
    %27 = vector.shape_cast %26 : vector<1x128x128xf32> to vector<128x128xf32>
    %28 = arith.mulf %27, %27 : vector<128x128xf32>
    %29 = arith.addf %25, %28 : vector<128x128xf32>
    %c7 = arith.constant 7 : index
    %c0_15 = arith.constant 0 : index
    %c0_16 = arith.constant 0 : index
    %30 = vector.load %arg3[%c7, %c0_15, %c0_16] : memref<8x128x128xf32, #tpu.memory_space<vmem>>, vector<1x128x128xf32>
    %31 = vector.shape_cast %30 : vector<1x128x128xf32> to vector<128x128xf32>
    %32 = arith.mulf %31, %31 : vector<128x128xf32>
    %33 = arith.addf %29, %32 : vector<128x128xf32>
    %34 = math.rsqrt %33 : vector<128x128xf32>
    %cst = arith.constant 1.000000e+01 : f32
    %35 = vector.broadcast %cst : f32 to vector<128x128xf32>
    %36 = arith.mulf %35, %4 : vector<128x128xf32>
    %37 = arith.mulf %36, %34 : vector<128x128xf32>
    %38 = math.exp %37 : vector<128x128xf32>
    %c0_17 = arith.constant 0 : index
    %39 = memref.load %arg4[%c0_17] : memref<8xf32, #tpu.memory_space<smem>>
    %40 = vector.broadcast %39 : f32 to vector<128x128xf32>
    %41 = arith.mulf %38, %40 : vector<128x128xf32>
    %c1_18 = arith.constant 1 : index
    %c0_19 = arith.constant 0 : index
    %c0_20 = arith.constant 0 : index
    %42 = vector.load %arg3[%c1_18, %c0_19, %c0_20] : memref<8x128x128xf32, #tpu.memory_space<vmem>>, vector<1x128x128xf32>
    %43 = vector.shape_cast %42 : vector<1x128x128xf32> to vector<128x128xf32>
    %cst_21 = arith.constant 1.000000e+01 : f32
    %44 = vector.broadcast %cst_21 : f32 to vector<128x128xf32>
    %45 = arith.mulf %44, %43 : vector<128x128xf32>
    %46 = arith.mulf %45, %34 : vector<128x128xf32>
    %47 = math.exp %46 : vector<128x128xf32>
    %c1_22 = arith.constant 1 : index
    %48 = memref.load %arg4[%c1_22] : memref<8xf32, #tpu.memory_space<smem>>
    %49 = vector.broadcast %48 : f32 to vector<128x128xf32>
    %50 = arith.mulf %47, %49 : vector<128x128xf32>
    %51 = arith.addf %41, %50 : vector<128x128xf32>
    %52 = arith.addf %38, %47 : vector<128x128xf32>
    %c2_23 = arith.constant 2 : index
    %c0_24 = arith.constant 0 : index
    %c0_25 = arith.constant 0 : index
    %53 = vector.load %arg3[%c2_23, %c0_24, %c0_25] : memref<8x128x128xf32, #tpu.memory_space<vmem>>, vector<1x128x128xf32>
    %54 = vector.shape_cast %53 : vector<1x128x128xf32> to vector<128x128xf32>
    %cst_26 = arith.constant 1.000000e+01 : f32
    %55 = vector.broadcast %cst_26 : f32 to vector<128x128xf32>
    %56 = arith.mulf %55, %54 : vector<128x128xf32>
    %57 = arith.mulf %56, %34 : vector<128x128xf32>
    %58 = math.exp %57 : vector<128x128xf32>
    %c2_27 = arith.constant 2 : index
    %59 = memref.load %arg4[%c2_27] : memref<8xf32, #tpu.memory_space<smem>>
    %60 = vector.broadcast %59 : f32 to vector<128x128xf32>
    %61 = arith.mulf %58, %60 : vector<128x128xf32>
    %62 = arith.addf %51, %61 : vector<128x128xf32>
    %63 = arith.addf %52, %58 : vector<128x128xf32>
    %c3_28 = arith.constant 3 : index
    %c0_29 = arith.constant 0 : index
    %c0_30 = arith.constant 0 : index
    %64 = vector.load %arg3[%c3_28, %c0_29, %c0_30] : memref<8x128x128xf32, #tpu.memory_space<vmem>>, vector<1x128x128xf32>
    %65 = vector.shape_cast %64 : vector<1x128x128xf32> to vector<128x128xf32>
    %cst_31 = arith.constant 1.000000e+01 : f32
    %66 = vector.broadcast %cst_31 : f32 to vector<128x128xf32>
    %67 = arith.mulf %66, %65 : vector<128x128xf32>
    %68 = arith.mulf %67, %34 : vector<128x128xf32>
    %69 = math.exp %68 : vector<128x128xf32>
    %c3_32 = arith.constant 3 : index
    %70 = memref.load %arg4[%c3_32] : memref<8xf32, #tpu.memory_space<smem>>
    %71 = vector.broadcast %70 : f32 to vector<128x128xf32>
    %72 = arith.mulf %69, %71 : vector<128x128xf32>
    %73 = arith.addf %62, %72 : vector<128x128xf32>
    %74 = arith.addf %63, %69 : vector<128x128xf32>
    %c4_33 = arith.constant 4 : index
    %c0_34 = arith.constant 0 : index
    %c0_35 = arith.constant 0 : index
    %75 = vector.load %arg3[%c4_33, %c0_34, %c0_35] : memref<8x128x128xf32, #tpu.memory_space<vmem>>, vector<1x128x128xf32>
    %76 = vector.shape_cast %75 : vector<1x128x128xf32> to vector<128x128xf32>
    %cst_36 = arith.constant 1.000000e+01 : f32
    %77 = vector.broadcast %cst_36 : f32 to vector<128x128xf32>
    %78 = arith.mulf %77, %76 : vector<128x128xf32>
    %79 = arith.mulf %78, %34 : vector<128x128xf32>
    %80 = math.exp %79 : vector<128x128xf32>
    %c4_37 = arith.constant 4 : index
    %81 = memref.load %arg4[%c4_37] : memref<8xf32, #tpu.memory_space<smem>>
    %82 = vector.broadcast %81 : f32 to vector<128x128xf32>
    %83 = arith.mulf %80, %82 : vector<128x128xf32>
    %84 = arith.addf %73, %83 : vector<128x128xf32>
    %85 = arith.addf %74, %80 : vector<128x128xf32>
    %c5_38 = arith.constant 5 : index
    %c0_39 = arith.constant 0 : index
    %c0_40 = arith.constant 0 : index
    %86 = vector.load %arg3[%c5_38, %c0_39, %c0_40] : memref<8x128x128xf32, #tpu.memory_space<vmem>>, vector<1x128x128xf32>
    %87 = vector.shape_cast %86 : vector<1x128x128xf32> to vector<128x128xf32>
    %cst_41 = arith.constant 1.000000e+01 : f32
    %88 = vector.broadcast %cst_41 : f32 to vector<128x128xf32>
    %89 = arith.mulf %88, %87 : vector<128x128xf32>
    %90 = arith.mulf %89, %34 : vector<128x128xf32>
    %91 = math.exp %90 : vector<128x128xf32>
    %c5_42 = arith.constant 5 : index
    %92 = memref.load %arg4[%c5_42] : memref<8xf32, #tpu.memory_space<smem>>
    %93 = vector.broadcast %92 : f32 to vector<128x128xf32>
    %94 = arith.mulf %91, %93 : vector<128x128xf32>
    %95 = arith.addf %84, %94 : vector<128x128xf32>
    %96 = arith.addf %85, %91 : vector<128x128xf32>
    %c6_43 = arith.constant 6 : index
    %c0_44 = arith.constant 0 : index
    %c0_45 = arith.constant 0 : index
    %97 = vector.load %arg3[%c6_43, %c0_44, %c0_45] : memref<8x128x128xf32, #tpu.memory_space<vmem>>, vector<1x128x128xf32>
    %98 = vector.shape_cast %97 : vector<1x128x128xf32> to vector<128x128xf32>
    %cst_46 = arith.constant 1.000000e+01 : f32
    %99 = vector.broadcast %cst_46 : f32 to vector<128x128xf32>
    %100 = arith.mulf %99, %98 : vector<128x128xf32>
    %101 = arith.mulf %100, %34 : vector<128x128xf32>
    %102 = math.exp %101 : vector<128x128xf32>
    %c6_47 = arith.constant 6 : index
    %103 = memref.load %arg4[%c6_47] : memref<8xf32, #tpu.memory_space<smem>>
    %104 = vector.broadcast %103 : f32 to vector<128x128xf32>
    %105 = arith.mulf %102, %104 : vector<128x128xf32>
    %106 = arith.addf %95, %105 : vector<128x128xf32>
    %107 = arith.addf %96, %102 : vector<128x128xf32>
    %c7_48 = arith.constant 7 : index
    %c0_49 = arith.constant 0 : index
    %c0_50 = arith.constant 0 : index
    %108 = vector.load %arg3[%c7_48, %c0_49, %c0_50] : memref<8x128x128xf32, #tpu.memory_space<vmem>>, vector<1x128x128xf32>
    %109 = vector.shape_cast %108 : vector<1x128x128xf32> to vector<128x128xf32>
    %cst_51 = arith.constant 1.000000e+01 : f32
    %110 = vector.broadcast %cst_51 : f32 to vector<128x128xf32>
    %111 = arith.mulf %110, %109 : vector<128x128xf32>
    %112 = arith.mulf %111, %34 : vector<128x128xf32>
    %113 = math.exp %112 : vector<128x128xf32>
    %c7_52 = arith.constant 7 : index
    %114 = memref.load %arg4[%c7_52] : memref<8xf32, #tpu.memory_space<smem>>
    %115 = vector.broadcast %114 : f32 to vector<128x128xf32>
    %116 = arith.mulf %113, %115 : vector<128x128xf32>
    %117 = arith.addf %106, %116 : vector<128x128xf32>
    %118 = arith.addf %107, %113 : vector<128x128xf32>
    %119 = arith.divf %117, %118 : vector<128x128xf32>
    %c0_53 = arith.constant 0 : index
    %c0_54 = arith.constant 0 : index
    %120 = vector.load %arg6[%c0_53, %c0_54] : memref<8x128xf32, #tpu.memory_space<vmem>>, vector<8x128xf32>
    %c0_55 = arith.constant 0 : index
    %c0_56 = arith.constant 0 : index
    %121 = vector.load %arg2[%c0_55, %c0_56] : memref<8x128xf32, #tpu.memory_space<vmem>>, vector<8x128xf32>
    %cst_57 = arith.constant dense<0.000000e+00> : vector<8x128xf32>
    %122 = tpu.matmul %121, %119, %cst_57 {dimension_numbers = #tpu.dot_dimension_numbers<[1], [0], [0], [1], [0, 0, 1, 1], [], []>} : vector<8x128xf32>, vector<128x128xf32>, vector<8x128xf32> -> vector<8x128xf32>
    %123 = arith.addf %120, %122 : vector<8x128xf32>
    %c0_58 = arith.constant 0 : index
    %c0_59 = arith.constant 0 : index
    %124 = vector.load %arg6[%c0_58, %c0_59] : memref<8x128xf32, #tpu.memory_space<vmem>>, vector<8x128xf32>
    tpu.vector_store %arg6[%c0_58, %c0_59], %123 {strides = array<i32>} : memref<8x128xf32, #tpu.memory_space<vmem>>, vector<8x128xf32>,
    return
  }
  func.func @transform_0(%arg0: i32, %arg1: i32) -> (i32, i32) {
    %c0_i32 = arith.constant 0 : i32
    %c0_i32_0 = arith.constant 0 : i32
    return %c0_i32, %arg1 : i32, i32
  }
  func.func @transform_1(%arg0: i32, %arg1: i32) -> (i32, i32, i32) {
    %c0_i32 = arith.constant 0 : i32
    %c0_i32_0 = arith.constant 0 : i32
    return %c0_i32, %arg1, %arg0 : i32, i32, i32
  }
  func.func @transform_2(%arg0: i32, %arg1: i32) -> i32 {
    %c0_i32 = arith.constant 0 : i32
    %c0_i32_0 = arith.constant 0 : i32
    return %c0_i32 : i32
  }
  func.func @transform_3(%arg0: i32, %arg1: i32) -> (i32, i32) {
    %c0_i32 = arith.constant 0 : i32
    %c0_i32_0 = arith.constant 0 : i32
    return %c0_i32, %arg0 : i32, i32
  }
  func.func @transform_4(%arg0: i32, %arg1: i32) -> (i32, i32) {
    %c0_i32 = arith.constant 0 : i32
    %c0_i32_0 = arith.constant 0 : i32
    return %c0_i32, %arg0 : i32, i32
  }
}

</mosaic_0001>

<bundles_post_ra>
// kernel: tpu_custom_call.1
= control target key start
LH: loop header
LB: loop body
LE: loop exit
PB: predicated region body
PF: predicated region fallthrough
CT: control target
= control target key end

     0   :  { %9 = vsyncpa [#allocation3], 0  ;;  %s4521_s0 = inlined_call_operand.hbm [shape: f32[8,128], index: 0, kind: input, shape index: {}]   ;;  %s4522_s1 = inlined_call_operand.hbm [shape: f32[8,128,128], index: 1, kind: input, shape index: {}]   ;;  %s4523_s2 = inlined_call_operand.vmem [shape: f32[8], index: 2, kind: input, shape index: {}]   ;;  %s4524_s3 = inlined_call_operand.vmem [shape: f32[1,128], index: 3, kind: input, shape index: {}]   ;;  %s4525_s4 = inlined_call_operand.hbm [shape: f32[8,128], index: 4, kind: output, shape index: {}]  }
   0x1   :  { %10 = vsyncpa [#allocation7], 0 }
   0x2   :  { %11 = vsyncpa [#allocation5], 0 }
   0x3   :  { %12 = vsyncpa [#allocation4], 0  ;;  %s18_s17 = sshll.u32 %s4521_s0, 4  ;;  %s2322_s18 = smov [#allocation2]   ;;  %s19_s17 = int_to_ptr.hbm [resolvable:$true] %s18_s17 }
   0x4   :  { %s20_s19 = sshll.u32 %s2322_s18, 4  ;;  %s28_s22 = sshll.u32 %s4522_s1, 4  ;;  %s21_s19 = int_to_ptr.vmem [resolvable:$true] %s20_s19  ;;  %s29_s22 = int_to_ptr.hbm [resolvable:$true] %s28_s22 }
   0x5   :  { %23 = dma.hbm_to_vmem [thread:$0]  %s19_s17, 128, %s21_s19, [#allocation3]  }
   0x6   :  { %s2323_s23 = smov [#allocation6]   ;;  %s2324_s25 = smov 128  }
   0x7   :  { %s30_s24 = sshll.u32 %s2323_s23, 4  ;;  %s2325_s26 = smov 8   ;;  %s31_s24 = int_to_ptr.vmem [resolvable:$true] %s30_s24 }
   0x8   :  { %36 = dma.hbm_to_vmem [thread:$0]  %s29_s22, 16384, %s31_s24, [#allocation7], %s2324_s25, %s2324_s25, %s2325_s26  }
   0x9   :  { %s42_s0 = sshll.u32 %s4523_s2, 4  ;;  %s2326_s29 = smov [#allocation8]   ;;  %s43_s0 = int_to_ptr.vmem [resolvable:$true] %s42_s0 }
   0xa   :  { %45 = dma.vmem_to_smem %s43_s0, 16, %s2326_s29, [#allocation5]  }
   0xb   :  { %2314 = dma.done.wait [#allocation3], 128  }
   0xc   :  { %2315 = vsyncadd [#allocation3], 4294967168 }
   0xd   :  { %2316 = dma.done.wait [#allocation7], 16384  }
   0xe   :  { %2317 = vsyncadd [#allocation7], 4294950912 }
   0xf   :  { %2318 = dma.done.wait [#allocation5], 16  }
  0x10   :  { %2319 = vsyncadd [#allocation5], 4294967280 }
  0x11   :  { %60 = sfence }
  0x12   :  { %v1782_v0 = vld [vmem:[%s4524_s3] ss:$0 sm:$0xff]  ;;  %v2365_v1 = vld [vmem:[#allocation6] sm:$0xff]  ;;  %v72_v2 = vld [vmem:[#allocation6 + $0x8] sm:$0xff]  ;;  %s2714_s2 = sld [smem:[#allocation8]]  ;;  %s2327_s11 = smov [#allocation9]  }
  0x13   :  { %70 = vst [vmem:[#allocation9] sm:$0xff] %v1782_v0  ;;  %v73_v3 = vld [vmem:[#allocation6 + $0x10] sm:$0xff]  ;;  %v74_v4 = vld [vmem:[#allocation6 + $0x18] sm:$0xff]  ;;  %v75_v5 = vld [vmem:[#allocation6 + $0x20] sm:$0xff]  ;;  %v87_v17 = vmul.f32 %v2365_v1, %v2365_v1  ;;  %v88_v18 = vmul.f32 %v72_v2, %v72_v2  ;;  %s2852_s3 = sld [smem:[#allocation8 + $0x1]]  ;;  %s1755_s12 = sshll.u32 %s2327_s11, 4  ;;  %s1756_s12 = int_to_ptr.vmem [resolvable:$true] %s1755_s12 }
  0x14   :  { %v76_v6 = vld [vmem:[#allocation6 + $0x28] sm:$0xff]  ;;  %v77_v7 = vld [vmem:[#allocation6 + $0x30] sm:$0xff]  ;;  %v78_v8 = vld [vmem:[#allocation6 + $0x38] sm:$0xff]  ;;  %v89_v19 = vmul.f32 %v73_v3, %v73_v3  ;;  %v90_v23 = vmul.f32 %v74_v4, %v74_v4  ;;  %v91_v24 = vmul.f32 %v75_v5, %v75_v5  ;;  %s3008_s5 = sld [smem:[#allocation8 + $0x2]]  ;;  %s1757_s15 = sshll.u32 %s4525_s4, 4  ;;  %s1758_s15 = int_to_ptr.hbm [resolvable:$true] %s1757_s15 }
  0x15   :  { %v79_v9 = vld [vmem:[#allocation6 + $0x40] sm:$0xff]  ;;  %v80_v10 = vld [vmem:[#allocation6 + $0x48] sm:$0xff]  ;;  %v81_v11 = vld [vmem:[#allocation6 + $0x50] sm:$0xff]  ;;  %v92_v25 = vmul.f32 %v76_v6, %v76_v6  ;;  %v93_v26 = vmul.f32 %v77_v7, %v77_v7  ;;  %v94_v30 = vmul.f32 %v78_v8, %v78_v8  ;;  %s3170_s6 = sld [smem:[#allocation8 + $0x3]] }
  0x16   :  { %v82_v12 = vld [vmem:[#allocation6 + $0x58] sm:$0xff]  ;;  %v83_v13 = vld [vmem:[#allocation6 + $0x60] sm:$0xff]  ;;  %v84_v14 = vld [vmem:[#allocation6 + $0x68] sm:$0xff]  ;;  %v95_v31 = vmul.f32 %v79_v9, %v79_v9  ;;  %v96_v32 = vmul.f32 %v80_v10, %v80_v10  ;;  %v97_v33 = vmul.f32 %v81_v11, %v81_v11  ;;  %s3342_s7 = sld [smem:[#allocation8 + $0x4]] }
  0x17   :  { %v85_v15 = vld [vmem:[#allocation6 + $0x70] sm:$0xff]  ;;  %v86_v16 = vld [vmem:[#allocation6 + $0x78] sm:$0xff]  ;;  %v104_v20 = vld [vmem:[#allocation6 + $0x80] sm:$0xff]  ;;  %v98_v37 = vmul.f32 %v82_v12, %v82_v12  ;;  %v99_v38 = vmul.f32 %v83_v13, %v83_v13  ;;  %v100_v39 = vmul.f32 %v84_v14, %v84_v14  ;;  %s3517_s8 = sld [smem:[#allocation8 + $0x5]] }
  0x18   :  { %v105_v21 = vld [vmem:[#allocation6 + $0x88] sm:$0xff]  ;;  %v106_v22 = vld [vmem:[#allocation6 + $0x90] sm:$0xff]  ;;  %v107_v27 = vld [vmem:[#allocation6 + $0x98] sm:$0xff]  ;;  %v101_v40 = vmul.f32 %v85_v15, %v85_v15  ;;  %v102_v44 = vmul.f32 %v86_v16, %v86_v16  ;;  %v120_v48 = vmul.f32 %v104_v20, %v104_v20  ;;  %s3685_s9 = sld [smem:[#allocation8 + $0x6]] }
  0x19   :  { %v108_v28 = vld [vmem:[#allocation6 + $0xa0] sm:$0xff]  ;;  %v109_v29 = vld [vmem:[#allocation6 + $0xa8] sm:$0xff]  ;;  %v110_v34 = vld [vmem:[#allocation6 + $0xb0] sm:$0xff]  ;;  %v121_v49 = vmul.f32 %v105_v21, %v105_v21  ;;  %v122_v50 = vmul.f32 %v106_v22, %v106_v22  ;;  %v123_v52 = vmul.f32 %v107_v27, %v107_v27  ;;  %s3841_s10 = sld [smem:[#allocation8 + $0x7]] }
  0x1a   :  { %v111_v35 = vld [vmem:[#allocation6 + $0xb8] sm:$0xff]  ;;  %v112_v36 = vld [vmem:[#allocation6 + $0xc0] sm:$0xff]  ;;  %v113_v41 = vld [vmem:[#allocation6 + $0xc8] sm:$0xff]  ;;  %v124_v53 = vmul.f32 %v108_v28, %v108_v28  ;;  %v125_v54 = vmul.f32 %v109_v29, %v109_v29  ;;  %v126_v55 = vmul.f32 %v110_v34, %v110_v34  ;;  %v136_v2 = vadd.f32 %v120_v48, %v87_v17 }
  0x1b   :  { %v114_v42 = vld [vmem:[#allocation6 + $0xd0] sm:$0xff]  ;;  %v115_v43 = vld [vmem:[#allocation6 + $0xd8] sm:$0xff]  ;;  %v116_v45 = vld [vmem:[#allocation6 + $0xe0] sm:$0xff]  ;;  %v127_v56 = vmul.f32 %v111_v35, %v111_v35  ;;  %v128_v57 = vmul.f32 %v112_v36, %v112_v36  ;;  %v129_v58 = vmul.f32 %v113_v41, %v113_v41  ;;  %v137_v3 = vadd.f32 %v121_v49, %v88_v18 }
  0x1c   :  { %v117_v46 = vld [vmem:[#allocation6 + $0xe8] sm:$0xff]  ;;  %v118_v47 = vld [vmem:[#allocation6 + $0xf0] sm:$0xff]  ;;  %v119_v51 = vld [vmem:[#allocation6 + $0xf8] sm:$0xff]  ;;  %v130_v59 = vmul.f32 %v114_v42, %v114_v42  ;;  %v131_v60 = vmul.f32 %v115_v43, %v115_v43  ;;  %v132_v61 = vmul.f32 %v116_v45, %v116_v45  ;;  %v138_v4 = vadd.f32 %v122_v50, %v89_v19 }
  0x1d   :  { %v133_v62 = vmul.f32 %v117_v46, %v117_v46  ;;  %v134_v63 = vmul.f32 %v118_v47, %v118_v47  ;;  %v135_v0 = vmul.f32 %v119_v51, %v119_v51  ;;  %v153_v5 = vld [vmem:[#allocation6 + $0x100] sm:$0xff]  ;;  %v154_v6 = vld [vmem:[#allocation6 + $0x108] sm:$0xff]  ;;  %v155_v7 = vld [vmem:[#allocation6 + $0x110] sm:$0xff]  ;;  %v139_v8 = vadd.f32 %v123_v52, %v90_v23 }
  0x1e   :  { %v140_v9 = vadd.f32 %v124_v53, %v91_v24  ;;  %v141_v10 = vadd.f32 %v125_v54, %v92_v25  ;;  %v142_v11 = vadd.f32 %v126_v55, %v93_v26  ;;  %v156_v12 = vld [vmem:[#allocation6 + $0x118] sm:$0xff]  ;;  %v157_v13 = vld [vmem:[#allocation6 + $0x120] sm:$0xff]  ;;  %v158_v14 = vld [vmem:[#allocation6 + $0x128] sm:$0xff]  ;;  %v143_v15 = vadd.f32 %v127_v56, %v94_v30 }
  0x1f   :  { %v144_v16 = vadd.f32 %v128_v57, %v95_v31  ;;  %v145_v20 = vadd.f32 %v129_v58, %v96_v32  ;;  %v146_v21 = vadd.f32 %v130_v59, %v97_v33  ;;  %v159_v22 = vld [vmem:[#allocation6 + $0x130] sm:$0xff]  ;;  %v160_v27 = vld [vmem:[#allocation6 + $0x138] sm:$0xff]  ;;  %v161_v28 = vld [vmem:[#allocation6 + $0x140] sm:$0xff]  ;;  %v147_v17 = vadd.f32 %v131_v60, %v98_v37 }
  0x20   :  { %v148_v18 = vadd.f32 %v132_v61, %v99_v38  ;;  %v149_v19 = vadd.f32 %v133_v62, %v100_v39  ;;  %v150_v29 = vadd.f32 %v134_v63, %v101_v40  ;;  %v162_v34 = vld [vmem:[#allocation6 + $0x148] sm:$0xff]  ;;  %v163_v35 = vld [vmem:[#allocation6 + $0x150] sm:$0xff]  ;;  %v164_v23 = vld [vmem:[#allocation6 + $0x158] sm:$0xff]  ;;  %v151_v24 = vadd.f32 %v135_v0, %v102_v44 }
  0x21   :  { %v165_v25 = vld [vmem:[#allocation6 + $0x160] sm:$0xff]  ;;  %v166_v26 = vld [vmem:[#allocation6 + $0x168] sm:$0xff]  ;;  %v167_v36 = vld [vmem:[#allocation6 + $0x170] sm:$0xff]  ;;  %v169_v41 = vmul.f32 %v153_v5, %v153_v5  ;;  %v170_v42 = vmul.f32 %v154_v6, %v154_v6  ;;  %v171_v30 = vmul.f32 %v155_v7, %v155_v7  ;;  %v172_v32 = vmul.f32 %v156_v12, %v156_v12 }
  0x22   :  { %v168_v31 = vld [vmem:[#allocation6 + $0x178] sm:$0xff]  ;;  %v173_v33 = vmul.f32 %v157_v13, %v157_v13  ;;  %v174_v43 = vmul.f32 %v158_v14, %v158_v14  ;;  %v175_v45 = vmul.f32 %v159_v22, %v159_v22  ;;  %v176_v46 = vmul.f32 %v160_v27, %v160_v27  ;;  %v202_v53 = vld [vmem:[#allocation6 + $0x180] sm:$0xff]  ;;  %v203_v54 = vld [vmem:[#allocation6 + $0x188] sm:$0xff] }
  0x23   :  { %v177_v37 = vmul.f32 %v161_v28, %v161_v28  ;;  %v178_v38 = vmul.f32 %v162_v34, %v162_v34  ;;  %v179_v39 = vmul.f32 %v163_v35, %v163_v35  ;;  %v180_v40 = vmul.f32 %v164_v23, %v164_v23  ;;  %v204_v55 = vld [vmem:[#allocation6 + $0x190] sm:$0xff]  ;;  %v205_v60 = vld [vmem:[#allocation6 + $0x198] sm:$0xff]  ;;  %v206_v61 = vld [vmem:[#allocation6 + $0x1a0] sm:$0xff] }
  0x24   :  { %v181_v47 = vmul.f32 %v165_v25, %v165_v25  ;;  %v182_v48 = vmul.f32 %v166_v26, %v166_v26  ;;  %v183_v49 = vmul.f32 %v167_v36, %v167_v36  ;;  %v184_v44 = vmul.f32 %v168_v31, %v168_v31  ;;  %v207_v62 = vld [vmem:[#allocation6 + $0x1a8] sm:$0xff]  ;;  %v208_v7 = vld [vmem:[#allocation6 + $0x1b0] sm:$0xff]  ;;  %v209_v12 = vld [vmem:[#allocation6 + $0x1b8] sm:$0xff] }
  0x25   :  { %v185_v50 = vadd.f32 %v169_v41, %v136_v2  ;;  %v186_v51 = vadd.f32 %v170_v42, %v137_v3  ;;  %v187_v52 = vadd.f32 %v171_v30, %v138_v4  ;;  %v188_v56 = vadd.f32 %v172_v32, %v139_v8  ;;  %v210_v13 = vld [vmem:[#allocation6 + $0x1c0] sm:$0xff]  ;;  %v211_v22 = vld [vmem:[#allocation6 + $0x1c8] sm:$0xff]  ;;  %v212_v27 = vld [vmem:[#allocation6 + $0x1d0] sm:$0xff] }
  0x26   :  { %v189_v57 = vadd.f32 %v173_v33, %v140_v9  ;;  %v190_v58 = vadd.f32 %v174_v43, %v141_v10  ;;  %v191_v59 = vadd.f32 %v175_v45, %v142_v11  ;;  %v192_v63 = vadd.f32 %v176_v46, %v143_v15  ;;  %v213_v8 = vld [vmem:[#allocation6 + $0x1d8] sm:$0xff]  ;;  %v214_v10 = vld [vmem:[#allocation6 + $0x1e0] sm:$0xff]  ;;  %v215_v11 = vld [vmem:[#allocation6 + $0x1e8] sm:$0xff] }
  0x27   :  { %v193_v0 = vadd.f32 %v177_v37, %v144_v16  ;;  %v194_v5 = vadd.f32 %v178_v38, %v145_v20  ;;  %v195_v6 = vadd.f32 %v179_v39, %v146_v21  ;;  %v196_v2 = vadd.f32 %v180_v40, %v147_v17  ;;  %v216_v28 = vld [vmem:[#allocation6 + $0x1f0] sm:$0xff]  ;;  %v217_v16 = vld [vmem:[#allocation6 + $0x1f8] sm:$0xff]  ;;  %v251_v33 = vld [vmem:[#allocation6 + $0x200] sm:$0xff] }
  0x28   :  { %v197_v3 = vadd.f32 %v181_v47, %v148_v18  ;;  %v198_v4 = vadd.f32 %v182_v48, %v149_v19  ;;  %v199_v14 = vadd.f32 %v183_v49, %v150_v29  ;;  %v200_v9 = vadd.f32 %v184_v44, %v151_v24  ;;  %v252_v43 = vld [vmem:[#allocation6 + $0x208] sm:$0xff]  ;;  %v253_v45 = vld [vmem:[#allocation6 + $0x210] sm:$0xff]  ;;  %v254_v40 = vld [vmem:[#allocation6 + $0x218] sm:$0xff] }
  0x29   :  { %v218_v34 = vmul.f32 %v202_v53, %v202_v53  ;;  %v219_v35 = vmul.f32 %v203_v54, %v203_v54  ;;  %v220_v15 = vmul.f32 %v204_v55, %v204_v55  ;;  %v221_v20 = vmul.f32 %v205_v60, %v205_v60  ;;  %v255_v47 = vld [vmem:[#allocation6 + $0x220] sm:$0xff]  ;;  %v256_v48 = vld [vmem:[#allocation6 + $0x228] sm:$0xff]  ;;  %v257_v55 = vld [vmem:[#allocation6 + $0x230] sm:$0xff] }
  0x2a   :  { %v222_v21 = vmul.f32 %v206_v61, %v206_v61  ;;  %v223_v23 = vmul.f32 %v207_v62, %v207_v62  ;;  %v224_v25 = vmul.f32 %v208_v7, %v208_v7  ;;  %v225_v26 = vmul.f32 %v209_v12, %v209_v12  ;;  %v258_v60 = vld [vmem:[#allocation6 + $0x238] sm:$0xff]  ;;  %v259_v61 = vld [vmem:[#allocation6 + $0x240] sm:$0xff]  ;;  %v260_v7 = vld [vmem:[#allocation6 + $0x248] sm:$0xff] }
  0x2b   :  { %v226_v17 = vmul.f32 %v210_v13, %v210_v13  ;;  %v227_v18 = vmul.f32 %v211_v22, %v211_v22  ;;  %v228_v19 = vmul.f32 %v212_v27, %v212_v27  ;;  %v229_v29 = vmul.f32 %v213_v8, %v213_v8  ;;  %v261_v12 = vld [vmem:[#allocation6 + $0x250] sm:$0xff] }
  0x2c   :  { %v230_v36 = vmul.f32 %v214_v10, %v214_v10  ;;  %v231_v41 = vmul.f32 %v215_v11, %v215_v11  ;;  %v232_v42 = vmul.f32 %v216_v28, %v216_v28  ;;  %v233_v24 = vmul.f32 %v217_v16, %v217_v16  ;;  %v265_v13 = vld [vmem:[#allocation6 + $0x270] sm:$0xff]  ;;  %v300_v11 = vld [vmem:[#allocation6 + $0x280] sm:$0xff] }
  0x2d   :  { %v234_v30 = vadd.f32 %v218_v34, %v185_v50  ;;  %v235_v31 = vadd.f32 %v219_v35, %v186_v51  ;;  %v236_v32 = vadd.f32 %v220_v15, %v187_v52  ;;  %v237_v46 = vadd.f32 %v221_v20, %v188_v56  ;;  %v262_v56 = vld [vmem:[#allocation6 + $0x258] sm:$0xff] }
  0x2e   :  { %v238_v37 = vadd.f32 %v222_v21, %v189_v57  ;;  %v239_v38 = vadd.f32 %v223_v23, %v190_v58  ;;  %v240_v39 = vadd.f32 %v224_v25, %v191_v59  ;;  %v241_v49 = vadd.f32 %v225_v26, %v192_v63  ;;  %v263_v58 = vld [vmem:[#allocation6 + $0x260] sm:$0xff]  ;;  %v264_v59 = vld [vmem:[#allocation6 + $0x268] sm:$0xff] }
  0x2f   :  { %v242_v44 = vadd.f32 %v226_v17, %v193_v0  ;;  %v243_v53 = vadd.f32 %v227_v18, %v194_v5  ;;  %v244_v54 = vadd.f32 %v228_v19, %v195_v6  ;;  %v245_v50 = vadd.f32 %v229_v29, %v196_v2  ;;  %v266_v0 = vld [vmem:[#allocation6 + $0x278] sm:$0xff]  ;;  %v301_v21 = vld [vmem:[#allocation6 + $0x288] sm:$0xff]  ;;  %v302_v19 = vld [vmem:[#allocation6 + $0x290] sm:$0xff] }
  0x30   :  { %v246_v51 = vadd.f32 %v230_v36, %v197_v3  ;;  %v247_v52 = vadd.f32 %v231_v41, %v198_v4  ;;  %v248_v62 = vadd.f32 %v232_v42, %v199_v14  ;;  %v249_v57 = vadd.f32 %v233_v24, %v200_v9  ;;  %v349_v29 = vld [vmem:[#allocation6 + $0x300] sm:$0xff] }
  0x31   :  { %v267_v22 = vmul.f32 %v251_v33, %v251_v33  ;;  %v268_v27 = vmul.f32 %v252_v43, %v252_v43  ;;  %v269_v63 = vmul.f32 %v253_v45, %v253_v45  ;;  %v270_v5 = vmul.f32 %v254_v40, %v254_v40  ;;  %v303_v33 = vld [vmem:[#allocation6 + $0x298] sm:$0xff]  ;;  %v304_v43 = vld [vmem:[#allocation6 + $0x2a0] sm:$0xff]  ;;  %v305_v45 = vld [vmem:[#allocation6 + $0x2a8] sm:$0xff] }
  0x32   :  { %v271_v6 = vmul.f32 %v255_v47, %v255_v47  ;;  %v272_v8 = vmul.f32 %v256_v48, %v256_v48  ;;  %v273_v10 = vmul.f32 %v257_v55, %v257_v55  ;;  %v274_v2 = vmul.f32 %v258_v60, %v258_v60  ;;  %v309_v47 = vld [vmem:[#allocation6 + $0x2c8] sm:$0xff]  ;;  %v310_v48 = vld [vmem:[#allocation6 + $0x2d0] sm:$0xff] }
  0x33   :  { %v275_v3 = vmul.f32 %v259_v61, %v259_v61  ;;  %v276_v4 = vmul.f32 %v260_v7, %v260_v7  ;;  %v277_v14 = vmul.f32 %v261_v12, %v261_v12  ;;  %v278_v28 = vmul.f32 %v262_v56, %v262_v56  ;;  %v398_v7 = vld [vmem:[#allocation6 + $0x380] sm:$0xff]  ;;  %v311_v12 = vld [vmem:[#allocation6 + $0x2d8] sm:$0xff] }
  0x34   :  { %v279_v34 = vmul.f32 %v263_v58, %v263_v58  ;;  %v280_v35 = vmul.f32 %v264_v59, %v264_v59  ;;  %v281_v9 = vmul.f32 %v265_v13, %v265_v13  ;;  %v282_v15 = vmul.f32 %v266_v0, %v266_v0  ;;  %v312_v56 = vld [vmem:[#allocation6 + $0x2e0] sm:$0xff] }
  0x35   :  { %v283_v16 = vadd.f32 %v267_v22, %v234_v30  ;;  %v284_v20 = vadd.f32 %v268_v27, %v235_v31  ;;  %v316_v23 = vmul.f32 %v300_v11, %v300_v11  ;;  %v285_v25 = vadd.f32 %v269_v63, %v236_v32  ;;  %v352_v22 = vld [vmem:[#allocation6 + $0x318] sm:$0xff]  ;;  %v313_v27 = vld [vmem:[#allocation6 + $0x2e8] sm:$0xff] }
  0x36   :  { %v286_v26 = vadd.f32 %v270_v5, %v237_v46  ;;  %v287_v17 = vadd.f32 %v271_v6, %v238_v37  ;;  %v288_v18 = vadd.f32 %v272_v8, %v239_v38  ;;  %v289_v36 = vadd.f32 %v273_v10, %v240_v39  ;;  %v306_v46 = vld [vmem:[#allocation6 + $0x2b0] sm:$0xff]  ;;  %v307_v37 = vld [vmem:[#allocation6 + $0x2b8] sm:$0xff]  ;;  %v308_v38 = vld [vmem:[#allocation6 + $0x2c0] sm:$0xff] }
  0x37   :  { %v2369_v41 = vadd.f32 %v274_v2, %v241_v49  ;;  %v2371_v42 = vadd.f32 %v275_v3, %v242_v44  ;;  %v2373_v24 = vadd.f32 %v276_v4, %v243_v53  ;;  %v2375_v30 = vadd.f32 %v277_v14, %v244_v54  ;;  %v350_v53 = vld [vmem:[#allocation6 + $0x308] sm:$0xff]  ;;  %v353_v6 = vld [vmem:[#allocation6 + $0x320] sm:$0xff] }
  0x38   :  { %v2377_v31 = vadd.f32 %v278_v28, %v245_v50  ;;  %v2379_v32 = vadd.f32 %v279_v34, %v246_v51  ;;  %v317_v40 = vmul.f32 %v301_v21, %v301_v21  ;;  %v2381_v39 = vadd.f32 %v280_v35, %v247_v52  ;;  %v351_v51 = vld [vmem:[#allocation6 + $0x310] sm:$0xff]  ;;  %v399_v2 = vld [vmem:[#allocation6 + $0x388] sm:$0xff] }
  0x39   :  { %v318_v49 = vmul.f32 %v302_v19, %v302_v19  ;;  %v332_v44 = vadd.f32 %v316_v23, %v283_v16  ;;  %v365_v55 = vmul.f32 %v349_v29, %v349_v29  ;;  %v2383_v60 = vadd.f32 %v281_v9, %v248_v62  ;;  %v355_v34 = vld [vmem:[#allocation6 + $0x330] sm:$0xff]  ;;  %v315_v16 = vld [vmem:[#allocation6 + $0x2f8] sm:$0xff] }
  0x3a   :  { %v2385_v54 = vadd.f32 %v282_v15, %v249_v57  ;;  %v319_v61 = vmul.f32 %v303_v33, %v303_v33  ;;  %v320_v50 = vmul.f32 %v304_v43, %v304_v43  ;;  %v321_v58 = vmul.f32 %v305_v45, %v305_v45  ;;  %v354_v57 = vld [vmem:[#allocation6 + $0x328] sm:$0xff]  ;;  %v400_v9 = vld [vmem:[#allocation6 + $0x390] sm:$0xff]  ;;  %v401_v29 = vld [vmem:[#allocation6 + $0x398] sm:$0xff] }
  0x3b   :  { %v322_v59 = vmul.f32 %v306_v46, %v306_v46  ;;  %v323_v52 = vmul.f32 %v307_v37, %v307_v37  ;;  %v324_v13 = vmul.f32 %v308_v38, %v308_v38  ;;  %v325_v63 = vmul.f32 %v309_v47, %v309_v47  ;;  %v314_v15 = vld [vmem:[#allocation6 + $0x2f0] sm:$0xff]  ;;  %v402_v46 = vld [vmem:[#allocation6 + $0x3a0] sm:$0xff]  ;;  %v403_v47 = vld [vmem:[#allocation6 + $0x3a8] sm:$0xff] }
  0x3c   :  { %v326_v0 = vmul.f32 %v310_v48, %v310_v48  ;;  %v333_v5 = vadd.f32 %v317_v40, %v284_v20  ;;  %v366_v62 = vmul.f32 %v350_v53, %v350_v53  ;;  %v334_v8 = vadd.f32 %v318_v49, %v285_v25  ;;  %v356_v25 = vld [vmem:[#allocation6 + $0x338] sm:$0xff] }
  0x3d   :  { %v367_v10 = vmul.f32 %v351_v51, %v351_v51  ;;  %v381_v11 = vadd.f32 %v365_v55, %v332_v44  ;;  %v414_v3 = vmul.f32 %v398_v7, %v398_v7  ;;  %v327_v4 = vmul.f32 %v311_v12, %v311_v12  ;;  %v404_v55 = vld [vmem:[#allocation6 + $0x3b0] sm:$0xff] }
  0x3e   :  { %v328_v14 = vmul.f32 %v312_v56, %v312_v56  ;;  %v335_v28 = vadd.f32 %v319_v61, %v286_v26  ;;  %v368_v35 = vmul.f32 %v352_v22, %v352_v22  ;;  %v329_v21 = vmul.f32 %v313_v27, %v313_v27  ;;  %v357_v61 = vld [vmem:[#allocation6 + $0x340] sm:$0xff]  ;;  %v405_v56 = vld [vmem:[#allocation6 + $0x3b8] sm:$0xff] }
  0x3f   :  { %v336_v23 = vadd.f32 %v320_v50, %v287_v17  ;;  %v337_v19 = vadd.f32 %v321_v58, %v288_v18  ;;  %v369_v20 = vmul.f32 %v353_v6, %v353_v6  ;;  %v338_v33 = vadd.f32 %v322_v59, %v289_v36 }
  0x40   :  { %v370_v43 = vmul.f32 %v354_v57, %v354_v57  ;;  %v382_v45 = vadd.f32 %v366_v62, %v333_v5  ;;  %v415_v37 = vmul.f32 %v399_v2, %v399_v2  ;;  %v371_v38 = vmul.f32 %v355_v34, %v355_v34  ;;  %v360_v34 = vld [vmem:[#allocation6 + $0x358] sm:$0xff] }
  0x41   :  { %v383_v40 = vadd.f32 %v367_v10, %v334_v8  ;;  %v416_v26 = vmul.f32 %v400_v9, %v400_v9  ;;  %v2387_v48 = vadd.f32 %v414_v3, %v381_v11  ;;  %v330_v49 = vmul.f32 %v314_v15, %v314_v15  ;;  %v406_v10 = vld [vmem:[#allocation6 + $0x3c0] sm:$0xff]  ;;  %v364_v9 = vld [vmem:[#allocation6 + $0x378] sm:$0xff] }
  0x42   :  { %v331_v44 = vmul.f32 %v315_v16, %v315_v16  ;;  %v384_v53 = vadd.f32 %v368_v35, %v335_v28  ;;  %v417_v17 = vmul.f32 %v401_v29, %v401_v29  ;;  %v339_v18 = vadd.f32 %v323_v52, %v2369_v41  ;;  %v358_v52 = vld [vmem:[#allocation6 + $0x348] sm:$0xff] }
  0x43   :  { %v372_v36 = vmul.f32 %v356_v25, %v356_v25  ;;  %v385_v50 = vadd.f32 %v369_v20, %v336_v23  ;;  %v418_v51 = vmul.f32 %v402_v46, %v402_v46  ;;  %v340_v7 = vadd.f32 %v324_v13, %v2371_v42  ;;  %v359_v13 = vld [vmem:[#allocation6 + $0x350] sm:$0xff]  ;;  %v410_v46 = vld [vmem:[#allocation6 + $0x3e0] sm:$0xff] }
  0x44   :  { %v386_v12 = vadd.f32 %v370_v43, %v337_v19  ;;  %v419_v58 = vmul.f32 %v403_v47, %v403_v47  ;;  %v2391_v59 = vadd.f32 %v415_v37, %v382_v45  ;;  %v387_v22 = vadd.f32 %v371_v38, %v338_v33  ;;  %v408_v33 = vld [vmem:[#allocation6 + $0x3d0] sm:$0xff]  ;;  %v409_v45 = vld [vmem:[#allocation6 + $0x3d8] sm:$0xff]  ;;  %v411_v47 = vld [vmem:[#allocation6 + $0x3e8] sm:$0xff] }
  0x45   :  { %v420_v27 = vmul.f32 %v404_v55, %v404_v55  ;;  %v2393_v5 = vadd.f32 %v416_v26, %v383_v40  ;;  %1783 = vrsqrt.f32 %v2387_v48  ;;  %v341_v6 = vadd.f32 %v325_v63, %v2373_v24  ;;  %v361_v24 = vld [vmem:[#allocation6 + $0x360] sm:$0xff]  ;;  %v412_v55 = vld [vmem:[#allocation6 + $0x3f0] sm:$0xff] }
  0x46   :  { %v342_v41 = vadd.f32 %v326_v0, %v2375_v30  ;;  %v373_v62 = vmul.f32 %v357_v61, %v357_v61  ;;  %v2398_v8 = vadd.f32 %v417_v17, %v384_v53  ;;  %v343_v42 = vadd.f32 %v327_v4, %v2377_v31  ;;  %v362_v0 = vld [vmem:[#allocation6 + $0x368] sm:$0xff]  ;;  %v363_v31 = vld [vmem:[#allocation6 + $0x370] sm:$0xff]  ;;  %v413_v17 = vld [vmem:[#allocation6 + $0x3f8] sm:$0xff] }
  0x47   :  { %v388_v57 = vadd.f32 %v372_v36, %v339_v18  ;;  %v421_v11 = vmul.f32 %v405_v56, %v405_v56  ;;  %v2401_v2 = vadd.f32 %v418_v51, %v385_v50  ;;  %v344_v3 = vadd.f32 %v328_v14, %v2379_v32  ;;  %v407_v14 = vld [vmem:[#allocation6 + $0x3c8] sm:$0xff] }
  0x48   :  { %v345_v28 = vadd.f32 %v329_v21, %v2381_v39  ;;  %v2405_v63 = vadd.f32 %v419_v58, %v386_v12  ;;  %1785 = vrsqrt.f32 %v2391_v59  ;;  %v346_v30 = vadd.f32 %v330_v49, %v2383_v60 }
  0x49   :  { %v374_v4 = vmul.f32 %v358_v52, %v358_v52  ;;  %v2409_v35 = vadd.f32 %v420_v27, %v387_v22  ;;  %1787 = vrsqrt.f32 %v2393_v5  ;;  %v375_v15 = vmul.f32 %v359_v13, %v359_v13 }
  0x4a   :  { %v389_v32 = vadd.f32 %v373_v62, %v340_v7  ;;  %v422_v39 = vmul.f32 %v406_v10, %v406_v10  ;;  %1789 = vrsqrt.f32 %v2398_v8  ;;  %v376_v21 = vmul.f32 %v360_v34, %v360_v34 }
  0x4b   :  { %v2413_v16 = vpop.eup %1783  ;;  %v377_v23 = vmul.f32 %v361_v24, %v361_v24  ;;  %v2415_v19 = vadd.f32 %v421_v11, %v388_v57  ;;  %1791 = vrsqrt.f32 %v2401_v2  ;;  %v347_v60 = vadd.f32 %v331_v44, %v2385_v54 }
  0x4c   :  { %v378_v20 = vmul.f32 %v362_v0, %v362_v0  ;;  %v379_v29 = vmul.f32 %v363_v31, %v363_v31  ;;  %1793 = vrsqrt.f32 %v2405_v63  ;;  %v380_v25 = vmul.f32 %v364_v9, %v364_v9 }
  0x4d   :  { %v390_v43 = vadd.f32 %v374_v4, %v341_v6  ;;  %v423_v37 = vmul.f32 %v407_v14, %v407_v14  ;;  %1795 = vrsqrt.f32 %v2409_v35  ;;  %v391_v40 = vadd.f32 %v375_v15, %v342_v41 }
  0x4e   :  { %v2421_v38 = vpop.eup %1785  ;;  %v2423_v26 = vadd.f32 %v422_v39, %v389_v32  ;;  %v447_v54 = vmul.f32 %v2413_v16, %v2387_v48  ;;  %v392_v44 = vadd.f32 %v376_v21, %v343_v42  ;;  %v393_v53 = vadd.f32 %v377_v23, %v344_v3 }
  0x4f   :  { %v2427_v49 = vpop.eup %1787  ;;  %v424_v18 = vmul.f32 %v408_v33, %v408_v33  ;;  %1797 = vrsqrt.f32 %v2415_v19  ;;  %v394_v36 = vadd.f32 %v378_v20, %v345_v28  ;;  %v395_v50 = vadd.f32 %v379_v29, %v346_v30 }
  0x50   :  { %v2430_v61 = vpop.eup %1789  ;;  %v425_v51 = vmul.f32 %v409_v45, %v409_v45  ;;  %v426_v7 = vmul.f32 %v410_v46, %v410_v46  ;;  %v396_v56 = vadd.f32 %v380_v25, %v347_v60  ;;  %v427_v58 = vmul.f32 %v411_v47, %v411_v47 }
  0x51   :  { %v2432_v12 = vpop.eup %1791  ;;  %v2434_v22 = vadd.f32 %v423_v37, %v390_v43  ;;  %v457_v27 = vmul.f32 %v2421_v38, %v2391_v59  ;;  %v428_v41 = vmul.f32 %v412_v55, %v412_v55  ;;  %v429_v52 = vmul.f32 %v413_v17, %v413_v17 }
  0x52   :  { %v2438_v6 = vpop.eup %1793  ;;  %v448_v62 = vmul.f32 %v2413_v16, %v447_v54  ;;  %1799 = vrsqrt.f32 %v2423_v26  ;;  %v2444_v13 = vadd.f32 %v424_v18, %v391_v40  ;;  %v467_v57 = vmul.f32 %v2427_v49, %v2393_v5 }
  0x53   :  { %v2442_v42 = vpop.eup %1795  ;;  %v477_v10 = vmul.f32 %v2430_v61, %v2398_v8  ;;  %v2450_v11 = vadd.f32 %v425_v51, %v392_v44  ;;  %v2452_v3 = vadd.f32 %v426_v7, %v393_v53  ;;  %v487_v28 = vmul.f32 %v2432_v12, %v2401_v2 }
  0x54   :  { %v2458_v24 = vadd.f32 %v427_v58, %v394_v36  ;;  %v458_v30 = vmul.f32 %v2421_v38, %v457_v27  ;;  %v497_v0 = vmul.f32 %v2438_v6, %v2405_v63  ;;  %1801 = vrsqrt.f32 %v2434_v22 }
  0x55   :  { %v2456_v34 = vpop.eup %1797  ;;  %v2464_v31 = vadd.f32 %v428_v41, %v395_v50  ;;  %v2466_v4 = vadd.f32 %v429_v52, %v396_v56  ;;  %v449_v9 = vmul.f32 0.5, %v448_v62  ;;  %v507_v15 = vmul.f32 %v2442_v42, %v2409_v35 }
  0x56   :  { %vm452_vm0 = vweird.f32 %v2387_v48  ;;  %v468_v32 = vmul.f32 %v2427_v49, %v467_v57  ;;  %v478_v14 = vmul.f32 %v2430_v61, %v477_v10  ;;  %1803 = vrsqrt.f32 %v2444_v13 }
  0x57   :  { %vm462_vm1 = vweird.f32 %v2391_v59  ;;  %vm472_vm2 = vweird.f32 %v2393_v5  ;;  %v488_v21 = vmul.f32 %v2432_v12, %v487_v28  ;;  %v517_v23 = vmul.f32 %v2456_v34, %v2415_v19  ;;  %v2103_v28 = vld [vmem:[#allocation6 + $0x8] sm:$0xff] }
  0x58   :  { %v2474_v39 = vpop.eup %1799  ;;  %v459_v60 = vmul.f32 0.5, %v458_v30  ;;  %vm482_vm3 = vweird.f32 %v2398_v8  ;;  %v498_v20 = vmul.f32 %v2438_v6, %v497_v0  ;;  %1805 = vrsqrt.f32 %v2450_v11 }
  0x59   :  { %v450_v29 = vsub.f32 1.5, %v449_v9  ;;  %vm492_vm4 = vweird.f32 %v2401_v2  ;;  %v508_v33 = vmul.f32 %v2442_v42, %v507_v15  ;;  %1807 = vrsqrt.f32 %v2452_v3 }
  0x5a   :  { %v2487_v25 = vpop.eup %1801  ;;  %v469_v43 = vmul.f32 0.5, %v468_v32  ;;  %v479_v45 = vmul.f32 0.5, %v478_v14  ;;  %vm502_vm5 = vweird.f32 %v2405_v63  ;;  %v527_v46 = vmul.f32 %v2474_v39, %v2423_v26 }
  0x5b   :  { %1809 = vrsqrt.f32 %v2458_v24  ;;  %vm453_vm6 = vweird.f32 %v2413_v16  ;;  %v489_v37 = vmul.f32 0.5, %v488_v21  ;;  %v518_v40 = vmul.f32 %v2456_v34, %v517_v23 }
  0x5c   :  { %1811 = vrsqrt.f32 %v2464_v31  ;;  %v2496_v47 = vpop.eup %1803  ;;  %v460_v54 = vsub.f32 1.5, %v459_v60  ;;  %v499_v44 = vmul.f32 0.5, %v498_v20  ;;  %vm512_vm7 = vweird.f32 %v2409_v35  ;;  %vm2511_vm10 = vmor %vm452_vm0, %vm453_vm6 }
  0x5d   :  { %1813 = vrsqrt.f32 %v2466_v4  ;;  %v451_v53 = vmul.f32 %v2413_v16, %v450_v29  ;;  %vm463_vm8 = vweird.f32 %v2421_v38  ;;  %v509_v55 = vmul.f32 0.5, %v508_v33 }
  0x5e   :  { %vm522_vm9 = vweird.f32 %v2415_v19  ;;  %v537_v17 = vmul.f32 %v2487_v25, %v2434_v22  ;;  %v2505_v18 = vpop.eup %1805  ;;  %v470_v50 = vsub.f32 1.5, %v469_v43  ;;  %vm473_vm11 = vweird.f32 %v2427_v49  ;;  %vm2539_vm0 = vmor %vm462_vm1, %vm463_vm8 }
  0x5f   :  { %v480_v51 = vsub.f32 1.5, %v479_v45  ;;  %v528_v7 = vmul.f32 %v2474_v39, %v527_v46  ;;  %v2517_v56 = vpop.eup %1807  ;;  %vm483_vm12 = vweird.f32 %v2430_v61  ;;  %v490_v58 = vsub.f32 1.5, %v489_v37 }
  0x60   :  { %v519_v27 = vmul.f32 0.5, %v518_v40  ;;  %v547_v41 = vmul.f32 %v2496_v47, %v2444_v13  ;;  %v461_v52 = vmul.f32 %v2421_v38, %v460_v54  ;;  %vm493_vm13 = vweird.f32 %v2432_v12  ;;  %vm2563_vm1 = vmor %vm482_vm3, %vm483_vm12 }
  0x61   :  { %v2522_v48 = vpop.eup %1809  ;;  %v500_v62 = vsub.f32 1.5, %v499_v44  ;;  %vm503_vm14 = vweird.f32 %v2438_v6  ;;  %vm532_vm15 = vweird.f32 %v2423_v26  ;;  %v2533_v10 = vsel %vm2511_vm10, %v2413_v16, %v451_v53  ;;  %vm2552_vm10 = vmor %vm472_vm2, %vm473_vm11 }
  0x62   :  { %v2528_v57 = vpop.eup %1811  ;;  %v510_v30 = vsub.f32 1.5, %v509_v55  ;;  %vm513_vm6 = vweird.f32 %v2442_v42  ;;  %v538_v0 = vmul.f32 %v2487_v25, %v537_v17  ;;  %v471_v15 = vmul.f32 %v2427_v49, %v470_v50  ;;  %vm494_vm3 = vmor %vm492_vm4, %vm493_vm13 }
  0x63   :  { %v2545_v9 = vpop.eup %1813  ;;  %v481_v59 = vmul.f32 %v2430_v61, %v480_v51  ;;  %v529_v32 = vmul.f32 0.5, %v528_v7  ;;  %v557_v14 = vmul.f32 %v2505_v18, %v2450_v11  ;;  %v491_v5 = vmul.f32 %v2432_v12, %v490_v58  ;;  %vm2590_vm8 = vmor %vm502_vm5, %vm503_vm14 }
  0x64   :  { %v520_v23 = vsub.f32 1.5, %v519_v27  ;;  %vm542_vm2 = vweird.f32 %v2434_v22  ;;  %v548_v60 = vmul.f32 %v2496_v47, %v547_v41  ;;  %v567_v20 = vmul.f32 %v2517_v56, %v2452_v3  ;;  %vm514_vm5 = vmor %vm512_vm7, %vm513_vm6 }
  0x65   :  { %v2575_v29 = vsel %vm2539_vm0, %v2421_v38, %v461_v52  ;;  %v501_v8 = vmul.f32 %v2438_v6, %v500_v62  ;;  %v577_v33 = vmul.f32 %v2522_v48, %v2458_v24  ;;  %v587_v43 = vmul.f32 %v2528_v57, %v2464_v31 }
  0x66   :  { %v511_v45 = vmul.f32 %v2442_v42, %v510_v30  ;;  %vm523_vm4 = vweird.f32 %v2456_v34  ;;  %v539_v2 = vmul.f32 0.5, %v538_v0  ;;  %vm552_vm11 = vweird.f32 %v2444_v13 }
  0x67   :  { %v597_v46 = vmul.f32 %v2545_v9, %v2466_v4  ;;  %v2602_v37 = vsel %vm2552_vm10, %v2427_v49, %v471_v15  ;;  %v2607_v63 = vsel %vm2563_vm1, %v2430_v61, %v481_v59  ;;  %v530_v40 = vsub.f32 1.5, %v529_v32  ;;  %vm524_vm7 = vmor %vm522_vm9, %vm523_vm4  ;;  %v2106_v32 = vld [vmem:[#allocation6 + $0x20] sm:$0xff] }
  0x68   :  { %4578 = vst [vmem:[#allocation14_spill] sm:$0xff] %v2602_v37  ;;  %v558_v54 = vmul.f32 %v2505_v18, %v557_v14  ;;  %v2615_v44 = vsel %vm494_vm3, %v2432_v12, %v491_v5  ;;  %v521_v53 = vmul.f32 %v2456_v34, %v520_v23  ;;  %v549_v49 = vmul.f32 0.5, %v548_v60 }
  0x69   :  { %4579 = vst [vmem:[#allocation15_spill] sm:$0xff] %v2607_v63  ;;  %vm562_vm12 = vweird.f32 %v2450_v11  ;;  %v568_v55 = vmul.f32 %v2517_v56, %v567_v20  ;;  %v2623_v61 = vsel %vm2590_vm8, %v2438_v6, %v501_v8  ;;  %vm533_vm13 = vweird.f32 %v2474_v39  ;;  %v2108_v8 = vld [vmem:[#allocation6 + $0x30] sm:$0xff] }
  0x6a   :  { %4580 = vst [vmem:[#allocation16_spill] sm:$0xff] %v2615_v44  ;;  %vm572_vm14 = vweird.f32 %v2452_v3  ;;  %v578_v35 = vmul.f32 %v2522_v48, %v577_v33  ;;  %v588_v12 = vmul.f32 %v2528_v57, %v587_v43  ;;  %v2634_v17 = vsel %vm514_vm5, %v2442_v42, %v511_v45  ;;  %vm534_vm10 = vmor %vm532_vm15, %vm533_vm13  ;;  %v2109_v45 = vld [vmem:[#allocation6 + $0x38] sm:$0xff] }
  0x6b   :  { %4581 = vst [vmem:[#allocation17_spill] sm:$0xff] %v2623_v61  ;;  %v540_v36 = vsub.f32 1.5, %v539_v2  ;;  %vm543_vm0 = vweird.f32 %v2487_v25  ;;  %v598_v6 = vmul.f32 %v2545_v9, %v597_v46  ;;  %v531_v50 = vmul.f32 %v2474_v39, %v530_v40  ;;  %v2110_v40 = vld [vmem:[#allocation6 + $0x40] sm:$0xff] }
  0x6c   :  { %4582 = vst [vmem:[#allocation18_spill] sm:$0xff] %v2634_v17  ;;  %vm553_vm9 = vweird.f32 %v2496_v47  ;;  %v559_v19 = vmul.f32 0.5, %v558_v54  ;;  %vm582_vm6 = vweird.f32 %v2458_v24  ;;  %v2642_v51 = vsel %vm524_vm7, %v2456_v34, %v521_v53  ;;  %v2104_v34 = vld [vmem:[#allocation6 + $0x10] sm:$0xff]  ;;  %vm2657_vm15 = vmor %vm542_vm2, %vm543_vm0  ;;  %v2111_v54 = vld [vmem:[#allocation6 + $0x48] sm:$0xff] }
  0x6d   :  { %4583 = vst [vmem:[#allocation19_spill] sm:$0xff] %v2642_v51  ;;  %v550_v42 = vsub.f32 1.5, %v549_v49  ;;  %v569_v7 = vmul.f32 0.5, %v568_v55  ;;  %vm592_vm1 = vweird.f32 %v2464_v31  ;;  %v579_v58 = vmul.f32 0.5, %v578_v35  ;;  %vm2667_vm2 = vmor %vm552_vm11, %vm553_vm9  ;;  %v2112_v35 = vld [vmem:[#allocation6 + $0x50] sm:$0xff] }
  0x6e   :  { %v589_v27 = vmul.f32 0.5, %v588_v12  ;;  %vm602_vm3 = vweird.f32 %v2466_v4  ;;  %v606_v41 = vmul.f32 10.0, %v2365_v1  ;;  %v541_v52 = vmul.f32 %v2487_v25, %v540_v36  ;;  %v2105_v1 = vld [vmem:[#allocation6 + $0x18] sm:$0xff]  ;;  %v2116_v31 = vld [vmem:[#allocation6 + $0x70] sm:$0xff] }
  0x6f   :  { %v599_v62 = vmul.f32 0.5, %v598_v6  ;;  %v607_v30 = vmul.f32 10.0, %v2103_v28  ;;  %v608_v0 = vmul.f32 10.0, %v2104_v34  ;;  %v2651_v26 = vsel %vm534_vm10, %v2474_v39, %v531_v50  ;;  %v2107_v39 = vld [vmem:[#allocation6 + $0x28] sm:$0xff]  ;;  %v2113_v6 = vld [vmem:[#allocation6 + $0x58] sm:$0xff] }
  0x70   :  { %4584 = vst [vmem:[#allocation20_spill] sm:$0xff] %v2651_v26  ;;  %v560_v16 = vsub.f32 1.5, %v559_v19  ;;  %v609_v59 = vmul.f32 10.0, %v2105_v1  ;;  %v610_v14 = vmul.f32 10.0, %v2106_v32  ;;  %v551_v21 = vmul.f32 %v2496_v47, %v550_v42  ;;  %v2117_v34 = vld [vmem:[#allocation6 + $0x78] sm:$0xff] }
  0x71   :  { %vm563_vm8 = vweird.f32 %v2505_v18  ;;  %v570_v5 = vsub.f32 1.5, %v569_v7  ;;  %v611_v23 = vmul.f32 10.0, %v2107_v39  ;;  %vm573_vm4 = vweird.f32 %v2517_v56  ;;  %v2114_v7 = vld [vmem:[#allocation6 + $0x60] sm:$0xff]  ;;  %v2121_v42 = vld [vmem:[#allocation6 + $0x98] sm:$0xff] }
  0x72   :  { %v580_v60 = vsub.f32 1.5, %v579_v58  ;;  %v590_v20 = vsub.f32 1.5, %v589_v27  ;;  %v612_v33 = vmul.f32 10.0, %v2108_v8  ;;  %v2675_v43 = vsel %vm2657_vm15, %v2487_v25, %v541_v52  ;;  %vm2683_vm11 = vmor %vm562_vm12, %vm563_vm8  ;;  %v2115_v27 = vld [vmem:[#allocation6 + $0x68] sm:$0xff] }
  0x73   :  { %4589 = vst [vmem:[#allocation21_spill] sm:$0xff] %v2675_v43  ;;  %vm583_vm5 = vweird.f32 %v2522_v48  ;;  %v600_v38 = vsub.f32 1.5, %v599_v62  ;;  %v613_v13 = vmul.f32 10.0, %v2109_v45  ;;  %v561_v2 = vmul.f32 %v2505_v18, %v560_v16  ;;  %vm2698_vm12 = vmor %vm572_vm14, %vm573_vm4 }
  0x74   :  { %vm593_vm7 = vweird.f32 %v2528_v57  ;;  %v614_v25 = vmul.f32 10.0, %v2110_v40  ;;  %v615_v53 = vmul.f32 10.0, %v2111_v54  ;;  %v2691_v49 = vsel %vm2667_vm2, %v2496_v47, %v551_v21  ;;  %vm2708_vm0 = vmor %vm582_vm6, %vm583_vm5 }
  0x75   :  { %4592 = vst [vmem:[#allocation22_spill] sm:$0xff] %v2691_v49  ;;  %v571_v55 = vmul.f32 %v2517_v56, %v570_v5  ;;  %vm603_vm13 = vweird.f32 %v2545_v9  ;;  %v616_v12 = vmul.f32 10.0, %v2112_v35  ;;  %v581_v36 = vmul.f32 %v2522_v48, %v580_v60  ;;  %vm2720_vm14 = vmor %vm592_vm1, %vm593_vm7 }
  0x76   :  { %v591_v3 = vmul.f32 %v2528_v57, %v590_v20  ;;  %v617_v50 = vmul.f32 10.0, %v2113_v6  ;;  %v622_v19 = vmul.f32 %v606_v41, %v2533_v10  ;;  %v601_v24 = vmul.f32 %v2545_v9, %v600_v38  ;;  %vm604_vm9 = vmor %vm602_vm3, %vm603_vm13 }
  0x77   :  { %v618_v58 = vmul.f32 10.0, %v2114_v7  ;;  %v619_v52 = vmul.f32 10.0, %v2115_v27  ;;  %v623_v62 = vmul.f32 %v607_v30, %v2575_v29  ;;  %v2729_v41 = vsel %vm2683_vm11, %v2505_v18, %v561_v2 }
  0x78   :  { %4599 = vst [vmem:[#allocation23_spill] sm:$0xff] %v2729_v41  ;;  %v620_v28 = vmul.f32 10.0, %v2116_v31  ;;  %v621_v15 = vmul.f32 10.0, %v2117_v34  ;;  %v624_v16 = vmul.f32 %v608_v0, %v2602_v37  ;;  %v2739_v30 = vsel %vm2698_vm12, %v2517_v56, %v571_v55  ;;  %v2124_v31 = vld [vmem:[#allocation6 + $0xb0] sm:$0xff] }
  0x79   :  { %4600 = vst [vmem:[#allocation24_spill] sm:$0xff] %v2739_v30  ;;  %v625_v1 = vmul.f32 %v609_v59, %v2607_v63  ;;  %v626_v18 = vmul.f32 %v610_v14, %v2615_v44  ;;  %v627_v32 = vmul.f32 %v611_v23, %v2623_v61  ;;  %v2747_v4 = vsel %vm2708_vm0, %v2522_v48, %v581_v36  ;;  %v2118_v36 = vld [vmem:[#allocation6 + $0x80] sm:$0xff] }
  0x7a   :  { %4601 = vst [vmem:[#allocation25_spill] sm:$0xff] %v2747_v4  ;;  %v2752_v0 = vsel %vm2720_vm14, %v2528_v57, %v591_v3  ;;  %v628_v21 = vmul.f32 %v612_v33, %v2634_v17  ;;  %v638_v56 = vmul.f32 1.442695, %v622_v19  ;;  %v2756_v59 = vsel %vm604_vm9, %v2545_v9, %v601_v24  ;;  %v2119_v3 = vld [vmem:[#allocation6 + $0x88] sm:$0xff] }
  0x7b   :  { %4602 = vst [vmem:[#allocation26_spill] sm:$0xff] %v2752_v0  ;;  %v629_v14 = vmul.f32 %v613_v13, %v2642_v51  ;;  %v630_v5 = vmul.f32 %v614_v25, %v2651_v26  ;;  %v640_v39 = vmul.f32 1.442695, %v623_v62  ;;  %v631_v48 = vmul.f32 %v615_v53, %v2675_v43 }
  0x7c   :  { %4603 = vst [vmem:[#allocation27_spill] sm:$0xff] %v2756_v59  ;;  %v632_v23 = vmul.f32 %v616_v12, %v2691_v49  ;;  %v633_v22 = vmul.f32 %v617_v50, %v2729_v41  ;;  %v642_v57 = vmul.f32 1.442695, %v624_v16  ;;  %v634_v60 = vmul.f32 %v618_v58, %v2739_v30  ;;  %v2120_v50 = vld [vmem:[#allocation6 + $0x90] sm:$0xff]  ;;  %v2122_v58 = vld [vmem:[#allocation6 + $0xa0] sm:$0xff] }
  0x7d   :  { %v635_v20 = vmul.f32 %v619_v52, %v2747_v4  ;;  %v636_v8 = vmul.f32 %v620_v28, %v2752_v0  ;;  %v644_v9 = vmul.f32 1.442695, %v625_v1  ;;  %v637_v33 = vmul.f32 %v621_v15, %v2756_v59  ;;  %v2123_v52 = vld [vmem:[#allocation6 + $0xa8] sm:$0xff]  ;;  %v2125_v15 = vld [vmem:[#allocation6 + $0xb8] sm:$0xff]  ;;  %v2126_v1 = vld [vmem:[#allocation6 + $0xc0] sm:$0xff] }
  0x7e   :  { %1815 = vpow2.f32 %v638_v56  ;;  %v646_v38 = vmul.f32 1.442695, %v626_v18  ;;  %v2768_v45 = vstv %s2714_s2  ;;  %v648_v13 = vmul.f32 1.442695, %v627_v32  ;;  %v2127_v32 = vld [vmem:[#allocation6 + $0xc8] sm:$0xff] }
  0x7f   :  { %1817 = vpow2.f32 %v640_v39  ;;  %v650_v2 = vmul.f32 1.442695, %v628_v21  ;;  %v652_v46 = vmul.f32 1.442695, %v629_v14  ;;  %v654_v40 = vmul.f32 1.442695, %v630_v5 }
  0x80   :  { %1819 = vpow2.f32 %v642_v57  ;;  %v656_v25 = vmul.f32 1.442695, %v631_v48  ;;  %v658_v54 = vmul.f32 1.442695, %v632_v23  ;;  %v660_v53 = vmul.f32 1.442695, %v633_v22 }
  0x81   :  { %1821 = vpow2.f32 %v644_v9  ;;  %v662_v55 = vmul.f32 1.442695, %v634_v60  ;;  %v664_v11 = vmul.f32 1.442695, %v635_v20  ;;  %v2770_v35 = vmul.f32 1.442695, %v636_v8 }
  0x82   :  { %1823 = vpow2.f32 %v646_v38  ;;  %v2772_v12 = vmul.f32 1.442695, %v637_v33  ;;  %v688_v47 = vmul.f32 10.0, %v2118_v36  ;;  %v689_v6 = vmul.f32 10.0, %v2119_v3  ;;  %v2128_v5 = vld [vmem:[#allocation6 + $0xd0] sm:$0xff]  ;;  %v2129_v48 = vld [vmem:[#allocation6 + $0xd8] sm:$0xff] }
  0x83   :  { %1825 = vpow2.f32 %v648_v13  ;;  %v690_v19 = vmul.f32 10.0, %v2120_v50  ;;  %v691_v24 = vmul.f32 10.0, %v2121_v42  ;;  %v692_v27 = vmul.f32 10.0, %v2122_v58  ;;  %v2130_v60 = vld [vmem:[#allocation6 + $0xe0] sm:$0xff]  ;;  %v2131_v8 = vld [vmem:[#allocation6 + $0xe8] sm:$0xff]  ;;  %v2132_v13 = vld [vmem:[#allocation6 + $0xf0] sm:$0xff] }
  0x84   :  { %v2774_v7 = vpop.eup %1815  ;;  %1827 = vpow2.f32 %v650_v2  ;;  %v693_v62 = vmul.f32 10.0, %v2123_v52  ;;  %v694_v28 = vmul.f32 10.0, %v2124_v31  ;;  %v695_v16 = vmul.f32 10.0, %v2125_v15  ;;  %v2133_v36 = vld [vmem:[#allocation6 + $0xf8] sm:$0xff] }
  0x85   :  { %v2776_v34 = vpop.eup %1817  ;;  %1829 = vpow2.f32 %v652_v46  ;;  %v696_v18 = vmul.f32 10.0, %v2126_v1  ;;  %v697_v21 = vmul.f32 10.0, %v2127_v32  ;;  %v2782_v14 = vmul.f32 %v2774_v7, %v2768_v45 }
  0x86   :  { %v2778_v56 = vpop.eup %1819  ;;  %1831 = vpow2.f32 %v654_v40  ;;  %v698_v39 = vmul.f32 10.0, %v2128_v5  ;;  %v699_v23 = vmul.f32 10.0, %v2129_v48  ;;  %v2788_v57 = vmul.f32 %v2776_v34, %v2768_v45 }
  0x87   :  { %v2784_v22 = vpop.eup %1821  ;;  %1833 = vpow2.f32 %v656_v25  ;;  %v700_v20 = vmul.f32 10.0, %v2130_v60  ;;  %v701_v9 = vmul.f32 10.0, %v2131_v8  ;;  %v2794_v38 = vmul.f32 %v2778_v56, %v2768_v45 }
  0x88   :  { %v2790_v33 = vpop.eup %1823  ;;  %1835 = vpow2.f32 %v658_v54  ;;  %v702_v2 = vmul.f32 10.0, %v2132_v13  ;;  %v704_v46 = vmul.f32 %v688_v47, %v2533_v10  ;;  %v2801_v25 = vmul.f32 %v2784_v22, %v2768_v45 }
  0x89   :  { %v2797_v40 = vpop.eup %1825  ;;  %1837 = vpow2.f32 %v660_v53  ;;  %v703_v3 = vmul.f32 10.0, %v2133_v36  ;;  %v705_v50 = vmul.f32 %v689_v6, %v2575_v29  ;;  %v2808_v42 = vmul.f32 %v2790_v33, %v2768_v45 }
  0x8a   :  { %v2804_v54 = vpop.eup %1827  ;;  %1839 = vpow2.f32 %v662_v55  ;;  %v706_v47 = vmul.f32 %v690_v19, %v2602_v37  ;;  %v707_v58 = vmul.f32 %v691_v24, %v2607_v63  ;;  %v2816_v52 = vmul.f32 %v2797_v40, %v2768_v45 }
  0x8b   :  { %v2812_v53 = vpop.eup %1829  ;;  %1841 = vpow2.f32 %v664_v11  ;;  %v708_v6 = vmul.f32 %v692_v27, %v2615_v44  ;;  %v709_v31 = vmul.f32 %v693_v62, %v2623_v61  ;;  %v2824_v15 = vmul.f32 %v2804_v54, %v2768_v45 }
  0x8c   :  { %v2820_v55 = vpop.eup %1831  ;;  %v710_v19 = vmul.f32 %v694_v28, %v2634_v17  ;;  %v711_v24 = vmul.f32 %v695_v16, %v2642_v51  ;;  %v720_v1 = vmul.f32 1.442695, %v704_v46  ;;  %1843 = vpow2.f32 %v2770_v35  ;;  %v2139_v17 = vld [vmem:[#allocation6 + $0x128] sm:$0xff] }
  0x8d   :  { %v2828_v11 = vpop.eup %1833  ;;  %v2833_v27 = vmul.f32 %v2812_v53, %v2768_v45  ;;  %v712_v62 = vmul.f32 %v696_v18, %v2651_v26  ;;  %v722_v32 = vmul.f32 1.442695, %v705_v50  ;;  %1845 = vpow2.f32 %v2772_v12 }
  0x8e   :  { %v2836_v5 = vpop.eup %1835  ;;  %v2841_v28 = vmul.f32 %v2820_v55, %v2768_v45  ;;  %v713_v16 = vmul.f32 %v697_v21, %v2675_v43  ;;  %v724_v48 = vmul.f32 1.442695, %v706_v47  ;;  %v2848_v35 = vmul.f32 %v2828_v11, %v2768_v45 }
  0x8f   :  { %v2844_v60 = vpop.eup %1837  ;;  %v714_v18 = vmul.f32 %v698_v39, %v2691_v49  ;;  %v715_v8 = vmul.f32 %v699_v23, %v2729_v41  ;;  %v726_v13 = vmul.f32 1.442695, %v707_v58  ;;  %v716_v46 = vmul.f32 %v700_v20, %v2739_v30 }
  0x90   :  { %v2854_v12 = vpop.eup %1839  ;;  %v717_v21 = vmul.f32 %v701_v9, %v2747_v4  ;;  %1847 = vpow2.f32 %v720_v1  ;;  %v728_v36 = vmul.f32 1.442695, %v708_v6  ;;  %v2862_v47 = vmul.f32 %v2836_v5, %v2768_v45 }
  0x91   :  { %v2858_v50 = vpop.eup %1841  ;;  %v718_v39 = vmul.f32 %v702_v2, %v2752_v0  ;;  %1849 = vpow2.f32 %v722_v32  ;;  %v730_v23 = vmul.f32 1.442695, %v709_v31  ;;  %v2867_v58 = vmul.f32 %v2844_v60, %v2768_v45 }
  0x92   :  { %v719_v20 = vmul.f32 %v703_v3, %v2756_v59  ;;  %1851 = vpow2.f32 %v724_v48  ;;  %v732_v9 = vmul.f32 1.442695, %v710_v19  ;;  %v2870_v1 = vpop.eup %1843  ;;  %v2874_v6 = vmul.f32 %v2854_v12, %v2768_v45 }
  0x93   :  { %v2878_v4 = vmul.f32 %v2858_v50, %v2768_v45  ;;  %1853 = vpow2.f32 %v726_v13  ;;  %v734_v2 = vmul.f32 1.442695, %v711_v24  ;;  %v2880_v31 = vpop.eup %1845  ;;  %v2884_v32 = vmul.f32 %v2870_v1, %v2768_v45 }
  0x94   :  { %1855 = vpow2.f32 %v728_v36  ;;  %v736_v3 = vmul.f32 1.442695, %v712_v62  ;;  %v738_v19 = vmul.f32 1.442695, %v713_v16  ;;  %v2888_v48 = vmul.f32 %v2880_v31, %v2768_v45  ;;  %v2134_v36 = vld [vmem:[#allocation6 + $0x100] sm:$0xff] }
  0x95   :  { %1857 = vpow2.f32 %v730_v23  ;;  %v740_v59 = vmul.f32 1.442695, %v714_v18  ;;  %v742_v0 = vmul.f32 1.442695, %v715_v8  ;;  %v744_v24 = vmul.f32 1.442695, %v716_v46 }
  0x96   :  { %4604 = vst [vmem:[#allocation28_spill] sm:$0xff] %v2888_v48  ;;  %v1848_v30 = vpop.eup %1847  ;;  %1859 = vpow2.f32 %v732_v9  ;;  %v746_v13 = vmul.f32 1.442695, %v717_v21  ;;  %v748_v41 = vmul.f32 1.442695, %v718_v39  ;;  %v2891_v26 = vstv %s2852_s3  ;;  %v2135_v23 = vld [vmem:[#allocation6 + $0x108] sm:$0xff] }
  0x97   :  { %v1850_v49 = vpop.eup %1849  ;;  %1861 = vpow2.f32 %v734_v2  ;;  %v750_v43 = vmul.f32 1.442695, %v719_v20  ;;  %v2893_v62 = vmul.f32 10.0, %v2134_v36  ;;  %v754_v45 = vmul.f32 %v1848_v30, %v2891_v26  ;;  %v2136_v8 = vld [vmem:[#allocation6 + $0x110] sm:$0xff]  ;;  %v2137_v39 = vld [vmem:[#allocation6 + $0x118] sm:$0xff]  ;;  %v2138_v2 = vld [vmem:[#allocation6 + $0x120] sm:$0xff] }
  0x98   :  { %v1852_v16 = vpop.eup %1851  ;;  %1863 = vpow2.f32 %v736_v3  ;;  %v2896_v18 = vmul.f32 10.0, %v2135_v23  ;;  %v2898_v9 = vmul.f32 10.0, %v2136_v8  ;;  %v755_v21 = vmul.f32 %v1850_v49, %v2891_v26  ;;  %v2140_v48 = vld [vmem:[#allocation6 + $0x130] sm:$0xff] }
  0x99   :  { %v1854_v46 = vpop.eup %1853  ;;  %1865 = vpow2.f32 %v738_v19  ;;  %v2901_v20 = vmul.f32 10.0, %v2137_v39  ;;  %v2903_v36 = vmul.f32 10.0, %v2138_v2  ;;  %v756_v3 = vmul.f32 %v1852_v16, %v2891_v26 }
  0x9a   :  { %v1856_v51 = vpop.eup %1855  ;;  %1867 = vpow2.f32 %v740_v59  ;;  %v2907_v23 = vadd.f32 %v1848_v30, %v2774_v7  ;;  %v2909_v8 = vmul.f32 10.0, %v2139_v17  ;;  %v757_v19 = vmul.f32 %v1854_v46, %v2891_v26 }
  0x9b   :  { %4605 = vst [vmem:[#allocation29_spill] sm:$0xff] %v2903_v36  ;;  %v1858_v61 = vpop.eup %1857  ;;  %1869 = vpow2.f32 %v742_v0  ;;  %v2913_v39 = vadd.f32 %v1850_v49, %v2776_v34  ;;  %v2915_v2 = vmul.f32 10.0, %v2140_v48  ;;  %v758_v59 = vmul.f32 %v1856_v51, %v2891_v26 }
  0x9c   :  { %v1860_v36 = vpop.eup %1859  ;;  %1871 = vpow2.f32 %v744_v24  ;;  %v2919_v30 = vadd.f32 %v754_v45, %v2782_v14  ;;  %v2922_v17 = vadd.f32 %v1852_v16, %v2778_v56  ;;  %v759_v0 = vmul.f32 %v1858_v61, %v2891_v26 }
  0x9d   :  { %4606 = vst [vmem:[#allocation30_spill] sm:$0xff] %v2913_v39  ;;  %v1862_v7 = vpop.eup %1861  ;;  %1873 = vpow2.f32 %v746_v13  ;;  %v760_v49 = vmul.f32 %v1860_v36, %v2891_v26  ;;  %v2927_v34 = vadd.f32 %v755_v21, %v2788_v57  ;;  %v2931_v39 = vadd.f32 %v756_v3, %v2794_v38 }
  0x9e   :  { %v1864_v48 = vpop.eup %1863  ;;  %1875 = vpow2.f32 %v748_v41  ;;  %v761_v24 = vmul.f32 %v1862_v7, %v2891_v26  ;;  %v2934_v14 = vadd.f32 %v1854_v46, %v2784_v22  ;;  %v2938_v16 = vadd.f32 %v757_v19, %v2801_v25  ;;  %v2141_v19 = vld [vmem:[#allocation6 + $0x138] sm:$0xff] }
  0x9f   :  { %v1866_v56 = vpop.eup %1865  ;;  %v762_v13 = vmul.f32 %v1864_v48, %v2891_v26  ;;  %v2941_v45 = vadd.f32 %v1856_v51, %v2790_v33  ;;  %v2944_v57 = vadd.f32 %v1858_v61, %v2797_v40  ;;  %1877 = vpow2.f32 %v750_v43 }
  0xa0   :  { %v1868_v41 = vpop.eup %1867  ;;  %v763_v38 = vmul.f32 %v1866_v56, %v2891_v26  ;;  %v2948_v21 = vadd.f32 %v758_v59, %v2808_v42  ;;  %v2951_v22 = vadd.f32 %v1860_v36, %v2804_v54  ;;  %v2955_v3 = vadd.f32 %v759_v0, %v2816_v52  ;;  %v2142_v0 = vld [vmem:[#allocation6 + $0x140] sm:$0xff] }
  0xa1   :  { %v1870_v46 = vpop.eup %1869  ;;  %v764_v25 = vmul.f32 %v1868_v41, %v2891_v26  ;;  %v2958_v51 = vadd.f32 %v760_v49, %v2824_v15  ;;  %v2961_v61 = vadd.f32 %v1862_v7, %v2812_v53  ;;  %v2965_v40 = vadd.f32 %v761_v24, %v2833_v27  ;;  %v2143_v24 = vld [vmem:[#allocation6 + $0x148] sm:$0xff] }
  0xa2   :  { %v1872_v43 = vpop.eup %1871  ;;  %v765_v33 = vmul.f32 %v1870_v46, %v2891_v26  ;;  %v2968_v54 = vadd.f32 %v1864_v48, %v2820_v55  ;;  %v2971_v42 = vadd.f32 %v1866_v56, %v2828_v11  ;;  %v2975_v15 = vadd.f32 %v762_v13, %v2841_v28 }
  0xa3   :  { %v1874_v52 = vpop.eup %1873  ;;  %v766_v36 = vmul.f32 %v1872_v43, %v2891_v26  ;;  %v2978_v53 = vadd.f32 %v1868_v41, %v2836_v5  ;;  %v809_v59 = vmul.f32 10.0, %v2141_v19  ;;  %v2982_v55 = vadd.f32 %v763_v38, %v2848_v35 }
  0xa4   :  { %v1876_v7 = vpop.eup %1875  ;;  %v767_v27 = vmul.f32 %v1874_v52, %v2891_v26  ;;  %v2985_v11 = vadd.f32 %v1870_v46, %v2844_v60  ;;  %v810_v49 = vmul.f32 10.0, %v2142_v0  ;;  %v2989_v28 = vadd.f32 %v764_v25, %v2862_v47  ;;  %v2144_v60 = vld [vmem:[#allocation6 + $0x150] sm:$0xff] }
  0xa5   :  { %v768_v48 = vmul.f32 %v1876_v7, %v2891_v26  ;;  %v2992_v5 = vadd.f32 %v1872_v43, %v2854_v12  ;;  %v811_v56 = vmul.f32 10.0, %v2143_v24  ;;  %v1878_v13 = vpop.eup %1877  ;;  %v2995_v41 = vadd.f32 %v765_v33, %v2867_v58  ;;  %v2145_v12 = vld [vmem:[#allocation6 + $0x158] sm:$0xff]  ;;  %v2146_v33 = vld [vmem:[#allocation6 + $0x160] sm:$0xff] }
  0xa6   :  { %v2998_v35 = vadd.f32 %v1874_v52, %v2858_v50  ;;  %v812_v38 = vmul.f32 10.0, %v2144_v60  ;;  %v818_v46 = vmul.f32 %v2893_v62, %v2533_v10  ;;  %v769_v47 = vmul.f32 %v1878_v13, %v2891_v26  ;;  %v4612_v24 = vld [vmem:[#allocation29_spill] sm:$0xff] }
  0xa7   :  { %v3004_v25 = vadd.f32 %v766_v36, %v2874_v6  ;;  %v813_v43 = vmul.f32 10.0, %v2145_v12  ;;  %v819_v19 = vmul.f32 %v2896_v18, %v2575_v29  ;;  %v3011_v50 = vadd.f32 %v767_v27, %v2878_v4  ;;  %v2147_v18 = vld [vmem:[#allocation6 + $0x168] sm:$0xff]  ;;  %v2148_v27 = vld [vmem:[#allocation6 + $0x170] sm:$0xff] }
  0xa8   :  { %4607 = vst [vmem:[#allocation31_spill] sm:$0xff] %v2998_v35  ;;  %v3014_v58 = vadd.f32 %v1876_v7, %v2870_v1  ;;  %v814_v62 = vmul.f32 10.0, %v2146_v33  ;;  %v820_v26 = vmul.f32 %v2898_v9, %v2602_v37  ;;  %v3019_v6 = vadd.f32 %v768_v48, %v2884_v32  ;;  %v2149_v1 = vld [vmem:[#allocation6 + $0x178] sm:$0xff]  ;;  %v4615_v32 = vld [vmem:[#allocation17_spill] sm:$0xff]  ;;  %v4616_v48 = vld [vmem:[#allocation18_spill] sm:$0xff] }
  0xa9   :  { %4608 = vst [vmem:[#allocation32_spill] sm:$0xff] %v3011_v50  ;;  %v3022_v52 = vadd.f32 %v1878_v13, %v2880_v31  ;;  %v815_v36 = vmul.f32 10.0, %v2147_v18  ;;  %v821_v4 = vmul.f32 %v2901_v20, %v2607_v63  ;;  %v816_v0 = vmul.f32 10.0, %v2148_v27  ;;  %v4613_v9 = vld [vmem:[#allocation28_spill] sm:$0xff]  ;;  %v4624_v35 = vld [vmem:[#allocation26_spill] sm:$0xff] }
  0xaa   :  { %4609 = vst [vmem:[#allocation33_spill] sm:$0xff] %v3014_v58  ;;  %v817_v7 = vmul.f32 10.0, %v2149_v1  ;;  %v822_v60 = vmul.f32 %v4612_v24, %v2615_v44  ;;  %v834_v12 = vmul.f32 1.442695, %v818_v46  ;;  %v3029_v33 = vadd.f32 %v769_v47, %v4613_v9  ;;  %v4618_v27 = vld [vmem:[#allocation20_spill] sm:$0xff]  ;;  %v4619_v1 = vld [vmem:[#allocation21_spill] sm:$0xff] }
  0xab   :  { %4610 = vst [vmem:[#allocation34_spill] sm:$0xff] %v3019_v6  ;;  %v823_v31 = vmul.f32 %v2909_v8, %v4615_v32  ;;  %v824_v13 = vmul.f32 %v2915_v2, %v4616_v48  ;;  %v836_v18 = vmul.f32 1.442695, %v819_v19  ;;  %v4617_v6 = vld [vmem:[#allocation19_spill] sm:$0xff]  ;;  %v827_v50 = vmul.f32 %v811_v56, %v4619_v1  ;;  %v4620_v24 = vld [vmem:[#allocation22_spill] sm:$0xff]  ;;  %v4622_v9 = vld [vmem:[#allocation24_spill] sm:$0xff] }
  0xac   :  { %4611 = vst [vmem:[#allocation35_spill] sm:$0xff] %v3022_v52  ;;  %v825_v20 = vmul.f32 %v809_v59, %v4617_v6  ;;  %v826_v52 = vmul.f32 %v810_v49, %v4618_v27  ;;  %v838_v63 = vmul.f32 1.442695, %v820_v26  ;;  %v828_v46 = vmul.f32 %v812_v38, %v4620_v24  ;;  %v4621_v44 = vld [vmem:[#allocation23_spill] sm:$0xff]  ;;  %v4623_v8 = vld [vmem:[#allocation25_spill] sm:$0xff] }
  0xad   :  { %4614 = vst [vmem:[#allocation29_spill] sm:$0xff] %v3029_v33  ;;  %v829_v47 = vmul.f32 %v813_v43, %v4621_v44  ;;  %v830_v33 = vmul.f32 %v814_v62, %v4622_v9  ;;  %v840_v58 = vmul.f32 1.442695, %v821_v4  ;;  %v831_v32 = vmul.f32 %v815_v36, %v4623_v8  ;;  %v4625_v48 = vld [vmem:[#allocation27_spill] sm:$0xff]  ;;  %v4627_v9 = vld [vmem:[#allocation30_spill] sm:$0xff]  ;;  %v2161_v44 = vld [vmem:[#allocation6 + $0x1d8] sm:$0xff] }
  0xae   :  { %v832_v2 = vmul.f32 %v816_v0, %v4624_v35  ;;  %1879 = vpow2.f32 %v834_v12  ;;  %v842_v19 = vmul.f32 1.442695, %v822_v60  ;;  %v833_v59 = vmul.f32 %v817_v7, %v4625_v48  ;;  %v2150_v12 = vld [vmem:[#allocation6 + $0x180] sm:$0xff] }
  0xaf   :  { %1881 = vpow2.f32 %v836_v18  ;;  %v844_v49 = vmul.f32 1.442695, %v823_v31  ;;  %v3045_v27 = vstv %s3008_s5  ;;  %v846_v56 = vmul.f32 1.442695, %v824_v13  ;;  %v2151_v31 = vld [vmem:[#allocation6 + $0x188] sm:$0xff]  ;;  %v2152_v13 = vld [vmem:[#allocation6 + $0x190] sm:$0xff] }
  0xb0   :  { %1883 = vpow2.f32 %v838_v63  ;;  %v848_v38 = vmul.f32 1.442695, %v825_v20  ;;  %v850_v26 = vmul.f32 1.442695, %v826_v52  ;;  %v852_v43 = vmul.f32 1.442695, %v827_v50 }
  0xb1   :  { %1885 = vpow2.f32 %v840_v58  ;;  %v854_v62 = vmul.f32 1.442695, %v828_v46  ;;  %v856_v4 = vmul.f32 1.442695, %v829_v47  ;;  %v858_v36 = vmul.f32 1.442695, %v830_v33 }
  0xb2   :  { %1887 = vpow2.f32 %v842_v19  ;;  %v860_v8 = vmul.f32 1.442695, %v831_v32  ;;  %v862_v0 = vmul.f32 1.442695, %v832_v2  ;;  %v864_v60 = vmul.f32 1.442695, %v833_v59 }
  0xb3   :  { %1889 = vpow2.f32 %v844_v49  ;;  %v3047_v7 = vmul.f32 10.0, %v2150_v12  ;;  %v3049_v18 = vmul.f32 10.0, %v2151_v31  ;;  %v3051_v52 = vmul.f32 10.0, %v2152_v13  ;;  %v2153_v50 = vld [vmem:[#allocation6 + $0x198] sm:$0xff]  ;;  %v2154_v20 = vld [vmem:[#allocation6 + $0x1a0] sm:$0xff]  ;;  %v2155_v47 = vld [vmem:[#allocation6 + $0x1a8] sm:$0xff] }
  0xb4   :  { %v1880_v63 = vpop.eup %1879  ;;  %1891 = vpow2.f32 %v846_v56  ;;  %v3053_v58 = vmul.f32 10.0, %v2153_v50  ;;  %v3055_v33 = vmul.f32 10.0, %v2154_v20  ;;  %v3058_v2 = vmul.f32 10.0, %v2155_v47  ;;  %v2156_v19 = vld [vmem:[#allocation6 + $0x1b0] sm:$0xff]  ;;  %v2157_v56 = vld [vmem:[#allocation6 + $0x1b8] sm:$0xff]  ;;  %v2158_v31 = vld [vmem:[#allocation6 + $0x1c0] sm:$0xff] }
  0xb5   :  { %v1882_v32 = vpop.eup %1881  ;;  %1893 = vpow2.f32 %v848_v38  ;;  %v868_v46 = vmul.f32 %v1880_v63, %v3045_v27  ;;  %v3060_v59 = vmul.f32 10.0, %v2156_v19  ;;  %v3062_v12 = vmul.f32 10.0, %v2157_v56  ;;  %v2159_v50 = vld [vmem:[#allocation6 + $0x1c8] sm:$0xff]  ;;  %v2160_v19 = vld [vmem:[#allocation6 + $0x1d0] sm:$0xff] }
  0xb6   :  { %v1884_v49 = vpop.eup %1883  ;;  %1895 = vpow2.f32 %v850_v26  ;;  %v3064_v13 = vmul.f32 10.0, %v2158_v31  ;;  %v3066_v20 = vmul.f32 10.0, %v2159_v50  ;;  %v869_v48 = vmul.f32 %v1882_v32, %v3045_v27 }
  0xb7   :  { %v1886_v38 = vpop.eup %1885  ;;  %1897 = vpow2.f32 %v852_v43  ;;  %v3070_v47 = vadd.f32 %v1880_v63, %v2907_v23  ;;  %v3072_v35 = vmul.f32 10.0, %v2160_v19  ;;  %v870_v56 = vmul.f32 %v1884_v49, %v3045_v27  ;;  %v2162_v63 = vld [vmem:[#allocation6 + $0x1e0] sm:$0xff] }
  0xb8   :  { %v1888_v26 = vpop.eup %1887  ;;  %1899 = vpow2.f32 %v854_v62  ;;  %v3076_v31 = vadd.f32 %v1882_v32, %v4627_v9  ;;  %v3078_v50 = vmul.f32 10.0, %v2161_v44  ;;  %v871_v43 = vmul.f32 %v1886_v38, %v3045_v27 }
  0xb9   :  { %4626 = vst [vmem:[#allocation28_spill] sm:$0xff] %v3070_v47  ;;  %v1890_v24 = vpop.eup %1889  ;;  %1901 = vpow2.f32 %v856_v4  ;;  %v3082_v23 = vadd.f32 %v868_v46, %v2919_v30  ;;  %v3084_v19 = vmul.f32 10.0, %v2162_v63  ;;  %v872_v62 = vmul.f32 %v1888_v26, %v3045_v27 }
  0xba   :  { %4628 = vst [vmem:[#allocation30_spill] sm:$0xff] %v3076_v31  ;;  %v1892_v47 = vpop.eup %1891  ;;  %1903 = vpow2.f32 %v858_v36  ;;  %v873_v9 = vmul.f32 %v1890_v24, %v3045_v27  ;;  %v3089_v32 = vadd.f32 %v1884_v49, %v2922_v17  ;;  %v3093_v31 = vadd.f32 %v869_v48, %v2927_v34 }
  0xbb   :  { %v1894_v44 = vpop.eup %1893  ;;  %1905 = vpow2.f32 %v860_v8  ;;  %v874_v4 = vmul.f32 %v1892_v47, %v3045_v27  ;;  %v3096_v30 = vadd.f32 %v1886_v38, %v2934_v14  ;;  %v3100_v63 = vadd.f32 %v870_v56, %v2931_v39 }
  0xbc   :  { %v1896_v46 = vpop.eup %1895  ;;  %1907 = vpow2.f32 %v862_v0  ;;  %v875_v36 = vmul.f32 %v1894_v44, %v3045_v27  ;;  %v3103_v17 = vadd.f32 %v1888_v26, %v2941_v45  ;;  %v3107_v34 = vadd.f32 %v871_v43, %v2938_v16 }
  0xbd   :  { %v1898_v49 = vpop.eup %1897  ;;  %1909 = vpow2.f32 %v864_v60  ;;  %v876_v8 = vmul.f32 %v1896_v46, %v3045_v27  ;;  %v3110_v14 = vadd.f32 %v1890_v24, %v2944_v57  ;;  %v3114_v38 = vadd.f32 %v872_v62, %v2948_v21 }
  0xbe   :  { %v1900_v48 = vpop.eup %1899  ;;  %v877_v0 = vmul.f32 %v1898_v49, %v3045_v27  ;;  %v3117_v39 = vadd.f32 %v873_v9, %v2955_v3  ;;  %v3120_v45 = vadd.f32 %v1892_v47, %v2951_v22  ;;  %v3124_v16 = vadd.f32 %v874_v4, %v2958_v51  ;;  %v2163_v47 = vld [vmem:[#allocation6 + $0x1e8] sm:$0xff]  ;;  %v2164_v9 = vld [vmem:[#allocation6 + $0x1f0] sm:$0xff] }
  0xbf   :  { %v1902_v60 = vpop.eup %1901  ;;  %v878_v26 = vmul.f32 %v1900_v48, %v3045_v27  ;;  %v3127_v57 = vadd.f32 %v1894_v44, %v2961_v61  ;;  %v3130_v24 = vadd.f32 %v1896_v46, %v2968_v54  ;;  %v3134_v3 = vadd.f32 %v875_v36, %v2965_v40 }
  0xc0   :  { %v1904_v21 = vpop.eup %1903  ;;  %v879_v56 = vmul.f32 %v1902_v60, %v3045_v27  ;;  %v3137_v22 = vadd.f32 %v1898_v49, %v2971_v42  ;;  %v929_v43 = vmul.f32 10.0, %v2163_v47  ;;  %v3141_v61 = vadd.f32 %v876_v8, %v2975_v15  ;;  %v2165_v8 = vld [vmem:[#allocation6 + $0x1f8] sm:$0xff] }
  0xc1   :  { %v1906_v62 = vpop.eup %1905  ;;  %v880_v51 = vmul.f32 %v1904_v21, %v3045_v27  ;;  %v3144_v54 = vadd.f32 %v1900_v48, %v2978_v53  ;;  %v930_v44 = vmul.f32 10.0, %v2164_v9  ;;  %v3148_v46 = vadd.f32 %v877_v0, %v2982_v55 }
  0xc2   :  { %v1908_v4 = vpop.eup %1907  ;;  %v881_v40 = vmul.f32 %v1906_v62, %v3045_v27  ;;  %v3151_v42 = vadd.f32 %v1902_v60, %v2985_v11  ;;  %v932_v36 = vmul.f32 %v3047_v7, %v2533_v10  ;;  %v3157_v53 = vadd.f32 %v878_v26, %v2989_v28  ;;  %v4630_v60 = vld [vmem:[#allocation31_spill] sm:$0xff] }
  0xc3   :  { %v1910_v49 = vpop.eup %1909  ;;  %v882_v15 = vmul.f32 %v1908_v4, %v3045_v27  ;;  %v931_v48 = vmul.f32 10.0, %v2165_v8  ;;  %v933_v47 = vmul.f32 %v3049_v18, %v2575_v29  ;;  %v3163_v0 = vadd.f32 %v879_v56, %v2995_v41  ;;  %v4631_v18 = vld [vmem:[#allocation33_spill] sm:$0xff]  ;;  %v4633_v56 = vld [vmem:[#allocation32_spill] sm:$0xff] }
  0xc4   :  { %v883_v55 = vmul.f32 %v1910_v49, %v3045_v27  ;;  %v3166_v11 = vadd.f32 %v1904_v21, %v2992_v5  ;;  %v934_v7 = vmul.f32 %v3051_v52, %v2602_v37  ;;  %v3173_v28 = vadd.f32 %v880_v51, %v3004_v25  ;;  %v4632_v27 = vld [vmem:[#allocation15_spill] sm:$0xff]  ;;  %v4635_v52 = vld [vmem:[#allocation16_spill] sm:$0xff]  ;;  %v4636_v51 = vld [vmem:[#allocation34_spill] sm:$0xff] }
  0xc5   :  { %v3176_v26 = vadd.f32 %v1906_v62, %v4630_v60  ;;  %v3179_v9 = vadd.f32 %v1908_v4, %v4631_v18  ;;  %v935_v41 = vmul.f32 %v3053_v58, %v4632_v27  ;;  %v3184_v5 = vadd.f32 %v881_v40, %v4633_v56  ;;  %v4634_v21 = vld [vmem:[#allocation35_spill] sm:$0xff]  ;;  %v4637_v62 = vld [vmem:[#allocation17_spill] sm:$0xff]  ;;  %v4638_v60 = vld [vmem:[#allocation18_spill] sm:$0xff] }
  0xc6   :  { %4629 = vst [vmem:[#allocation36_spill] sm:$0xff] %v3173_v28  ;;  %v3187_v8 = vadd.f32 %v1910_v49, %v4634_v21  ;;  %v936_v37 = vmul.f32 %v3055_v33, %v4635_v52  ;;  %v948_v25 = vmul.f32 1.442695, %v932_v36  ;;  %v3192_v28 = vadd.f32 %v882_v15, %v4636_v51  ;;  %v4639_v27 = vld [vmem:[#allocation29_spill] sm:$0xff]  ;;  %v4641_v56 = vld [vmem:[#allocation20_spill] sm:$0xff]  ;;  %v4642_v21 = vld [vmem:[#allocation22_spill] sm:$0xff] }
  0xc7   :  { %v937_v4 = vmul.f32 %v3058_v2, %v4637_v62  ;;  %v938_v18 = vmul.f32 %v3060_v59, %v4638_v60  ;;  %v950_v58 = vmul.f32 1.442695, %v933_v47  ;;  %v3199_v40 = vadd.f32 %v883_v55, %v4639_v27  ;;  %v4643_v51 = vld [vmem:[#allocation23_spill] sm:$0xff]  ;;  %v4644_v55 = vld [vmem:[#allocation24_spill] sm:$0xff] }
  0xc8   :  { %v939_v49 = vmul.f32 %v3062_v12, %v4617_v6  ;;  %v940_v33 = vmul.f32 %v3064_v13, %v4641_v56  ;;  %v952_v36 = vmul.f32 1.442695, %v934_v7  ;;  %v941_v15 = vmul.f32 %v3066_v20, %v4619_v1  ;;  %v4646_v13 = vld [vmem:[#allocation26_spill] sm:$0xff]  ;;  %v4647_v56 = vld [vmem:[#allocation27_spill] sm:$0xff] }
  0xc9   :  { %4640 = vst [vmem:[#allocation31_spill] sm:$0xff] %v3199_v40  ;;  %v942_v2 = vmul.f32 %v3072_v35, %v4642_v21  ;;  %v943_v59 = vmul.f32 %v3078_v50, %v4643_v51  ;;  %v954_v47 = vmul.f32 1.442695, %v935_v41  ;;  %v944_v27 = vmul.f32 %v3084_v19, %v4644_v55  ;;  %v4645_v40 = vld [vmem:[#allocation25_spill] sm:$0xff]  ;;  %v4653_v55 = vld [vmem:[#allocation30_spill] sm:$0xff] }
  0xca   :  { %v945_v12 = vmul.f32 %v929_v43, %v4645_v40  ;;  %1911 = vpow2.f32 %v948_v25  ;;  %v956_v6 = vmul.f32 1.442695, %v936_v37  ;;  %v946_v7 = vmul.f32 %v930_v44, %v4646_v13  ;;  %v2175_v13 = vld [vmem:[#allocation6 + $0x248] sm:$0xff] }
  0xcb   :  { %v947_v60 = vmul.f32 %v931_v48, %v4647_v56  ;;  %1913 = vpow2.f32 %v950_v58  ;;  %v958_v20 = vmul.f32 1.442695, %v937_v4  ;;  %v960_v1 = vmul.f32 1.442695, %v938_v18  ;;  %v2166_v48 = vld [vmem:[#allocation6 + $0x200] sm:$0xff]  ;;  %v2167_v18 = vld [vmem:[#allocation6 + $0x208] sm:$0xff] }
  0xcc   :  { %1915 = vpow2.f32 %v952_v36  ;;  %v962_v35 = vmul.f32 1.442695, %v939_v49  ;;  %v3217_v21 = vstv %s3170_s6  ;;  %v964_v50 = vmul.f32 1.442695, %v940_v33  ;;  %v2168_v36 = vld [vmem:[#allocation6 + $0x210] sm:$0xff]  ;;  %v4650_v56 = vld [vmem:[#allocation28_spill] sm:$0xff] }
  0xcd   :  { %1917 = vpow2.f32 %v954_v47  ;;  %v966_v41 = vmul.f32 1.442695, %v941_v15  ;;  %v968_v51 = vmul.f32 1.442695, %v942_v2  ;;  %v970_v19 = vmul.f32 1.442695, %v943_v59 }
  0xce   :  { %1919 = vpow2.f32 %v956_v6  ;;  %v972_v43 = vmul.f32 1.442695, %v944_v27  ;;  %v974_v25 = vmul.f32 1.442695, %v945_v12  ;;  %v976_v37 = vmul.f32 1.442695, %v946_v7 }
  0xcf   :  { %1921 = vpow2.f32 %v958_v20  ;;  %v3219_v44 = vmul.f32 1.442695, %v947_v60  ;;  %v3221_v58 = vmul.f32 10.0, %v2166_v48  ;;  %v3223_v49 = vmul.f32 10.0, %v2167_v18  ;;  %v2169_v15 = vld [vmem:[#allocation6 + $0x218] sm:$0xff]  ;;  %v2170_v59 = vld [vmem:[#allocation6 + $0x220] sm:$0xff] }
  0xd0   :  { %v1912_v4 = vpop.eup %1911  ;;  %1923 = vpow2.f32 %v960_v1  ;;  %v3225_v33 = vmul.f32 10.0, %v2168_v36  ;;  %v3227_v6 = vmul.f32 10.0, %v2169_v15  ;;  %v3229_v47 = vmul.f32 10.0, %v2170_v59  ;;  %v2171_v60 = vld [vmem:[#allocation6 + $0x228] sm:$0xff]  ;;  %v2172_v12 = vld [vmem:[#allocation6 + $0x230] sm:$0xff]  ;;  %v2173_v48 = vld [vmem:[#allocation6 + $0x238] sm:$0xff] }
  0xd1   :  { %v1914_v2 = vpop.eup %1913  ;;  %1925 = vpow2.f32 %v962_v35  ;;  %v3231_v27 = vmul.f32 10.0, %v2171_v60  ;;  %v3233_v7 = vmul.f32 10.0, %v2172_v12  ;;  %v982_v20 = vmul.f32 %v1912_v4, %v3217_v21  ;;  %v2174_v36 = vld [vmem:[#allocation6 + $0x240] sm:$0xff] }
  0xd2   :  { %v1916_v1 = vpop.eup %1915  ;;  %1927 = vpow2.f32 %v964_v50  ;;  %v3236_v18 = vmul.f32 10.0, %v2173_v48  ;;  %v3238_v15 = vmul.f32 10.0, %v2174_v36  ;;  %v983_v59 = vmul.f32 %v1914_v2, %v3217_v21 }
  0xd3   :  { %v1918_v35 = vpop.eup %1917  ;;  %1929 = vpow2.f32 %v966_v41  ;;  %v3242_v60 = vadd.f32 %v1912_v4, %v4650_v56  ;;  %v3244_v12 = vmul.f32 10.0, %v2175_v13  ;;  %v984_v50 = vmul.f32 %v1916_v1, %v3217_v21  ;;  %v2177_v4 = vld [vmem:[#allocation6 + $0x258] sm:$0xff] }
  0xd4   :  { %4648 = vst [vmem:[#allocation33_spill] sm:$0xff] %v3236_v18  ;;  %v1920_v40 = vpop.eup %1919  ;;  %1931 = vpow2.f32 %v968_v51  ;;  %v3248_v48 = vadd.f32 %v1914_v2, %v4653_v55  ;;  %v2176_v18 = vld [vmem:[#allocation6 + $0x250] sm:$0xff]  ;;  %v985_v41 = vmul.f32 %v1918_v35, %v3217_v21  ;;  %v3261_v55 = vadd.f32 %v1916_v1, %v3089_v32 }
  0xd5   :  { %4649 = vst [vmem:[#allocation32_spill] sm:$0xff] %v3238_v15  ;;  %v3250_v36 = vmul.f32 10.0, %v2176_v18  ;;  %v1922_v15 = vpop.eup %1921  ;;  %1933 = vpow2.f32 %v970_v19  ;;  %v986_v56 = vmul.f32 %v1920_v40, %v3217_v21  ;;  %v3265_v18 = vadd.f32 %v983_v59, %v3093_v31 }
  0xd6   :  { %4651 = vst [vmem:[#allocation35_spill] sm:$0xff] %v3242_v60  ;;  %v3254_v60 = vmul.f32 10.0, %v2177_v4  ;;  %v1924_v13 = vpop.eup %1923  ;;  %1935 = vpow2.f32 %v972_v43  ;;  %v987_v51 = vmul.f32 %v1922_v15, %v3217_v21  ;;  %v3268_v4 = vadd.f32 %v1918_v35, %v3096_v30 }
  0xd7   :  { %4652 = vst [vmem:[#allocation34_spill] sm:$0xff] %v3244_v12  ;;  %v3258_v12 = vadd.f32 %v982_v20, %v3082_v23  ;;  %v1926_v2 = vpop.eup %1925  ;;  %1937 = vpow2.f32 %v974_v25  ;;  %v988_v19 = vmul.f32 %v1924_v13, %v3217_v21  ;;  %v3272_v23 = vadd.f32 %v984_v50, %v3100_v63  ;;  %v2178_v50 = vld [vmem:[#allocation6 + $0x260] sm:$0xff] }
  0xd8   :  { %4654 = vst [vmem:[#allocation29_spill] sm:$0xff] %v3248_v48  ;;  %v1928_v48 = vpop.eup %1927  ;;  %1939 = vpow2.f32 %v976_v37  ;;  %v989_v43 = vmul.f32 %v1926_v2, %v3217_v21  ;;  %v3275_v32 = vadd.f32 %v1920_v40, %v3103_v17  ;;  %v3279_v20 = vadd.f32 %v985_v41, %v3107_v34 }
  0xd9   :  { %v1930_v1 = vpop.eup %1929  ;;  %v990_v25 = vmul.f32 %v1928_v48, %v3217_v21  ;;  %v3282_v31 = vadd.f32 %v986_v56, %v3114_v38  ;;  %v3285_v30 = vadd.f32 %v1922_v15, %v3110_v14  ;;  %1941 = vpow2.f32 %v3219_v44 }
  0xda   :  { %v1932_v37 = vpop.eup %1931  ;;  %v991_v63 = vmul.f32 %v1930_v1, %v3217_v21  ;;  %v3290_v17 = vadd.f32 %v987_v51, %v3117_v39  ;;  %v3293_v40 = vadd.f32 %v1924_v13, %v3120_v45  ;;  %v3297_v38 = vadd.f32 %v988_v19, %v3124_v16 }
  0xdb   :  { %v1934_v35 = vpop.eup %1933  ;;  %v992_v34 = vmul.f32 %v1932_v37, %v3217_v21  ;;  %v3300_v14 = vadd.f32 %v1926_v2, %v3127_v57  ;;  %v3303_v15 = vadd.f32 %v1928_v48, %v3130_v24  ;;  %v3307_v39 = vadd.f32 %v989_v43, %v3134_v3  ;;  %v2179_v48 = vld [vmem:[#allocation6 + $0x268] sm:$0xff] }
  0xdc   :  { %v1936_v44 = vpop.eup %1935  ;;  %v993_v59 = vmul.f32 %v1934_v35, %v3217_v21  ;;  %v3310_v45 = vadd.f32 %v1930_v1, %v3137_v22  ;;  %v1042_v41 = vmul.f32 10.0, %v2178_v50  ;;  %v3314_v57 = vadd.f32 %v990_v25, %v3141_v61 }
  0xdd   :  { %v1938_v56 = vpop.eup %1937  ;;  %v994_v16 = vmul.f32 %v1936_v44, %v3217_v21  ;;  %v3317_v24 = vadd.f32 %v1932_v37, %v3144_v54  ;;  %v1043_v13 = vmul.f32 10.0, %v2179_v48  ;;  %v3321_v2 = vadd.f32 %v991_v63, %v3148_v46  ;;  %v2180_v54 = vld [vmem:[#allocation6 + $0x270] sm:$0xff]  ;;  %v2181_v63 = vld [vmem:[#allocation6 + $0x278] sm:$0xff] }
  0xde   :  { %v1940_v51 = vpop.eup %1939  ;;  %v995_v3 = vmul.f32 %v1938_v56, %v3217_v21  ;;  %v3324_v22 = vadd.f32 %v1934_v35, %v3151_v42  ;;  %v1046_v19 = vmul.f32 %v3221_v58, %v2533_v10  ;;  %v3330_v43 = vadd.f32 %v992_v34, %v3157_v53  ;;  %v4655_v58 = vld [vmem:[#allocation14_spill] sm:$0xff]  ;;  %v4656_v53 = vld [vmem:[#allocation36_spill] sm:$0xff] }
  0xdf   :  { %v996_v61 = vmul.f32 %v1940_v51, %v3217_v21  ;;  %v1044_v1 = vmul.f32 10.0, %v2180_v54  ;;  %v1047_v25 = vmul.f32 %v3223_v49, %v2575_v29  ;;  %v1942_v37 = vpop.eup %1941  ;;  %v3335_v46 = vadd.f32 %v993_v59, %v3163_v0  ;;  %v4657_v0 = vld [vmem:[#allocation15_spill] sm:$0xff] }
  0xe0   :  { %v3338_v42 = vadd.f32 %v1936_v44, %v3166_v11  ;;  %v1045_v35 = vmul.f32 10.0, %v2181_v63  ;;  %v1048_v50 = vmul.f32 %v3225_v33, %v4655_v58  ;;  %v3345_v34 = vadd.f32 %v994_v16, %v4656_v53  ;;  %v4664_v63 = vld [vmem:[#allocation20_spill] sm:$0xff] }
  0xe1   :  { %v3348_v48 = vadd.f32 %v1938_v56, %v3176_v26  ;;  %v3351_v49 = vadd.f32 %v1940_v51, %v3179_v9  ;;  %v1049_v11 = vmul.f32 %v3227_v6, %v4657_v0  ;;  %v997_v44 = vmul.f32 %v1942_v37, %v3217_v21  ;;  %v4661_v6 = vld [vmem:[#allocation18_spill] sm:$0xff]  ;;  %v4662_v51 = vld [vmem:[#allocation19_spill] sm:$0xff]  ;;  %v4665_v53 = vld [vmem:[#allocation32_spill] sm:$0xff] }
  0xe2   :  { %v3357_v59 = vadd.f32 %v995_v3, %v3184_v5  ;;  %v1050_v33 = vmul.f32 %v3229_v47, %v4635_v52  ;;  %v1062_v54 = vmul.f32 1.442695, %v1046_v19  ;;  %v3362_v16 = vadd.f32 %v996_v61, %v3192_v28  ;;  %v4663_v5 = vld [vmem:[#allocation33_spill] sm:$0xff]  ;;  %v4667_v28 = vld [vmem:[#allocation34_spill] sm:$0xff] }
  0xe3   :  { %v3365_v26 = vadd.f32 %v1942_v37, %v3187_v8  ;;  %v1051_v9 = vmul.f32 %v3231_v27, %v4637_v62  ;;  %v1064_v56 = vmul.f32 1.442695, %v1047_v25  ;;  %v1052_v21 = vmul.f32 %v3233_v7, %v4661_v6  ;;  %v4668_v8 = vld [vmem:[#allocation22_spill] sm:$0xff]  ;;  %v4670_v62 = vld [vmem:[#allocation24_spill] sm:$0xff]  ;;  %v4671_v6 = vld [vmem:[#allocation25_spill] sm:$0xff] }
  0xe4   :  { %4658 = vst [vmem:[#allocation28_spill] sm:$0xff] %v3357_v59  ;;  %v1053_v3 = vmul.f32 %v4663_v5, %v4662_v51  ;;  %v1054_v47 = vmul.f32 %v4665_v53, %v4664_v63  ;;  %v1066_v19 = vmul.f32 1.442695, %v1048_v50  ;;  %v4666_v59 = vld [vmem:[#allocation21_spill] sm:$0xff]  ;;  %v1056_v37 = vmul.f32 %v3250_v36, %v4668_v8  ;;  %v4672_v51 = vld [vmem:[#allocation26_spill] sm:$0xff]  ;;  %v4673_v50 = vld [vmem:[#allocation27_spill] sm:$0xff] }
  0xe5   :  { %4659 = vst [vmem:[#allocation30_spill] sm:$0xff] %v3362_v16  ;;  %v1055_v61 = vmul.f32 %v4667_v28, %v4666_v59  ;;  %v4669_v16 = vld [vmem:[#allocation23_spill] sm:$0xff]  ;;  %v1068_v25 = vmul.f32 1.442695, %v1049_v11  ;;  %v1058_v7 = vmul.f32 %v1042_v41, %v4670_v62  ;;  %1943 = vpow2.f32 %v1062_v54  ;;  %v4680_v62 = vld [vmem:[#allocation29_spill] sm:$0xff] }
  0xe6   :  { %4660 = vst [vmem:[#allocation14_spill] sm:$0xff] %v3365_v26  ;;  %v1057_v27 = vmul.f32 %v3254_v60, %v4669_v16  ;;  %v1059_v26 = vmul.f32 %v1043_v13, %v4671_v6  ;;  %v1070_v5 = vmul.f32 1.442695, %v1050_v33  ;;  %v1060_v53 = vmul.f32 %v1044_v1, %v4672_v51  ;;  %v4674_v28 = vld [vmem:[#allocation31_spill] sm:$0xff] }
  0xe7   :  { %v1061_v63 = vmul.f32 %v1045_v35, %v4673_v50  ;;  %1945 = vpow2.f32 %v1064_v56  ;;  %v1072_v52 = vmul.f32 1.442695, %v1051_v9  ;;  %v3386_v59 = vadd.f32 %v997_v44, %v4674_v28  ;;  %v2182_v44 = vld [vmem:[#allocation6 + $0x280] sm:$0xff] }
  0xe8   :  { %1947 = vpow2.f32 %v1066_v19  ;;  %v1074_v36 = vmul.f32 1.442695, %v1052_v21  ;;  %v3389_v8 = vstv %s3342_s7  ;;  %v1076_v60 = vmul.f32 1.442695, %v1053_v3  ;;  %v2183_v21 = vld [vmem:[#allocation6 + $0x288] sm:$0xff] }
  0xe9   :  { %4675 = vst [vmem:[#allocation36_spill] sm:$0xff] %v3386_v59  ;;  %1949 = vpow2.f32 %v1068_v25  ;;  %v1078_v41 = vmul.f32 1.442695, %v1054_v47  ;;  %v1080_v11 = vmul.f32 1.442695, %v1055_v61  ;;  %v3391_v28 = vmul.f32 10.0, %v2182_v44 }
  0xea   :  { %1951 = vpow2.f32 %v1070_v5  ;;  %v1082_v13 = vmul.f32 1.442695, %v1056_v37  ;;  %v1084_v33 = vmul.f32 1.442695, %v1057_v27  ;;  %v1086_v54 = vmul.f32 1.442695, %v1058_v7 }
  0xeb   :  { %1953 = vpow2.f32 %v1072_v52  ;;  %v1088_v1 = vmul.f32 1.442695, %v1059_v26  ;;  %v1090_v35 = vmul.f32 1.442695, %v1060_v53  ;;  %v1092_v56 = vmul.f32 1.442695, %v1061_v63  ;;  %v1944_v9 = vpop.eup %1943 }
  0xec   :  { %1955 = vpow2.f32 %v1074_v36  ;;  %v3393_v19 = vmul.f32 10.0, %v2183_v21  ;;  %v2184_v25 = vld [vmem:[#allocation6 + $0x290] sm:$0xff]  ;;  %v2185_v61 = vld [vmem:[#allocation6 + $0x298] sm:$0xff]  ;;  %v2186_v52 = vld [vmem:[#allocation6 + $0x2a0] sm:$0xff]  ;;  %v1096_v5 = vmul.f32 %v1944_v9, %v3389_v8 }
  0xed   :  { %v3395_v3 = vmul.f32 10.0, %v2184_v25  ;;  %v1946_v47 = vpop.eup %1945  ;;  %1957 = vpow2.f32 %v1076_v60  ;;  %v3397_v37 = vmul.f32 10.0, %v2185_v61  ;;  %v3399_v26 = vmul.f32 10.0, %v2186_v52  ;;  %v2187_v63 = vld [vmem:[#allocation6 + $0x2a8] sm:$0xff]  ;;  %v2188_v53 = vld [vmem:[#allocation6 + $0x2b0] sm:$0xff]  ;;  %v2189_v44 = vld [vmem:[#allocation6 + $0x2b8] sm:$0xff] }
  0xee   :  { %v3401_v27 = vmul.f32 10.0, %v2187_v63  ;;  %v1948_v7 = vpop.eup %1947  ;;  %1959 = vpow2.f32 %v1078_v41  ;;  %v3404_v36 = vmul.f32 10.0, %v2188_v53  ;;  %v3406_v21 = vmul.f32 10.0, %v2189_v44  ;;  %v2190_v52 = vld [vmem:[#allocation6 + $0x2c0] sm:$0xff]  ;;  %v4678_v59 = vld [vmem:[#allocation35_spill] sm:$0xff]  ;;  %v2191_v53 = vld [vmem:[#allocation6 + $0x2c8] sm:$0xff] }
  0xef   :  { %v1950_v60 = vpop.eup %1949  ;;  %1961 = vpow2.f32 %v1080_v11  ;;  %v1097_v25 = vmul.f32 %v1946_v47, %v3389_v8  ;;  %v1098_v61 = vmul.f32 %v1948_v7, %v3389_v8  ;;  %v3410_v50 = vmul.f32 10.0, %v2190_v52 }
  0xf0   :  { %4676 = vst [vmem:[#allocation33_spill] sm:$0xff] %v3406_v21  ;;  %v1952_v63 = vpop.eup %1951  ;;  %1963 = vpow2.f32 %v1082_v13  ;;  %v1099_v41 = vmul.f32 %v1950_v60, %v3389_v8  ;;  %v3414_v51 = vadd.f32 %v1944_v9, %v4678_v59  ;;  %v3416_v6 = vmul.f32 10.0, %v2191_v53  ;;  %v2192_v21 = vld [vmem:[#allocation6 + $0x2d0] sm:$0xff] }
  0xf1   :  { %4677 = vst [vmem:[#allocation32_spill] sm:$0xff] %v3410_v50  ;;  %v1954_v44 = vpop.eup %1953  ;;  %1965 = vpow2.f32 %v1084_v33  ;;  %v1100_v11 = vmul.f32 %v1952_v63, %v3389_v8  ;;  %v3420_v16 = vadd.f32 %v1946_v47, %v4680_v62  ;;  %v3422_v52 = vmul.f32 10.0, %v2192_v21 }
  0xf2   :  { %4679 = vst [vmem:[#allocation34_spill] sm:$0xff] %v3414_v51  ;;  %v1956_v50 = vpop.eup %1955  ;;  %1967 = vpow2.f32 %v1086_v54  ;;  %v1101_v13 = vmul.f32 %v1954_v44, %v3389_v8  ;;  %v3426_v59 = vadd.f32 %v1096_v5, %v3258_v12  ;;  %v3429_v9 = vadd.f32 %v1948_v7, %v3261_v55 }
  0xf3   :  { %v1958_v53 = vpop.eup %1957  ;;  %v1102_v33 = vmul.f32 %v1956_v50, %v3389_v8  ;;  %v3433_v51 = vadd.f32 %v1097_v25, %v3265_v18  ;;  %v3436_v62 = vadd.f32 %v1098_v61, %v3272_v23  ;;  %v3439_v47 = vadd.f32 %v1950_v60, %v3268_v4 }
  0xf4   :  { %v1960_v54 = vpop.eup %1959  ;;  %1969 = vpow2.f32 %v1088_v1  ;;  %v1103_v12 = vmul.f32 %v1958_v53, %v3389_v8  ;;  %v3443_v5 = vadd.f32 %v1099_v41, %v3279_v20  ;;  %v3446_v55 = vadd.f32 %v1952_v63, %v3275_v32 }
  0xf5   :  { %v1962_v7 = vpop.eup %1961  ;;  %1971 = vpow2.f32 %v1090_v35  ;;  %v1104_v18 = vmul.f32 %v1960_v54, %v3389_v8  ;;  %v3450_v23 = vadd.f32 %v1100_v11, %v3282_v31  ;;  %v3453_v4 = vadd.f32 %v1954_v44, %v3285_v30 }
  0xf6   :  { %v1964_v21 = vpop.eup %1963  ;;  %1973 = vpow2.f32 %v1092_v56  ;;  %v1105_v1 = vmul.f32 %v1962_v7, %v3389_v8  ;;  %v3457_v20 = vadd.f32 %v1101_v13, %v3290_v17  ;;  %v3460_v32 = vadd.f32 %v1956_v50, %v3293_v40  ;;  %v2193_v50 = vld [vmem:[#allocation6 + $0x2d8] sm:$0xff] }
  0xf7   :  { %v1966_v60 = vpop.eup %1965  ;;  %v1106_v35 = vmul.f32 %v1964_v21, %v3389_v8  ;;  %v3464_v25 = vadd.f32 %v1102_v33, %v3297_v38  ;;  %v3467_v31 = vadd.f32 %v1958_v53, %v3300_v14  ;;  %v3470_v30 = vadd.f32 %v1960_v54, %v3303_v15  ;;  %v2194_v15 = vld [vmem:[#allocation6 + $0x2e0] sm:$0xff] }
  0xf8   :  { %v1968_v56 = vpop.eup %1967  ;;  %v1107_v61 = vmul.f32 %v1966_v60, %v3389_v8  ;;  %v3474_v17 = vadd.f32 %v1103_v12, %v3307_v39  ;;  %v3477_v40 = vadd.f32 %v1962_v7, %v3310_v45  ;;  %v1155_v63 = vmul.f32 10.0, %v2193_v50  ;;  %v2195_v45 = vld [vmem:[#allocation6 + $0x2e8] sm:$0xff]  ;;  %v4682_v50 = vld [vmem:[#allocation28_spill] sm:$0xff] }
  0xf9   :  { %v1108_v38 = vmul.f32 %v1968_v56, %v3389_v8  ;;  %v3481_v41 = vadd.f32 %v1104_v18, %v3314_v57  ;;  %v3484_v14 = vadd.f32 %v1964_v21, %v3317_v24  ;;  %v1156_v44 = vmul.f32 10.0, %v2194_v15  ;;  %v2196_v21 = vld [vmem:[#allocation6 + $0x2f0] sm:$0xff] }
  0xfa   :  { %v1970_v11 = vpop.eup %1969  ;;  %v3487_v13 = vadd.f32 %v1105_v1, %v3321_v2  ;;  %v3490_v39 = vadd.f32 %v1966_v60, %v3324_v22  ;;  %v1157_v53 = vmul.f32 10.0, %v2195_v45  ;;  %v1160_v33 = vmul.f32 %v3391_v28, %v2533_v10  ;;  %v2197_v60 = vld [vmem:[#allocation6 + $0x2f8] sm:$0xff] }
  0xfb   :  { %v1972_v54 = vpop.eup %1971  ;;  %v1109_v57 = vmul.f32 %v1970_v11, %v3389_v8  ;;  %v3496_v24 = vadd.f32 %v1106_v35, %v3330_v43  ;;  %v3499_v12 = vadd.f32 %v1968_v56, %v3338_v42  ;;  %v1161_v2 = vmul.f32 %v3393_v19, %v2575_v29 }
  0xfc   :  { %v1974_v7 = vpop.eup %1973  ;;  %v1110_v22 = vmul.f32 %v1972_v54, %v3389_v8  ;;  %v3505_v18 = vadd.f32 %v1107_v61, %v3335_v46  ;;  %v1158_v28 = vmul.f32 10.0, %v2196_v21  ;;  %v1162_v1 = vmul.f32 %v3395_v3, %v4655_v58  ;;  %v4681_v61 = vld [vmem:[#allocation16_spill] sm:$0xff]  ;;  %v4687_v21 = vld [vmem:[#allocation30_spill] sm:$0xff] }
  0xfd   :  { %v3510_v43 = vadd.f32 %v1108_v38, %v3345_v34  ;;  %v3513_v42 = vadd.f32 %v1970_v11, %v3348_v48  ;;  %v1159_v35 = vmul.f32 10.0, %v2197_v60  ;;  %v1163_v19 = vmul.f32 %v3397_v37, %v4657_v0  ;;  %v4684_v48 = vld [vmem:[#allocation14_spill] sm:$0xff]  ;;  %v4686_v11 = vld [vmem:[#allocation17_spill] sm:$0xff] }
  0xfe   :  { %v1111_v46 = vmul.f32 %v1974_v7, %v3389_v8  ;;  %v3521_v56 = vadd.f32 %v1972_v54, %v3351_v49  ;;  %v1164_v3 = vmul.f32 %v3399_v26, %v4681_v61  ;;  %v1176_v34 = vmul.f32 1.442695, %v1160_v33  ;;  %v4689_v8 = vld [vmem:[#allocation18_spill] sm:$0xff]  ;;  %v4690_v54 = vld [vmem:[#allocation19_spill] sm:$0xff]  ;;  %v4691_v0 = vld [vmem:[#allocation33_spill] sm:$0xff] }
  0xff   :  { %v3526_v38 = vadd.f32 %v1109_v57, %v4682_v50  ;;  %v3529_v15 = vadd.f32 %v1974_v7, %v4684_v48  ;;  %v1165_v37 = vmul.f32 %v3401_v27, %v4686_v11  ;;  %v1178_v45 = vmul.f32 1.442695, %v1161_v2  ;;  %v4692_v61 = vld [vmem:[#allocation20_spill] sm:$0xff]  ;;  %v4695_v48 = vld [vmem:[#allocation22_spill] sm:$0xff]  ;;  %v4696_v11 = vld [vmem:[#allocation23_spill] sm:$0xff] }
 0x100   :  { %v3534_v60 = vadd.f32 %v1110_v22, %v4687_v21  ;;  %v1166_v49 = vmul.f32 %v3404_v36, %v4689_v8  ;;  %v1167_v26 = vmul.f32 %v4691_v0, %v4690_v54  ;;  %v1180_v33 = vmul.f32 1.442695, %v1162_v1  ;;  %v4693_v57 = vld [vmem:[#allocation32_spill] sm:$0xff]  ;;  %v4698_v8 = vld [vmem:[#allocation25_spill] sm:$0xff]  ;;  %v4699_v1 = vld [vmem:[#allocation26_spill] sm:$0xff] }
 0x101   :  { %4683 = vst [vmem:[#allocation31_spill] sm:$0xff] %v3526_v38  ;;  %v1168_v50 = vmul.f32 %v4693_v57, %v4692_v61  ;;  %v4694_v38 = vld [vmem:[#allocation21_spill] sm:$0xff]  ;;  %v1170_v27 = vmul.f32 %v3422_v52, %v4695_v48  ;;  %v1182_v2 = vmul.f32 1.442695, %v1163_v19  ;;  %v1171_v22 = vmul.f32 %v1155_v63, %v4696_v11  ;;  %v4697_v21 = vld [vmem:[#allocation24_spill] sm:$0xff] }
 0x102   :  { %4685 = vst [vmem:[#allocation35_spill] sm:$0xff] %v3529_v15  ;;  %v1169_v7 = vmul.f32 %v3416_v6, %v4694_v38  ;;  %1975 = vpow2.f32 %v1176_v34  ;;  %v1184_v36 = vmul.f32 1.442695, %v1164_v3  ;;  %v1173_v0 = vmul.f32 %v1157_v53, %v4698_v8  ;;  %v4700_v61 = vld [vmem:[#allocation36_spill] sm:$0xff]  ;;  %v4702_v6 = vld [vmem:[#allocation27_spill] sm:$0xff] }
 0x103   :  { %4688 = vst [vmem:[#allocation29_spill] sm:$0xff] %v3534_v60  ;;  %v1172_v60 = vmul.f32 %v1156_v44, %v4697_v21  ;;  %v1174_v54 = vmul.f32 %v1158_v28, %v4699_v1  ;;  %1977 = vpow2.f32 %v1178_v45  ;;  %v1186_v57 = vmul.f32 1.442695, %v1165_v37  ;;  %v2208_v1 = vld [vmem:[#allocation6 + $0x350] sm:$0xff]  ;;  %v2209_v48 = vld [vmem:[#allocation6 + $0x358] sm:$0xff] }
 0x104   :  { %v3551_v15 = vadd.f32 %v1111_v46, %v4700_v61  ;;  %v1175_v38 = vmul.f32 %v1159_v35, %v4702_v6  ;;  %1979 = vpow2.f32 %v1180_v33  ;;  %v1188_v52 = vmul.f32 1.442695, %v1166_v49  ;;  %v2198_v61 = vld [vmem:[#allocation6 + $0x300] sm:$0xff]  ;;  %v2199_v49 = vld [vmem:[#allocation6 + $0x308] sm:$0xff] }
 0x105   :  { %1981 = vpow2.f32 %v1182_v2  ;;  %v1190_v19 = vmul.f32 1.442695, %v1167_v26  ;;  %v1192_v63 = vmul.f32 1.442695, %v1168_v50  ;;  %v3555_v11 = vstv %s3517_s8  ;;  %v2200_v50 = vld [vmem:[#allocation6 + $0x310] sm:$0xff] }
 0x106   :  { %4701 = vst [vmem:[#allocation28_spill] sm:$0xff] %v3551_v15  ;;  %1983 = vpow2.f32 %v1184_v36  ;;  %v1194_v44 = vmul.f32 1.442695, %v1169_v7  ;;  %v1196_v3 = vmul.f32 1.442695, %v1170_v27  ;;  %v3557_v35 = vmul.f32 10.0, %v2198_v61 }
 0x107   :  { %v1198_v53 = vmul.f32 1.442695, %v1171_v22  ;;  %1985 = vpow2.f32 %v1186_v57  ;;  %v1200_v28 = vmul.f32 1.442695, %v1172_v60  ;;  %v1202_v34 = vmul.f32 1.442695, %v1173_v0 }
 0x108   :  { %v1204_v37 = vmul.f32 1.442695, %v1174_v54  ;;  %v1976_v45 = vpop.eup %1975  ;;  %1987 = vpow2.f32 %v1188_v52  ;;  %v1206_v46 = vmul.f32 1.442695, %v1175_v38  ;;  %v3559_v33 = vmul.f32 10.0, %v2199_v49  ;;  %v2201_v7 = vld [vmem:[#allocation6 + $0x318] sm:$0xff] }
 0x109   :  { %v1978_v26 = vpop.eup %1977  ;;  %1989 = vpow2.f32 %v1190_v19  ;;  %v3561_v2 = vmul.f32 10.0, %v2200_v50  ;;  %v3563_v27 = vmul.f32 10.0, %v2201_v7  ;;  %v2202_v60 = vld [vmem:[#allocation6 + $0x320] sm:$0xff]  ;;  %v2203_v38 = vld [vmem:[#allocation6 + $0x328] sm:$0xff]  ;;  %v2204_v0 = vld [vmem:[#allocation6 + $0x330] sm:$0xff]  ;;  %v1210_v49 = vmul.f32 %v1976_v45, %v3555_v11 }
 0x10a   :  { %v3565_v22 = vmul.f32 10.0, %v2202_v60  ;;  %v1980_v54 = vpop.eup %1979  ;;  %1991 = vpow2.f32 %v1192_v63  ;;  %v3567_v36 = vmul.f32 10.0, %v2203_v38  ;;  %v3569_v57 = vmul.f32 10.0, %v2204_v0  ;;  %v2205_v52 = vld [vmem:[#allocation6 + $0x338] sm:$0xff]  ;;  %v2206_v7 = vld [vmem:[#allocation6 + $0x340] sm:$0xff]  ;;  %v4704_v63 = vld [vmem:[#allocation34_spill] sm:$0xff] }
 0x10b   :  { %v3571_v61 = vmul.f32 10.0, %v2205_v52  ;;  %v1982_v19 = vpop.eup %1981  ;;  %1993 = vpow2.f32 %v1194_v44  ;;  %v1211_v50 = vmul.f32 %v1978_v26, %v3555_v11  ;;  %v3575_v60 = vmul.f32 10.0, %v2206_v7  ;;  %v2207_v15 = vld [vmem:[#allocation6 + $0x348] sm:$0xff] }
 0x10c   :  { %v1984_v6 = vpop.eup %1983  ;;  %1995 = vpow2.f32 %v1196_v3  ;;  %v3578_v38 = vadd.f32 %v1976_v45, %v4704_v63  ;;  %v3580_v0 = vmul.f32 10.0, %v2207_v15  ;;  %v3582_v52 = vmul.f32 10.0, %v2208_v1  ;;  %v2210_v15 = vld [vmem:[#allocation6 + $0x360] sm:$0xff] }
 0x10d   :  { %4703 = vst [vmem:[#allocation14_spill] sm:$0xff] %v3575_v60  ;;  %v1986_v8 = vpop.eup %1985  ;;  %1997 = vpow2.f32 %v1198_v53  ;;  %v1212_v44 = vmul.f32 %v1980_v54, %v3555_v11  ;;  %v1213_v21 = vmul.f32 %v1982_v19, %v3555_v11  ;;  %v3586_v7 = vmul.f32 10.0, %v2209_v48 }
 0x10e   :  { %4705 = vst [vmem:[#allocation30_spill] sm:$0xff] %v3578_v38  ;;  %v1988_v60 = vpop.eup %1987  ;;  %1999 = vpow2.f32 %v1200_v28  ;;  %v1214_v3 = vmul.f32 %v1984_v6, %v3555_v11  ;;  %v3590_v45 = vadd.f32 %v1978_v26, %v3420_v16  ;;  %v3592_v63 = vmul.f32 10.0, %v2210_v15 }
 0x10f   :  { %4706 = vst [vmem:[#allocation33_spill] sm:$0xff] %v3582_v52  ;;  %v1990_v1 = vpop.eup %1989  ;;  %v1215_v53 = vmul.f32 %v1986_v8, %v3555_v11  ;;  %v3596_v38 = vadd.f32 %v1210_v49, %v3426_v59  ;;  %v3599_v52 = vadd.f32 %v1211_v50, %v3433_v51  ;;  %v3602_v48 = vadd.f32 %v1980_v54, %v3429_v9 }
 0x110   :  { %4707 = vst [vmem:[#allocation32_spill] sm:$0xff] %v3590_v45  ;;  %v1992_v28 = vpop.eup %1991  ;;  %2001 = vpow2.f32 %v1202_v34  ;;  %v1216_v16 = vmul.f32 %v1988_v60, %v3555_v11  ;;  %v1217_v26 = vmul.f32 %v1990_v1, %v3555_v11  ;;  %v3607_v15 = vadd.f32 %v1982_v19, %v3439_v47 }
 0x111   :  { %4708 = vst [vmem:[#allocation36_spill] sm:$0xff] %v3596_v38  ;;  %v1994_v45 = vpop.eup %1993  ;;  %2003 = vpow2.f32 %v1204_v37  ;;  %v3610_v59 = vadd.f32 %v1212_v44, %v3436_v62  ;;  %v3613_v51 = vadd.f32 %v1213_v21, %v3443_v5  ;;  %v3616_v9 = vadd.f32 %v1984_v6, %v3446_v55 }
 0x112   :  { %v1996_v54 = vpop.eup %1995  ;;  %2005 = vpow2.f32 %v1206_v46  ;;  %v1218_v34 = vmul.f32 %v1992_v28, %v3555_v11  ;;  %v3620_v49 = vadd.f32 %v1214_v3, %v3450_v23  ;;  %v3623_v47 = vadd.f32 %v1986_v8, %v3453_v4 }
 0x113   :  { %v1998_v37 = vpop.eup %1997  ;;  %v1219_v62 = vmul.f32 %v1994_v45, %v3555_v11  ;;  %v3627_v19 = vadd.f32 %v1215_v53, %v3457_v20  ;;  %v3630_v5 = vadd.f32 %v1988_v60, %v3460_v32  ;;  %v3633_v55 = vadd.f32 %v1990_v1, %v3467_v31  ;;  %v2211_v31 = vld [vmem:[#allocation6 + $0x368] sm:$0xff] }
 0x114   :  { %v2000_v21 = vpop.eup %1999  ;;  %v1220_v6 = vmul.f32 %v1996_v54, %v3555_v11  ;;  %v3637_v23 = vadd.f32 %v1216_v16, %v3464_v25  ;;  %v3640_v4 = vadd.f32 %v1217_v26, %v3474_v17  ;;  %v3643_v8 = vadd.f32 %v1992_v28, %v3470_v30  ;;  %v2212_v17 = vld [vmem:[#allocation6 + $0x370] sm:$0xff]  ;;  %v2213_v26 = vld [vmem:[#allocation6 + $0x378] sm:$0xff] }
 0x115   :  { %v1221_v20 = vmul.f32 %v1998_v37, %v3555_v11  ;;  %v1222_v32 = vmul.f32 %v2000_v21, %v3555_v11  ;;  %v3648_v46 = vadd.f32 %v1994_v45, %v3477_v40  ;;  %v1271_v50 = vmul.f32 10.0, %v2211_v31  ;;  %v4726_v31 = vld [vmem:[#allocation29_spill] sm:$0xff] }
 0x116   :  { %v2002_v60 = vpop.eup %2001  ;;  %v3651_v44 = vadd.f32 %v1218_v34, %v3481_v41  ;;  %v3654_v25 = vadd.f32 %v1996_v54, %v3484_v14  ;;  %v1272_v3 = vmul.f32 10.0, %v2212_v17  ;;  %v1274_v30 = vmul.f32 %v3557_v35, %v2533_v10  ;;  %v4729_v17 = vld [vmem:[#allocation18_spill] sm:$0xff]  ;;  %v4735_v38 = vld [vmem:[#allocation33_spill] sm:$0xff] }
 0x117   :  { %4709 = vst [vmem:[#allocation34_spill] sm:$0xff] %v3648_v46  ;;  %v2004_v1 = vpop.eup %2003  ;;  %v1223_v53 = vmul.f32 %v2002_v60, %v3555_v11  ;;  %v3660_v40 = vadd.f32 %v1219_v62, %v3487_v13  ;;  %v3663_v45 = vadd.f32 %v1998_v37, %v3490_v39  ;;  %v1275_v41 = vmul.f32 %v3559_v33, %v2575_v29 }
 0x118   :  { %4710 = vst [vmem:[#allocation37_spill] sm:$0xff] %v3651_v44  ;;  %v2006_v28 = vpop.eup %2005  ;;  %v1224_v14 = vmul.f32 %v2004_v1, %v3555_v11  ;;  %v3669_v16 = vadd.f32 %v1220_v6, %v3496_v24  ;;  %v1273_v35 = vmul.f32 10.0, %v2213_v26  ;;  %v1276_v54 = vmul.f32 %v3561_v2, %v4655_v58  ;;  %v4720_v2 = vld [vmem:[#allocation15_spill] sm:$0xff]  ;;  %v4731_v26 = vld [vmem:[#allocation20_spill] sm:$0xff]  ;;  %v4744_v44 = vld [vmem:[#allocation30_spill] sm:$0xff] }
 0x119   :  { %4711 = vst [vmem:[#allocation38_spill] sm:$0xff] %v3654_v25  ;;  %v3674_v13 = vadd.f32 %v1221_v20, %v3505_v18  ;;  %v3677_v39 = vadd.f32 %v1222_v32, %v3510_v43  ;;  %v3680_v34 = vadd.f32 %v2000_v21, %v3499_v12  ;;  %v3683_v33 = vadd.f32 %v2002_v60, %v3513_v42  ;;  %v4721_v6 = vld [vmem:[#allocation31_spill] sm:$0xff]  ;;  %v4725_v21 = vld [vmem:[#allocation16_spill] sm:$0xff] }
 0x11a   :  { %4712 = vst [vmem:[#allocation39_spill] sm:$0xff] %v3660_v40  ;;  %v1225_v24 = vmul.f32 %v2006_v28, %v3555_v11  ;;  %v3689_v37 = vadd.f32 %v2004_v1, %v3521_v56  ;;  %v1277_v18 = vmul.f32 %v3563_v27, %v4720_v2  ;;  %v1290_v62 = vmul.f32 1.442695, %v1274_v30  ;;  %v4723_v20 = vld [vmem:[#allocation35_spill] sm:$0xff]  ;;  %v4728_v11 = vld [vmem:[#allocation17_spill] sm:$0xff]  ;;  %v2223_v40 = vld [vmem:[#allocation6 + $0x3c8] sm:$0xff] }
 0x11b   :  { %4713 = vst [vmem:[#allocation40_spill] sm:$0xff] %v3663_v45  ;;  %v3694_v43 = vadd.f32 %v1223_v53, %v4721_v6  ;;  %v3697_v12 = vadd.f32 %v2006_v28, %v4723_v20  ;;  %v1278_v42 = vmul.f32 %v3565_v22, %v4725_v21  ;;  %v1292_v32 = vmul.f32 1.442695, %v1275_v41  ;;  %v4730_v1 = vld [vmem:[#allocation19_spill] sm:$0xff]  ;;  %v4732_v28 = vld [vmem:[#allocation14_spill] sm:$0xff]  ;;  %v4733_v20 = vld [vmem:[#allocation21_spill] sm:$0xff] }
 0x11c   :  { %4714 = vst [vmem:[#allocation41_spill] sm:$0xff] %v3669_v16  ;;  %v3702_v60 = vadd.f32 %v1224_v14, %v4726_v31  ;;  %v1279_v56 = vmul.f32 %v3567_v36, %v4728_v11  ;;  %v1280_v27 = vmul.f32 %v3569_v57, %v4729_v17  ;;  %v1294_v30 = vmul.f32 1.442695, %v1276_v54  ;;  %v4734_v41 = vld [vmem:[#allocation22_spill] sm:$0xff]  ;;  %v4736_v31 = vld [vmem:[#allocation23_spill] sm:$0xff] }
 0x11d   :  { %4715 = vst [vmem:[#allocation42_spill] sm:$0xff] %v3674_v13  ;;  %v1281_v53 = vmul.f32 %v3571_v61, %v4730_v1  ;;  %v1282_v6 = vmul.f32 %v4732_v28, %v4731_v26  ;;  %v1283_v22 = vmul.f32 %v3580_v0, %v4733_v20  ;;  %v1284_v14 = vmul.f32 %v4735_v38, %v4734_v41 }
 0x11e   :  { %4716 = vst [vmem:[#allocation43_spill] sm:$0xff] %v3677_v39  ;;  %v1285_v36 = vmul.f32 %v3586_v7, %v4736_v31  ;;  %2007 = vpow2.f32 %v1290_v62  ;;  %v1296_v54 = vmul.f32 1.442695, %v1277_v18  ;;  %v1298_v28 = vmul.f32 1.442695, %v1278_v42  ;;  %v4740_v39 = vld [vmem:[#allocation28_spill] sm:$0xff] }
 0x11f   :  { %4717 = vst [vmem:[#allocation44_spill] sm:$0xff] %v3680_v34  ;;  %2009 = vpow2.f32 %v1292_v32  ;;  %v3723_v0 = vadd.f32 %v1225_v24, %v4740_v39  ;;  %v1300_v13 = vmul.f32 1.442695, %v1279_v56  ;;  %v1302_v34 = vmul.f32 1.442695, %v1280_v27  ;;  %v2215_v56 = vld [vmem:[#allocation6 + $0x388] sm:$0xff] }
 0x120   :  { %4718 = vst [vmem:[#allocation45_spill] sm:$0xff] %v3683_v33  ;;  %v4742_v33 = vld [vmem:[#allocation27_spill] sm:$0xff]  ;;  %2011 = vpow2.f32 %v1294_v30  ;;  %v1304_v7 = vmul.f32 1.442695, %v1281_v53  ;;  %v1306_v16 = vmul.f32 1.442695, %v1282_v6  ;;  %v3727_v45 = vstv %s3685_s9 }
 0x121   :  { %4719 = vst [vmem:[#allocation46_spill] sm:$0xff] %v3689_v37  ;;  %v1289_v38 = vmul.f32 %v1273_v35, %v4742_v33  ;;  %2013 = vpow2.f32 %v1296_v54  ;;  %v1310_v18 = vmul.f32 1.442695, %v1284_v14  ;;  %v2214_v35 = vld [vmem:[#allocation6 + $0x380] sm:$0xff]  ;;  %v1373_v27 = vmul.f32 10.0, %v2215_v56  ;;  %v2216_v53 = vld [vmem:[#allocation6 + $0x390] sm:$0xff] }
 0x122   :  { %4722 = vst [vmem:[#allocation15_spill] sm:$0xff] %v3694_v43  ;;  %v4739_v43 = vld [vmem:[#allocation26_spill] sm:$0xff]  ;;  %2015 = vpow2.f32 %v1298_v28  ;;  %v1372_v32 = vmul.f32 10.0, %v2214_v35  ;;  %v1374_v6 = vmul.f32 10.0, %v2216_v53  ;;  %v2222_v56 = vld [vmem:[#allocation6 + $0x3c0] sm:$0xff]  ;;  %v3735_v53 = vmul.f32 10.0, %v2223_v40 }
 0x123   :  { %4724 = vst [vmem:[#allocation31_spill] sm:$0xff] %v3697_v12  ;;  %v4738_v12 = vld [vmem:[#allocation25_spill] sm:$0xff]  ;;  %v1288_v37 = vmul.f32 %v1272_v3, %v4739_v43  ;;  %2017 = vpow2.f32 %v1300_v13  ;;  %v3731_v24 = vmul.f32 1.442695, %v1289_v38  ;;  %v2220_v13 = vld [vmem:[#allocation6 + $0x3b0] sm:$0xff]  ;;  %v4745_v43 = vld [vmem:[#allocation32_spill] sm:$0xff] }
 0x124   :  { %4727 = vst [vmem:[#allocation35_spill] sm:$0xff] %v3702_v60  ;;  %v4737_v60 = vld [vmem:[#allocation24_spill] sm:$0xff]  ;;  %v1287_v61 = vmul.f32 %v1271_v50, %v4738_v12  ;;  %v1312_v50 = vmul.f32 1.442695, %v1285_v36  ;;  %v2008_v39 = vpop.eup %2007  ;;  %2019 = vpow2.f32 %v1302_v34  ;;  %v2218_v36 = vld [vmem:[#allocation6 + $0x3a0] sm:$0xff]  ;;  %v1378_v38 = vmul.f32 10.0, %v2220_v13 }
 0x125   :  { %v1286_v57 = vmul.f32 %v3592_v63, %v4737_v60  ;;  %4741 = vst [vmem:[#allocation16_spill] sm:$0xff] %v3723_v0  ;;  %v1308_v63 = vmul.f32 1.442695, %v1283_v22  ;;  %v3729_v42 = vmul.f32 1.442695, %v1288_v37  ;;  %v2010_v30 = vpop.eup %2009  ;;  %v2217_v22 = vld [vmem:[#allocation6 + $0x398] sm:$0xff]  ;;  %2021 = vpow2.f32 %v1304_v7 }
 0x126   :  { %v1316_v62 = vmul.f32 1.442695, %v1287_v61  ;;  %v1375_v14 = vmul.f32 10.0, %v2217_v22  ;;  %v1376_v54 = vmul.f32 10.0, %v2218_v36  ;;  %v1325_v37 = vmul.f32 %v2010_v30, %v3727_v45  ;;  %v2219_v61 = vld [vmem:[#allocation6 + $0x3a8] sm:$0xff]  ;;  %v2221_v0 = vld [vmem:[#allocation6 + $0x3b8] sm:$0xff] }
 0x127   :  { %v1314_v3 = vmul.f32 1.442695, %v1286_v57  ;;  %v2012_v57 = vpop.eup %2011  ;;  %v1377_v28 = vmul.f32 10.0, %v2219_v61  ;;  %v1379_v25 = vmul.f32 10.0, %v2221_v0  ;;  %v1380_v34 = vmul.f32 10.0, %v2222_v56  ;;  %v2224_v61 = vld [vmem:[#allocation6 + $0x3d0] sm:$0xff] }
 0x128   :  { %v1326_v35 = vmul.f32 %v2012_v57, %v3727_v45  ;;  %v2014_v22 = vpop.eup %2013  ;;  %2023 = vpow2.f32 %v1306_v16  ;;  %v3738_v36 = vmul.f32 %v2008_v39, %v3727_v45  ;;  %v3741_v33 = vadd.f32 %v2008_v39, %v4744_v44  ;;  %v2225_v40 = vld [vmem:[#allocation6 + $0x3d8] sm:$0xff] }
 0x129   :  { %v3743_v13 = vmul.f32 10.0, %v2224_v61  ;;  %v2016_v0 = vpop.eup %2015  ;;  %2025 = vpow2.f32 %v1308_v63  ;;  %v1327_v7 = vmul.f32 %v2014_v22, %v3727_v45  ;;  %v3747_v56 = vadd.f32 %v2010_v30, %v4745_v43 }
 0x12a   :  { %4743 = vst [vmem:[#allocation29_spill] sm:$0xff] %v3738_v36  ;;  %v3749_v46 = vmul.f32 10.0, %v2225_v40  ;;  %v2018_v16 = vpop.eup %2017  ;;  %2027 = vpow2.f32 %v1310_v18  ;;  %v1328_v36 = vmul.f32 %v2016_v0, %v3727_v45  ;;  %v3753_v44 = vadd.f32 %v1325_v37, %v3599_v52 }
 0x12b   :  { %v3756_v39 = vadd.f32 %v2012_v57, %v3602_v48  ;;  %v2020_v61 = vpop.eup %2019  ;;  %2029 = vpow2.f32 %v1312_v50  ;;  %v3759_v63 = vadd.f32 %v1326_v35, %v3610_v59  ;;  %v3762_v43 = vadd.f32 %v2014_v22, %v3607_v15  ;;  %v2226_v35 = vld [vmem:[#allocation6 + $0x3e0] sm:$0xff] }
 0x12c   :  { %4746 = vst [vmem:[#allocation17_spill] sm:$0xff] %v3753_v44  ;;  %v1388_v30 = vmul.f32 %v1372_v32, %v2533_v10  ;;  %2031 = vpow2.f32 %v1314_v3  ;;  %v1329_v18 = vmul.f32 %v2018_v16, %v3727_v45  ;;  %v3767_v40 = vadd.f32 %v2016_v0, %v3616_v9  ;;  %v2022_v48 = vpop.eup %2021 }
 0x12d   :  { %4747 = vst [vmem:[#allocation18_spill] sm:$0xff] %v3759_v63  ;;  %v1389_v52 = vmul.f32 %v1373_v27, %v2575_v29  ;;  %2033 = vpow2.f32 %v1316_v62  ;;  %v3771_v50 = vadd.f32 %v1327_v7, %v3613_v51  ;;  %v3774_v59 = vadd.f32 %v2018_v16, %v3623_v47  ;;  %v2228_v7 = vld [vmem:[#allocation6 + $0x3f0] sm:$0xff] }
 0x12e   :  { %v1390_v15 = vmul.f32 %v1374_v6, %v4655_v58  ;;  %v2024_v57 = vpop.eup %2023  ;;  %v1330_v10 = vmul.f32 %v2020_v61, %v3727_v45  ;;  %v3779_v3 = vadd.f32 %v1328_v36, %v3620_v49  ;;  %v3782_v9 = vadd.f32 %v2020_v61, %v3630_v5  ;;  %v2229_v61 = vld [vmem:[#allocation6 + $0x3f8] sm:$0xff] }
 0x12f   :  { %v1391_v29 = vmul.f32 %v1375_v14, %v4720_v2  ;;  %v2026_v62 = vpop.eup %2025  ;;  %2035 = vpow2.f32 %v3729_v42  ;;  %v1331_v51 = vmul.f32 %v2022_v48, %v3727_v45  ;;  %v1392_v47 = vmul.f32 %v1376_v54, %v4725_v21 }
 0x130   :  { %v1404_v32 = vmul.f32 1.442695, %v1388_v30  ;;  %v3788_v58 = vpop.eup %2027  ;;  %v3791_v27 = vadd.f32 %v1329_v18, %v3627_v19  ;;  %v3794_v49 = vadd.f32 %v2022_v48, %v3633_v55  ;;  %v1393_v5 = vmul.f32 %v1377_v28, %v4728_v11 }
 0x131   :  { %v1406_v6 = vmul.f32 1.442695, %v1389_v52  ;;  %v3797_v2 = vpop.eup %2029  ;;  %2037 = vpow2.f32 %v3731_v24  ;;  %v1332_v42 = vmul.f32 %v2024_v57, %v3727_v45  ;;  %v1394_v21 = vmul.f32 %v1378_v38, %v4729_v17  ;;  %v2227_v38 = vld [vmem:[#allocation6 + $0x3e8] sm:$0xff] }
 0x132   :  { %v1408_v14 = vmul.f32 1.442695, %v1390_v15  ;;  %v3802_v54 = vpop.eup %2031  ;;  %v3805_v19 = vadd.f32 %v1330_v10, %v3637_v23  ;;  %v3808_v55 = vadd.f32 %v2024_v57, %v3643_v8  ;;  %v1395_v11 = vmul.f32 %v1379_v25, %v4730_v1  ;;  %v4750_v57 = vld [vmem:[#allocation26_spill] sm:$0xff] }
 0x133   :  { %v1410_v37 = vmul.f32 1.442695, %v1391_v29  ;;  %v3811_v28 = vpop.eup %2033  ;;  %v1384_v24 = vmul.f32 10.0, %v2226_v35  ;;  %v1396_v22 = vmul.f32 %v1380_v34, %v4731_v26  ;;  %2039 = vpow2.f32 %v1404_v32  ;;  %v4754_v35 = vld [vmem:[#allocation38_spill] sm:$0xff] }
 0x134   :  { %v1412_v17 = vmul.f32 1.442695, %v1392_v47  ;;  %v1385_v36 = vmul.f32 10.0, %v2227_v38  ;;  %v1397_v23 = vmul.f32 %v3735_v53, %v4733_v20  ;;  %2041 = vpow2.f32 %v1406_v6 }
 0x135   :  { %v1414_v0 = vmul.f32 1.442695, %v1393_v5  ;;  %v3816_v8 = vpop.eup %2035  ;;  %v1386_v25 = vmul.f32 10.0, %v2228_v7  ;;  %v1398_v1 = vmul.f32 %v3743_v13, %v4734_v41  ;;  %2043 = vpow2.f32 %v1408_v14  ;;  %v4752_v5 = vld [vmem:[#allocation37_spill] sm:$0xff] }
 0x136   :  { %v1416_v16 = vmul.f32 1.442695, %v1394_v21  ;;  %v1387_v26 = vmul.f32 10.0, %v2229_v61  ;;  %v1399_v34 = vmul.f32 %v3749_v46, %v4736_v31  ;;  %2045 = vpow2.f32 %v1410_v37  ;;  %v4749_v46 = vld [vmem:[#allocation34_spill] sm:$0xff]  ;;  %v4756_v7 = vld [vmem:[#allocation41_spill] sm:$0xff] }
 0x137   :  { %v1418_v30 = vmul.f32 1.442695, %v1395_v11  ;;  %v3822_v18 = vpop.eup %2037  ;;  %v1333_v20 = vmul.f32 %v2026_v62, %v3727_v45  ;;  %v1400_v53 = vmul.f32 %v1384_v24, %v4737_v60  ;;  %2047 = vpow2.f32 %v1412_v17  ;;  %v4753_v11 = vld [vmem:[#allocation39_spill] sm:$0xff] }
 0x138   :  { %v1420_v52 = vmul.f32 1.442695, %v1396_v22  ;;  %v3827_v48 = vadd.f32 %v1331_v51, %v3640_v4  ;;  %v1401_v41 = vmul.f32 %v1385_v36, %v4738_v12  ;;  %2049 = vpow2.f32 %v1414_v0  ;;  %v4751_v4 = vld [vmem:[#allocation27_spill] sm:$0xff]  ;;  %v4755_v36 = vld [vmem:[#allocation40_spill] sm:$0xff] }
 0x139   :  { %v1422_v13 = vmul.f32 1.442695, %v1397_v23  ;;  %v3830_v15 = vpop.eup %2039  ;;  %v3833_v31 = vadd.f32 %v2026_v62, %v4749_v46  ;;  %v1402_v10 = vmul.f32 %v1386_v25, %v4750_v57  ;;  %2051 = vpow2.f32 %v1416_v16  ;;  %v4760_v46 = vld [vmem:[#allocation43_spill] sm:$0xff] }
 0x13a   :  { %4748 = vst [vmem:[#allocation19_spill] sm:$0xff] %v3830_v15  ;;  %v1424_v29 = vmul.f32 1.442695, %v1398_v1  ;;  %v3836_v47 = vpop.eup %2041  ;;  %v1334_v60 = vmul.f32 %v3788_v58, %v3727_v45  ;;  %v1403_v51 = vmul.f32 %v1387_v26, %v4751_v4  ;;  %2053 = vpow2.f32 %v1418_v30  ;;  %v4757_v1 = vld [vmem:[#allocation44_spill] sm:$0xff] }
 0x13b   :  { %v1426_v12 = vmul.f32 1.442695, %v1399_v34  ;;  %v2044_v32 = vpop.eup %2043  ;;  %v1335_v62 = vmul.f32 %v3797_v2, %v3727_v45  ;;  %v3846_v6 = vadd.f32 %v1332_v42, %v4752_v5  ;;  %2055 = vpow2.f32 %v1420_v52  ;;  %v4758_v34 = vld [vmem:[#allocation42_spill] sm:$0xff] }
 0x13c   :  { %v1428_v21 = vmul.f32 1.442695, %v1400_v53  ;;  %v2046_v14 = vpop.eup %2045  ;;  %v3849_v37 = vadd.f32 %v1333_v20, %v4753_v11  ;;  %v3853_v24 = vadd.f32 %v3788_v58, %v4754_v35  ;;  %2057 = vpow2.f32 %v1422_v13  ;;  %v4759_v53 = vld [vmem:[#allocation45_spill] sm:$0xff] }
 0x13d   :  { %v1430_v22 = vmul.f32 1.442695, %v1401_v41  ;;  %v2048_v17 = vpop.eup %2047  ;;  %v1336_v38 = vmul.f32 %v3802_v54, %v3727_v45  ;;  %v3859_v42 = vadd.f32 %v3797_v2, %v4755_v36  ;;  %2059 = vpow2.f32 %v1424_v29 }
 0x13e   :  { %v1432_v23 = vmul.f32 1.442695, %v1402_v10  ;;  %v2050_v0 = vpop.eup %2049  ;;  %v3862_v25 = vadd.f32 %v1334_v60, %v4756_v7  ;;  %v3866_v58 = vadd.f32 %v3802_v54, %v4757_v1  ;;  %2061 = vpow2.f32 %v1426_v12  ;;  %v4761_v10 = vld [vmem:[#allocation46_spill] sm:$0xff]  ;;  %v4763_v12 = vld [vmem:[#allocation15_spill] sm:$0xff] }
 0x13f   :  { %v1434_v16 = vmul.f32 1.442695, %v1403_v51  ;;  %v2052_v61 = vpop.eup %2051  ;;  %v1337_v26 = vmul.f32 %v3811_v28, %v3727_v45  ;;  %v3871_v30 = vadd.f32 %v1335_v62, %v4758_v34  ;;  %2063 = vpow2.f32 %v1428_v21  ;;  %v4764_v21 = vld [vmem:[#allocation31_spill] sm:$0xff] }
 0x140   :  { %v3875_v2 = vadd.f32 %v3830_v15, %v3741_v33  ;;  %v2054_v20 = vpop.eup %2053  ;;  %v1338_v54 = vmul.f32 %v3816_v8, %v3727_v45  ;;  %v3881_v52 = vadd.f32 %v3811_v28, %v4759_v53  ;;  %2065 = vpow2.f32 %v1430_v22  ;;  %v4765_v22 = vld [vmem:[#allocation35_spill] sm:$0xff] }
 0x141   :  { %v3885_v41 = vadd.f32 %v3836_v47, %v3747_v56  ;;  %v2056_v13 = vpop.eup %2055  ;;  %v3888_v57 = vadd.f32 %v1336_v38, %v4760_v46  ;;  %v3892_v33 = vadd.f32 %v3816_v8, %v4761_v10  ;;  %2067 = vpow2.f32 %v1432_v23 }
 0x142   :  { %v3895_v29 = vadd.f32 %v2044_v32, %v3756_v39  ;;  %v2058_v60 = vpop.eup %2057  ;;  %v1339_v28 = vmul.f32 %v3822_v18, %v3727_v45  ;;  %2069 = vpow2.f32 %v1434_v16  ;;  %v3900_v4 = vstv %s3841_s10 }
 0x143   :  { %4762 = vst [vmem:[#allocation20_spill] sm:$0xff] %v3900_v4  ;;  %v3903_v56 = vadd.f32 %v2046_v14, %v3762_v43  ;;  %v2060_v51 = vpop.eup %2059  ;;  %v3906_v62 = vadd.f32 %v1337_v26, %v4763_v12  ;;  %v1441_v8 = vmul.f32 %v2046_v14, %v3900_v4  ;;  %v3910_v5 = vadd.f32 %v2050_v0, %v3774_v59 }
 0x144   :  { %2071 = vrcp.f32 %v3875_v2  ;;  %v2062_v39 = vpop.eup %2061  ;;  %v3915_v45 = vadd.f32 %v3822_v18, %v4764_v21  ;;  %v1442_v11 = vmul.f32 %v2048_v17, %v3900_v4  ;;  %v3919_v43 = vadd.f32 %v2052_v61, %v3782_v9  ;;  %v4766_v18 = vld [vmem:[#allocation16_spill] sm:$0xff] }
 0x145   :  { %2073 = vrcp.f32 %v3885_v41  ;;  %v2064_v35 = vpop.eup %2063  ;;  %v1354_v14 = vadd.f32 %v1338_v54, %v4765_v22  ;;  %v1443_v59 = vmul.f32 %v2050_v0, %v3900_v4  ;;  %v3925_v38 = vadd.f32 %v2048_v17, %v3767_v40 }
 0x146   :  { %2075 = vrcp.f32 %v3895_v29  ;;  %v2066_v36 = vpop.eup %2065  ;;  %v1355_v23 = vadd.f32 %v1339_v28, %v4766_v18  ;;  %v1444_v7 = vmul.f32 %v2052_v61, %v3900_v4  ;;  %v3931_v9 = vadd.f32 %v2054_v20, %v3794_v49 }
 0x147   :  { %2077 = vrcp.f32 %v3903_v56  ;;  %v2068_v1 = vpop.eup %2067  ;;  %v3936_v16 = vmul.f32 %v3836_v47, %v3900_v4  ;;  %v3939_v40 = vmul.f32 %v2044_v32, %v3900_v4  ;;  %v3942_v17 = vadd.f32 %v1441_v8, %v3771_v50 }
 0x148   :  { %2079 = vrcp.f32 %v3910_v5  ;;  %v2070_v0 = vpop.eup %2069  ;;  %v1445_v61 = vmul.f32 %v2054_v20, %v3900_v4  ;;  %v3947_v49 = vadd.f32 %v1442_v11, %v3779_v3  ;;  %v3950_v26 = vadd.f32 %v2056_v13, %v3808_v55 }
 0x149   :  { %4767 = vst [vmem:[#allocation14_spill] sm:$0xff] %v3936_v16  ;;  %2081 = vrcp.f32 %v3919_v43  ;;  %v1446_v32 = vmul.f32 %v2056_v13, %v3900_v4  ;;  %v3957_v50 = vadd.f32 %v1443_v59, %v3791_v27  ;;  %v3960_v34 = vadd.f32 %v2058_v60, %v3833_v31 }
 0x14a   :  { %4768 = vst [vmem:[#allocation21_spill] sm:$0xff] %v3939_v40  ;;  %v3953_v47 = vpop.eup %2071  ;;  %2083 = vrcp.f32 %v3925_v38  ;;  %v1447_v3 = vmul.f32 %v2058_v60, %v3900_v4  ;;  %v3967_v55 = vadd.f32 %v1444_v7, %v3805_v19  ;;  %v3970_v54 = vadd.f32 %v2060_v51, %v3853_v24 }
 0x14b   :  { %4769 = vst [vmem:[#allocation22_spill] sm:$0xff] %v3942_v17  ;;  %v3963_v20 = vpop.eup %2073  ;;  %2085 = vrcp.f32 %v3931_v9  ;;  %v1448_v27 = vmul.f32 %v2060_v51, %v3900_v4  ;;  %v1449_v31 = vmul.f32 %v2062_v39, %v3900_v4  ;;  %v1450_v13 = vmul.f32 %v2064_v35, %v3900_v4 }
 0x14c   :  { %4770 = vst [vmem:[#allocation33_spill] sm:$0xff] %v3947_v49  ;;  %v3973_v53 = vpop.eup %2075  ;;  %v3979_v46 = vadd.f32 %v2062_v39, %v3859_v42  ;;  %v1451_v19 = vmul.f32 %v2066_v36, %v3900_v4  ;;  %v3985_v24 = vadd.f32 %v1445_v61, %v3827_v48  ;;  %v3988_v60 = vadd.f32 %v2064_v35, %v3866_v58 }
 0x14d   :  { %4771 = vst [vmem:[#allocation23_spill] sm:$0xff] %v3957_v50  ;;  %v3981_v10 = vpop.eup %2077  ;;  %2087 = vrcp.f32 %v3950_v26  ;;  %v1452_v51 = vmul.f32 %v2068_v1, %v3900_v4  ;;  %v3995_v12 = vadd.f32 %v1446_v32, %v3846_v6  ;;  %v3998_v42 = vadd.f32 %v2066_v36, %v3881_v52 }
 0x14e   :  { %4772 = vst [vmem:[#allocation24_spill] sm:$0xff] %v3963_v20  ;;  %v3991_v28 = vpop.eup %2079  ;;  %2089 = vrcp.f32 %v3960_v34  ;;  %v1453_v48 = vmul.f32 %v2070_v0, %v3900_v4  ;;  %v4005_v58 = vadd.f32 %v1447_v3, %v3849_v37  ;;  %v4009_v39 = vmul.f32 %v3953_v47, %v3875_v2 }
 0x14f   :  { %4773 = vst [vmem:[#allocation25_spill] sm:$0xff] %v3967_v55  ;;  %v4001_v8 = vpop.eup %2081  ;;  %2091 = vrcp.f32 %v3970_v54  ;;  %v4015_v52 = vadd.f32 %v1448_v27, %v3862_v25  ;;  %v4018_v21 = vadd.f32 %v1449_v31, %v3871_v30  ;;  %v4021_v11 = vadd.f32 %v1450_v13, %v3888_v57 }
 0x150   :  { %4774 = vst [vmem:[#allocation28_spill] sm:$0xff] %v3973_v53  ;;  %v4012_v6 = vpop.eup %2083  ;;  %2093 = vrcp.f32 %v3979_v46  ;;  %v4027_v35 = vadd.f32 %v1451_v19, %v3906_v62  ;;  %v4030_v22 = vadd.f32 %v2068_v1, %v3892_v33  ;;  %v1562_v25 = vmul.f32 %v3991_v28, %v3910_v5 }
 0x151   :  { %4775 = vst [vmem:[#allocation30_spill] sm:$0xff] %v3985_v24  ;;  %v4024_v37 = vpop.eup %2085  ;;  %2095 = vrcp.f32 %v3988_v60  ;;  %v4035_v30 = vadd.f32 %v1452_v51, %v1354_v14  ;;  %v4038_v57 = vadd.f32 %v2070_v0, %v3915_v45  ;;  %v1577_v59 = vmul.f32 %v4001_v8, %v3919_v43 }
 0x152   :  { %4776 = vst [vmem:[#allocation32_spill] sm:$0xff] %v3995_v12  ;;  %2097 = vrcp.f32 %v3998_v42  ;;  %v4045_v36 = vadd.f32 %v1453_v48, %v1355_v23  ;;  %v4050_v18 = vmul.f32 %v3963_v20, %v3885_v41  ;;  %v4054_v14 = vmul.f32 %v3973_v53, %v3895_v29 }
 0x153   :  { %4777 = vst [vmem:[#allocation34_spill] sm:$0xff] %v4005_v58  ;;  %v4043_v62 = vpop.eup %2087  ;;  %v4061_v1 = vmul.f32 %v3981_v10, %v3903_v56  ;;  %v4065_v23 = vmul.f32 %v4012_v6, %v3925_v38  ;;  %v1592_v0 = vmul.f32 %v4024_v37, %v3931_v9  ;;  %v1563_v31 = vsub.f32 1.0, %v1562_v25 }
 0x154   :  { %4778 = vst [vmem:[#allocation26_spill] sm:$0xff] %v4009_v39  ;;  %v4056_v45 = vpop.eup %2089  ;;  %v1578_v48 = vsub.f32 1.0, %v1577_v59  ;;  %2099 = vrcp.f32 %v4030_v22  ;;  %v4095_v33 = vmul.f32 %v4043_v62, %v3950_v26  ;;  %vm1656_vm6 = vweird.f32 %v3979_v46 }
 0x155   :  { %4779 = vst [vmem:[#allocation27_spill] sm:$0xff] %v4050_v18  ;;  %v4069_v61 = vpop.eup %2091  ;;  %v1593_v51 = vsub.f32 1.0, %v1592_v0  ;;  %v4091_v16 = vmul.f32 %v3991_v28, %v1563_v31  ;;  %v4107_v0 = vmul.f32 %v4056_v45, %v3960_v34  ;;  %2101 = vrcp.f32 %v4038_v57 }
 0x156   :  { %4780 = vst [vmem:[#allocation37_spill] sm:$0xff] %v4054_v14  ;;  %v4074_v13 = vpop.eup %2093  ;;  %v4102_v32 = vmul.f32 %v4001_v8, %v1578_v48  ;;  %v1637_v44 = vmul.f32 %v4069_v61, %v3970_v54  ;;  %v1608_v15 = vsub.f32 1.0, %v4095_v33  ;;  %vm1671_vm10 = vweird.f32 %v3988_v60 }
 0x157   :  { %v4079_v7 = vpop.eup %2095  ;;  %v1652_v3 = vmul.f32 %v4074_v13, %v3979_v46  ;;  %v4119_v17 = vmul.f32 %v4024_v37, %v1593_v51  ;;  %v1623_v50 = vsub.f32 1.0, %v4107_v0  ;;  %vm1686_vm1 = vweird.f32 %v3998_v42 }
 0x158   :  { %v4085_v25 = vpop.eup %2097  ;;  %v1667_v31 = vmul.f32 %v4079_v7, %v3988_v60  ;;  %v1638_v49 = vsub.f32 1.0, %v1637_v44  ;;  %vm1641_vm3 = vweird.f32 %v3970_v54  ;;  %vm1642_vm15 = vweird.f32 %v4069_v61 }
 0x159   :  { %v1682_v27 = vmul.f32 %v4085_v25, %v3998_v42  ;;  %v1653_v59 = vsub.f32 1.0, %v1652_v3  ;;  %v1690_v0 = vand.u32 2147483647, %v3998_v42  ;;  %vm1701_vm8 = vweird.f32 %v4030_v22 }
 0x15a   :  { %v4116_v48 = vpop.eup %2099  ;;  %v1668_v55 = vsub.f32 1.0, %v1667_v31  ;;  %v1692_v40 = vand.u32 2147483648, %v3998_v42  ;;  %vm1626_vm4 = vweird.f32 %v3960_v34  ;;  %vm1687_vm5 = vweird.f32 %v4085_v25 }
 0x15b   :  { %v1683_v63 = vsub.f32 1.0, %v1682_v27  ;;  %v1697_v4 = vmul.f32 %v4116_v48, %v4030_v22  ;;  %v1675_v27 = vand.u32 2147483647, %v3988_v60  ;;  %vm1702_vm2 = vweird.f32 %v4116_v48  ;;  %v2102_v31 = vpop.eup %2101 }
 0x15c   :  { %v1654_v44 = vmul.f32 %v4074_v13, %v1653_v59  ;;  %v1669_v19 = vmul.f32 %v4079_v7, %v1668_v55  ;;  %v1712_v24 = vmul.f32 %v2102_v31, %v4038_v57  ;;  %vm1672_vm11 = vweird.f32 %v4079_v7  ;;  %vm4150_vm7 = vmor %vm1701_vm8, %vm1702_vm2 }
 0x15d   :  { %v1698_v33 = vsub.f32 1.0, %v1697_v4  ;;  %v1684_v3 = vmul.f32 %v4085_v25, %v1683_v63  ;;  %v1707_v4 = vand.u32 2147483648, %v4030_v22  ;;  %v1705_v63 = vand.u32 2147483647, %v4030_v22  ;;  %vm4167_vm8 = vmor %vm1686_vm1, %vm1687_vm5 }
 0x15e   :  { %vm1716_vm12 = vweird.f32 %v4038_v57  ;;  %vm1612_vm0 = vweird.f32 %v4043_v62  ;;  %v1713_v22 = vsub.f32 1.0, %v1712_v24  ;;  %vm1717_vm14 = vweird.f32 %v2102_v31  ;;  %vm4177_vm13 = vmor %vm1671_vm10, %vm1672_vm11 }
 0x15f   :  { %v1699_v51 = vmul.f32 %v4116_v48, %v1698_v33  ;;  %v1722_v33 = vand.u32 2147483648, %v4038_v57  ;;  %v1685_v55 = vadd.f32 %v4085_v25, %v1684_v3  ;;  %v1720_v12 = vand.u32 2147483647, %v4038_v57  ;;  %vm4196_vm10 = vmor %vm1716_vm12, %vm1717_vm14 }
 0x160   :  { %vm1657_vm9 = vweird.f32 %v4074_v13  ;;  %v1677_v20 = vand.u32 2147483648, %v3988_v60  ;;  %v1708_v58 = vor.u32 1.1754944e-38, %v1707_v4  ;;  %v1670_v24 = vadd.f32 %v4079_v7, %v1669_v19 }
 0x161   :  { %v1700_v59 = vadd.f32 %v4116_v48, %v1699_v51  ;;  %v1639_v51 = vmul.f32 %v4069_v61, %v1638_v49  ;;  %vm4184_vm1 = vcmp.eq.f32.partialorder %v1705_v63, 8.507059e+37  ;;  %v1714_v4 = vmul.f32 %v2102_v31, %v1713_v22  ;;  %vm4216_vm14 = vmor %vm1656_vm6, %vm1657_vm9 }
 0x162   :  { %v1624_v53 = vmul.f32 %v4056_v45, %v1623_v50  ;;  %vm4189_vm5 = vcmp.eq.f32.partialorder %v1690_v0, 8.507059e+37  ;;  %v1693_v60 = vor.u32 1.1754944e-38, %v1692_v40  ;;  %v1723_v39 = vor.u32 1.1754944e-38, %v1722_v33  ;;  %vm4238_vm6 = vmor %vm1641_vm3, %vm1642_vm15 }
 0x163   :  { %v1704_v42 = vsel %vm4150_vm7, %v4116_v48, %v1700_v59  ;;  %v1655_v48 = vadd.f32 %v4074_v13, %v1654_v44  ;;  %v1689_v50 = vsel %vm4167_vm8, %v4085_v25, %v1685_v55  ;;  %v1715_v0 = vadd.f32 %v2102_v31, %v1714_v4 }
 0x164   :  { %vm4206_vm2 = vcmp.eq.f32.partialorder %v1720_v12, 8.507059e+37  ;;  %v1609_v57 = vmul.f32 %v4043_v62, %v1608_v15  ;;  %vm1627_vm12 = vweird.f32 %v4056_v45  ;;  %v1678_v44 = vor.u32 1.1754944e-38, %v1677_v20 }
 0x165   :  { %v1709_v18 = vsel %vm4184_vm1, %v1708_v58, %v1704_v42  ;;  %vm1566_vm8 = vweird.f32 %v3910_v5  ;;  %vm1567_vm11 = vweird.f32 %v3991_v28  ;;  %v1640_v15 = vadd.f32 %v4069_v61, %v1639_v51 }
 0x166   :  { %v1674_v12 = vsel %vm4177_vm13, %v4079_v7, %v1670_v24  ;;  %vm4228_vm7 = vcmp.eq.f32.partialorder %v1675_v27, 8.507059e+37  ;;  %v1719_v20 = vsel %vm4196_vm10, %v2102_v31, %v1715_v0  ;;  %v4801_v59 = vand.u32 2147483647, %v3979_v46  ;;  %vm4267_vm13 = vmor %vm1626_vm4, %vm1627_vm12 }
 0x167   :  { %v4804_v7 = vand.u32 2147483648, %v3979_v46  ;;  %v1694_v14 = vsel %vm4189_vm5, %v1693_v60, %v1689_v50  ;;  %v1724_v31 = vsel %vm4206_vm2, %v1723_v39, %v1719_v20  ;;  %vm1551_vm3 = vweird.f32 %v3925_v38 }
 0x168   :  { %vm4244_vm9 = vcmp.eq.f32.partialorder %v4801_v59, 8.507059e+37  ;;  %v1625_v55 = vadd.f32 %v4056_v45, %v1624_v53  ;;  %v1659_v22 = vsel %vm4216_vm14, %v4074_v13, %v1655_v48  ;;  %v1710_v51 = vmul.f32 %v1709_v18, %v4035_v30  ;;  %v4850_v48 = vld [vmem:[#allocation32_spill] sm:$0xff] }
 0x169   :  { %v1663_v27 = vor.u32 1.1754944e-38, %v4804_v7  ;;  %v1725_v24 = vmul.f32 %v1724_v31, %v4045_v36  ;;  %vm1597_vm15 = vweird.f32 %v4024_v37  ;;  %v1617_v46 = vand.u32 2147483648, %v3950_v26  ;;  %v4832_v7 = vld [vmem:[#allocation37_spill] sm:$0xff] }
 0x16a   :  { %v4807_v53 = vand.u32 2147483648, %v3970_v54  ;;  %v1679_v30 = vsel %vm4228_vm7, %v1678_v44, %v1674_v12  ;;  %vm1536_vm2 = vweird.f32 %v3903_v56  ;;  %v1610_v36 = vadd.f32 %v4043_v62, %v1609_v57 }
 0x16b   :  { %v1644_v13 = vsel %vm4238_vm6, %v4069_v61, %v1640_v15  ;;  %v4808_v3 = vand.u32 2147483647, %v3970_v54  ;;  %v1695_v19 = vmul.f32 %v1694_v14, %v4027_v35  ;;  %1728 = vmatpush.msra.mxu0 %v1725_v24  ;;  %v1600_v60 = vand.u32 2147483647, %v3931_v9  ;;  %v4834_v14 = vld [vmem:[#allocation28_spill] sm:$0xff]  ;;  %v4878_v24 = vld [vmem:[#allocation18_spill] sm:$0xff] }
 0x16c   :  { %v1648_v42 = vor.u32 1.1754944e-38, %v4807_v53  ;;  %v1602_v39 = vand.u32 2147483648, %v3931_v9  ;;  %vm4811_vm1 = vweird.f32 %v3950_v26  ;;  %v4814_v54 = vand.u32 2147483648, %v3960_v34  ;;  %v4841_v53 = vld [vmem:[#allocation27_spill] sm:$0xff] }
 0x16d   :  { %vm4282_vm4 = vcmp.eq.f32.partialorder %v4808_v3, 8.507059e+37  ;;  %vm4293_vm5 = vmor %vm4811_vm1, %vm1612_vm0  ;;  %v1664_v50 = vsel %vm4244_vm9, %v1663_v27, %v1659_v22  ;;  %vm1521_vm10 = vweird.f32 %v3895_v29  ;;  %v1595_v35 = vadd.f32 %v4024_v37, %v4119_v17  ;;  %1729 = vmatpush.msra.mxu0 %v1710_v51 }
 0x16e   :  { %v1633_v61 = vor.u32 1.1754944e-38, %v4814_v54  ;;  %v1629_v0 = vsel %vm4267_vm13, %v4056_v45, %v1625_v55  ;;  %v4815_v40 = vand.u32 2147483647, %v3960_v34  ;;  %v1680_v63 = vmul.f32 %v1679_v30, %v4021_v11  ;;  %v4843_v30 = vld [vmem:[#allocation24_spill] sm:$0xff] }
 0x16f   :  { %v4818_v44 = vsub.f32 1.0, %v4065_v23  ;;  %v1587_v15 = vand.u32 2147483648, %v3919_v43  ;;  %vm4819_vm7 = vweird.f32 %v3931_v9  ;;  %v1618_v34 = vor.u32 1.1754944e-38, %v1617_v46  ;;  %1730 = vmatpush.msra.mxu0 %v1695_v19  ;;  %v4840_v46 = vld [vmem:[#allocation34_spill] sm:$0xff] }
 0x170   :  { %vm4309_vm0 = vcmp.eq.f32.partialorder %v4815_v40, 8.507059e+37  ;;  %vm4322_vm12 = vmor %vm4819_vm7, %vm1597_vm15  ;;  %v1649_v45 = vsel %vm4282_vm4, %v1648_v42, %v1644_v13  ;;  %vm1506_vm14 = vweird.f32 %v3885_v41  ;;  %v1580_v11 = vadd.f32 %v4001_v8, %v4102_v32 }
 0x171   :  { %v1549_v18 = vmul.f32 %v4012_v6, %v4818_v44  ;;  %v1614_v23 = vsel %vm4293_vm5, %v4043_v62, %v1610_v36  ;;  %v4822_v12 = vand.u32 2147483647, %v3950_v26  ;;  %v1665_v25 = vmul.f32 %v1664_v50, %v4018_v21  ;;  %1731 = vmatpush.msra.mxu0 %v1680_v63 }
 0x172   :  { %v4825_v20 = vsub.f32 1.0, %v4061_v1  ;;  %vm1552_vm9 = vweird.f32 %v4012_v6  ;;  %vm4826_vm15 = vweird.f32 %v4001_v8  ;;  %vm4827_vm13 = vweird.f32 %v3919_v43 }
 0x173   :  { %vm4336_vm6 = vcmp.eq.f32.partialorder %v4822_v12, 8.507059e+37  ;;  %vm4349_vm4 = vmor %vm4827_vm13, %vm4826_vm15  ;;  %v1603_v26 = vor.u32 1.1754944e-38, %v1602_v39  ;;  %v1634_v32 = vsel %vm4309_vm0, %v1633_v61, %v1629_v0  ;;  %vm1491_vm1 = vweird.f32 %v3875_v2  ;;  %1732 = vmatpush.msra.mxu0 %v1665_v25  ;;  %v4851_v61 = vld [vmem:[#allocation26_spill] sm:$0xff] }
 0x174   :  { %v1534_v58 = vmul.f32 %v3981_v10, %v4825_v20  ;;  %vm1492_vm5 = vweird.f32 %v3953_v47  ;;  %v1565_v21 = vadd.f32 %v3991_v28, %v4091_v16  ;;  %v1599_v1 = vsel %vm4322_vm12, %v4024_v37, %v1595_v35  ;;  %vm4375_vm15 = vmor %vm1566_vm8, %vm1567_vm11  ;;  %v4873_v16 = vld [vmem:[#allocation29_spill] sm:$0xff] }
 0x175   :  { %vm4362_vm7 = vcmp.eq.f32.partialorder %v1600_v60, 8.507059e+37  ;;  %v1650_v33 = vmul.f32 %v1649_v45, %v4015_v52  ;;  %v4833_v27 = vsub.f32 1.0, %v4832_v7  ;;  %vm1537_vm0 = vweird.f32 %v3981_v10  ;;  %vm4400_vm8 = vmor %vm1551_vm3, %vm1552_vm9 }
 0x176   :  { %v1588_v37 = vor.u32 1.1754944e-38, %v1587_v15  ;;  %v1619_v55 = vsel %vm4336_vm6, %v1618_v34, %v1614_v23  ;;  %v1550_v52 = vadd.f32 %v4012_v6, %v1549_v18  ;;  %v1584_v22 = vsel %vm4349_vm4, %v4001_v8, %v1580_v11  ;;  %vm4427_vm9 = vmor %vm1536_vm2, %vm1537_vm0  ;;  %v4859_v15 = vld [vmem:[#allocation30_spill] sm:$0xff] }
 0x177   :  { %v1519_v31 = vmul.f32 %v4834_v14, %v4833_v27  ;;  %v4837_v51 = vand.u32 2147483647, %v3919_v43  ;;  %v1635_v49 = vmul.f32 %v1634_v32, %v4840_v46  ;;  %v4842_v42 = vsub.f32 1.0, %v4841_v53  ;;  %1733 = vmatpush.msra.mxu0 %v1650_v33  ;;  %v4879_v46 = vld [vmem:[#allocation21_spill] sm:$0xff] }
 0x178   :  { %vm1522_vm11 = vweird.f32 %v4834_v14  ;;  %v4846_v43 = vand.u32 2147483648, %v3910_v5  ;;  %v1604_v3 = vsel %vm4362_vm7, %v1603_v26, %v1599_v1  ;;  %v1535_v4 = vadd.f32 %v3981_v10, %v1534_v58  ;;  %v4866_v58 = vld [vmem:[#allocation25_spill] sm:$0xff] }
 0x179   :  { %vm4387_vm12 = vcmp.eq.f32.partialorder %v4837_v51, 8.507059e+37  ;;  %v1504_v36 = vmul.f32 %v4843_v30, %v4842_v42  ;;  %v1569_v19 = vsel %vm4375_vm15, %v3991_v28, %v1565_v21  ;;  %v4847_v60 = vand.u32 2147483647, %v3910_v5  ;;  %1734 = vmatpush.msra.mxu0 %v1635_v49  ;;  %vm4452_vm2 = vmor %vm1521_vm10, %vm1522_vm11  ;;  %v4880_v42 = vld [vmem:[#allocation33_spill] sm:$0xff] }
 0x17a   :  { %v1573_v13 = vor.u32 1.1754944e-38, %v4846_v43  ;;  %v1620_v54 = vmul.f32 %v1619_v55, %v4850_v48  ;;  %v4852_v50 = vsub.f32 1.0, %v4851_v61  ;;  %vm1507_vm3 = vweird.f32 %v4843_v30  ;;  %v4874_v55 = vld [vmem:[#allocation20_spill] sm:$0xff]  ;;  %v4881_v43 = vld [vmem:[#allocation17_spill] sm:$0xff] }
 0x17b   :  { %vm4414_vm6 = vcmp.eq.f32.partialorder %v4847_v60, 8.507059e+37  ;;  %v4855_v5 = vand.u32 2147483648, %v3925_v38  ;;  %v1589_v40 = vsel %vm4387_vm12, %v1588_v37, %v1584_v22  ;;  %v1520_v57 = vadd.f32 %v4834_v14, %v1519_v31  ;;  %vm4477_vm10 = vmor %vm1506_vm14, %vm1507_vm3  ;;  %v4872_v31 = vld [vmem:[#allocation36_spill] sm:$0xff]  ;;  %v1726_v28 = vld [vmem:[#allocation9] sm:$0xff] }
 0x17c   :  { %v1489_v35 = vmul.f32 %v3953_v47, %v4852_v50  ;;  %v1554_v63 = vsel %vm4400_vm8, %v4012_v6, %v1550_v52  ;;  %v4856_v44 = vand.u32 2147483647, %v3925_v38  ;;  %v1605_v17 = vmul.f32 %v1604_v3, %v4859_v15  ;;  %1735 = vmatpush.msra.mxu0 %v1620_v54  ;;  %v4875_v52 = vld [vmem:[#allocation19_spill] sm:$0xff]  ;;  %vm4500_vm14 = vmor %vm1491_vm1, %vm1492_vm5 }
 0x17d   :  { %v1558_v0 = vor.u32 1.1754944e-38, %v4855_v5  ;;  %v1510_v34 = vand.u32 2147483647, %v3885_v41  ;;  %v1512_v45 = vand.u32 2147483648, %v3885_v41  ;;  %v4862_v38 = vand.u32 2147483648, %v3903_v56  ;;  %v4871_v41 = vld [vmem:[#allocation23_spill] sm:$0xff] }
 0x17e   :  { %vm4441_vm13 = vcmp.eq.f32.partialorder %v4856_v44, 8.507059e+37  ;;  %v1574_v23 = vsel %vm4414_vm6, %v1573_v13, %v1569_v19  ;;  %v1505_v12 = vadd.f32 %v4843_v30, %v1504_v36  ;;  %v1539_v9 = vsel %vm4427_vm9, %v3981_v10, %v1535_v4  ;;  %1736 = vmatpush.msra.mxu0 %v1605_v17  ;;  %v4882_v13 = vld [vmem:[#allocation14_spill] sm:$0xff] }
 0x17f   :  { %v1543_v6 = vor.u32 1.1754944e-38, %v4862_v38  ;;  %v4863_v25 = vand.u32 2147483647, %v3903_v56  ;;  %v1590_v62 = vmul.f32 %v1589_v40, %v4866_v58  ;;  %v1495_v26 = vand.u32 2147483647, %v3875_v2  ;;  %v4883_v19 = vld [vmem:[#allocation22_spill] sm:$0xff] }
 0x180   :  { %v1497_v32 = vand.u32 2147483648, %v3875_v2  ;;  %v4869_v56 = vand.u32 2147483648, %v3895_v29  ;;  %v1559_v1 = vsel %vm4441_vm13, %v1558_v0, %v1554_v63  ;;  %v1490_v59 = vadd.f32 %v3953_v47, %v1489_v35  ;;  %v1727_v35 = vld [vmem:[#allocation2] sm:$0xff] }
 0x181   :  { %vm4466_vm4 = vcmp.eq.f32.partialorder %v4863_v25, 8.507059e+37  ;;  %v1524_v33 = vsel %vm4452_vm2, %v4834_v14, %v1520_v57  ;;  %v4870_v7 = vand.u32 2147483647, %v3895_v29  ;;  %v1575_v27 = vmul.f32 %v1574_v23, %v4871_v41  ;;  %1737 = vmatpush.msra.mxu0 %v1590_v62 }
 0x182   :  { %v1528_v10 = vor.u32 1.1754944e-38, %v4869_v56  ;;  %v1340_v37 = vadd.f32 %v4873_v16, %v4872_v31  ;;  %v1438_v22 = vmul.f32 %v4875_v52, %v4874_v55  ;;  %v1513_v14 = vor.u32 1.1754944e-38, %v1512_v45 }
 0x183   :  { %vm1526_vm7 = vcmp.eq.f32.partialorder %v4870_v7, 8.507059e+37  ;;  %v1544_v29 = vsel %vm4466_vm4, %v1543_v6, %v1539_v9  ;;  %v1456_v49 = vadd.f32 %v4879_v46, %v4878_v24  ;;  %v1509_v53 = vsel %vm4477_vm10, %v4843_v30, %v1505_v12  ;;  %1738 = vmatpush.msra.mxu0 %v1575_v27 }
 0x184   :  { %vm1511_vm0 = vcmp.eq.f32.partialorder %v1510_v34, 8.507059e+37  ;;  %v1560_v36 = vmul.f32 %v1559_v1, %v4880_v42  ;;  %v1498_v2 = vor.u32 1.1754944e-38, %v1497_v32  ;;  %v1529_v8 = vsel %vm1526_vm7, %v1528_v10, %v1524_v33 }
 0x185   :  { %v1455_v3 = vadd.f32 %v4882_v13, %v4881_v43  ;;  %v1494_v4 = vsel %vm4500_vm14, %v3953_v47, %v1490_v59  ;;  %vm1496_vm1 = vcmp.eq.f32.partialorder %v1495_v26, 8.507059e+37  ;;  %v1545_v60 = vmul.f32 %v1544_v29, %v4883_v19 }
 0x186   :  { %v1514_v39 = vsel %vm1511_vm0, %v1513_v14, %v1509_v53  ;;  %v1454_v48 = vadd.f32 %v1438_v22, %v1340_v37  ;;  %v1530_v30 = vmul.f32 %v1529_v8, %v1456_v49  ;;  %1739 = vmatpush.msra.mxu0 %v1560_v36  ;;  %v1499_v54 = vsel %vm1496_vm1, %v1498_v2, %v1494_v4 }
 0x187   :  { %v1515_v61 = vmul.f32 %v1514_v39, %v1455_v3 }
 0x188   :  { %1740 = vmatpush.msra.mxu0 %v1545_v60  ;;  %v1500_v50 = vmul.f32 %v1499_v54, %v1454_v48 }
 0x18a   :  { %1741 = vmatpush.msra.mxu0 %v1530_v30 }
 0x18c   :  { %1742 = vmatpush.msra.mxu0 %v1515_v61 }
 0x18e   :  { %1743 = vmatpush.msra.mxu0 %v1500_v50 }
 0x18f   :  { %1744 = vmatmul.f32.vlgmr.msra.gmra.mxu0 %v1727_v35 }
 0x20c   :  { %v1745_v47 = vpop.f32.mrf.mxu0 }
 0x20d   :  { %v1748_v5 = vadd.f32 %v1745_v47, %v1726_v28 }
 0x20f   :  { %1749 = vst [vmem:[#allocation9] sm:$0xff] %v1748_v5 }
 0x210   :  { %1760 = dma.vmem_to_hbm [thread:$0]  %s1756_s12, 128, %s1758_s15, [#allocation4]  }
 0x211   :  { %2320 = dma.done.wait [#allocation4], 128  }
 0x212   :  { %2321 = vsyncadd [#allocation4], 4294967168 }
 0x213   :  { %1765 = vsyncpa [#allocation3], 1 }
 0x214   :  { %1766 = vsyncpa [#allocation7], 1 }
 0x215   :  { %1767 = vsyncpa [#allocation4], 1 }
 0x216   :  { %1768 = vsyncpa [#allocation5], 1 }

</bundles_post_ra>
